<compile_context>
chip_gen: v7x
topology: tpu7x:2x2x1
jax: 0.10.0
libtpu: 0.0.40
codegen_flags: <defaults>
</compile_context>

<pallas_src>
import functools

import jax
import jax.numpy as jnp
from jax import lax
from jax.experimental import pallas as pl
from jax.experimental.pallas import tpu as pltpu


# ---------------------------------------------------------------------------
# Activation list (cyclic per-output-column, mirroring the PyTorch module's
# `activation_functions` constructor argument).
# ---------------------------------------------------------------------------
ACTIVATIONS = (
    ("tanh", jnp.tanh),
    ("sin", jnp.sin),
    ("relu", lambda v: jnp.maximum(v, 0.0)),
)
NUM_ACT = len(ACTIVATIONS)


# ---------------------------------------------------------------------------
# Static helpers (pure Python / trace-time).
# ---------------------------------------------------------------------------
def _choose_batch_tile(B, max_tile=1024):
    """Batch tile lives on the LANE axis. Use a single tile covering B whenever
    it fits (no per-grid-step overhead; the kernel is latency-bound at small
    hidden sizes); otherwise the largest 128-multiple cap so lane loads/stores
    stay unmasked."""
    if B <= max_tile:
        return B
    return max_tile


def _cyclic_row_activation(y, n_out):
    """Apply ACTIVATIONS[row % NUM_ACT] per sublane-row of the feature-major
    tile y (n_out, tb). Only the activations actually present are computed; the
    result stays in vregs (no VMEM scratch)."""
    n_act = min(n_out, NUM_ACT)
    if n_act == 1:
        return ACTIVATIONS[0][1](y)
    out = ACTIVATIONS[n_act - 1][1](y)
    row = lax.broadcasted_iota(jnp.int32, y.shape, 0) % NUM_ACT
    for idx in range(n_act - 2, -1, -1):
        out = jnp.where(row == idx, ACTIVATIONS[idx][1](y), out)
    return out


# ---------------------------------------------------------------------------
# Fused Pallas kernel: all layers in one body, activations kept in vregs.
# Refs layout: (x_ref, w_0, b_0, ..., w_{D-1}, b_{D-1}, o_ref).
# ---------------------------------------------------------------------------
def _make_fused_kernel(depth, compute_dtype):
    def kernel(x_ref, *refs):
        o_ref = refs[2 * depth]
        h = x_ref[...].astype(jnp.float32)           # (in0, tb): batch on lanes
        for l in range(depth):
            w = refs[2 * l][...]                     # (out, in)  PyTorch layout
            b = refs[2 * l + 1][...]                 # (out, 1)
            k_dim = w.shape[1]
            if l == 0 and k_dim <= 8:
                # Tiny contraction (K = in0 = 4): VPU broadcast-FMA outer
                # products instead of an MXU matmul at ~3% contraction-dim use.
                y = w[:, 0:1].astype(jnp.float32) * h[0:1, :]
                for k in range(1, k_dim):
                    y = y + w[:, k:k + 1].astype(jnp.float32) * h[k:k + 1, :]
            else:
                y = jnp.dot(w.astype(compute_dtype), h.astype(compute_dtype),
                            preferred_element_type=jnp.float32)
            y = y + b.astype(jnp.float32)
            h = _cyclic_row_activation(y, y.shape[0])
        o_ref[...] = h.astype(o_ref.dtype)           # (out_f, tb) lane-dense

    return kernel


@functools.partial(jax.jit, static_argnames=("batch_tile", "compute_dtype"))
def vdlnn_forward(x, params, batch_tile=None, compute_dtype=jnp.float32):
    """x: (B, in0); params: list of (W:(out,in), b:(out,)) in PyTorch layout."""
    B, in0 = x.shape
    depth = len(params)
    out_f = params[-1][0].shape[0]
    tb = batch_tile if batch_tile is not None else _choose_batch_tile(B)
    grid = (pl.cdiv(B, tb),)

    # Layout plumbing only: present x feature-major so the batch rides on lanes.
    xt = x.T                                          # (in0, B)

    in_specs = [pl.BlockSpec((in0, tb), lambda i: (0, i))]
    flat_inputs = [xt]
    for (w, b) in params:
        # Constant index_map => weights/biases stay resident in VMEM across all
        # grid steps.  (For big hidden/depth configs stream them over an extra
        # 'arbitrary' grid axis or store bf16 to fit v7x's 64 MiB VMEM.)
        in_specs.append(pl.BlockSpec(w.shape, lambda i: (0, 0)))
        in_specs.append(pl.BlockSpec((w.shape[0], 1), lambda i: (0, 0)))
        flat_inputs.append(w)
        flat_inputs.append(b.reshape(w.shape[0], 1))

    kernel = _make_fused_kernel(depth, compute_dtype)

    flops = 2 * B * sum(w.shape[0] * w.shape[1] for (w, _) in params)
    transcendentals = B * sum(w.shape[0] for (w, _) in params)
    bytes_accessed = 4 * (x.size + sum(w.size + b.size for (w, b) in params)
                          + B * out_f)

    out_t = pl.pallas_call(
        kernel,
        out_shape=jax.ShapeDtypeStruct((out_f, B), jnp.float32),
        grid_spec=pltpu.PrefetchScalarGridSpec(
            num_scalar_prefetch=0,
            grid=grid,
            in_specs=in_specs,
            out_specs=pl.BlockSpec((out_f, tb), lambda i: (0, i)),
        ),
        compiler_params=pltpu.CompilerParams(
            dimension_semantics=("parallel",),
        ),
        cost_estimate=pl.CostEstimate(
            flops=int(flops),
            transcendentals=int(transcendentals),
            bytes_accessed=int(bytes_accessed),
        ),
    )(*flat_inputs)
    return out_t.T                                    # back to (B, out_f)


# ---------------------------------------------------------------------------
# Parameter init (xavier_uniform weights / zero bias, matching
# VDL.reset_parameters()), PyTorch layout (out, in).
# ---------------------------------------------------------------------------
def init_vdl_params(key, in_features, out_features):
    bound = jnp.sqrt(6.0 / (in_features + out_features))
    weight = jax.random.uniform(
        key, (out_features, in_features), jnp.float32, minval=-bound, maxval=bound
    )
    bias = jnp.zeros((out_features,), jnp.float32)
    return weight, bias


def init_vdlnn_params(key, input_size, hidden_size, output_size, depth):
    sizes = [input_size] + [hidden_size] * (depth - 1) + [output_size]
    params = []
    for li in range(depth):
        key, sub = jax.random.split(key)
        params.append(init_vdl_params(sub, sizes[li], sizes[li + 1]))
    return params


# ---------------------------------------------------------------------------
# Pure-JAX reference (original batch-major layout, per-column cyclic act).
# ---------------------------------------------------------------------------
def ref_forward(x, params):
    h = x
    for (w, b) in params:
        y = jnp.dot(h, w.T, precision=lax.Precision.HIGHEST) + b
        cols = jnp.arange(y.shape[1]) % NUM_ACT
        out = ACTIVATIONS[NUM_ACT - 1][1](y)
        for idx in range(NUM_ACT - 2, -1, -1):
            out = jnp.where(cols[None, :] == idx, ACTIVATIONS[idx][1](y), out)
        h = out
    return h


# ---------------------------------------------------------------------------
# Main
# ---------------------------------------------------------------------------
if __name__ == "__main__":
    # VDLNN(input_size=4, hidden_size=32, output_size=2, depth=3), batch=256.
    batch, input_size, hidden_size, output_size, depth = 256, 4, 32, 2, 3

    key = jax.random.PRNGKey(0)
    key_x, key_p = jax.random.split(key)
    x = jax.random.normal(key_x, (batch, input_size), jnp.float32)
    params = init_vdlnn_params(key_p, input_size, hidden_size, output_size, depth)

    out = vdlnn_forward(x, params)
    jax.block_until_ready(out)

    ref = ref_forward(x, params)
    assert out.shape == (batch, output_size)
    max_err = float(jnp.max(jnp.abs(out - ref)))
    # Tolerance covers f32 contraction-order differences (W@h vs h@W.T, and the
    # layer-0 FMA accumulation order); loosen further if compute_dtype=bf16.
    assert jnp.allclose(out, ref, atol=1e-4, rtol=1e-4), f"max_err={max_err}"

    print("KERNEL_OK")
</pallas_src>

<mosaic_0001>
module attributes {stable_mosaic.version = 11 : i64} {
  func.func @kernel(%arg0: i32, %arg1: memref<4x256xf32, #tpu.memory_space<vmem>>, %arg2: memref<32x4xf32, #tpu.memory_space<vmem>>, %arg3: memref<32x1xf32, #tpu.memory_space<vmem>>, %arg4: memref<32x32xf32, #tpu.memory_space<vmem>>, %arg5: memref<32x1xf32, #tpu.memory_space<vmem>>, %arg6: memref<2x32xf32, #tpu.memory_space<vmem>>, %arg7: memref<2x1xf32, #tpu.memory_space<vmem>>, %arg8: memref<2x256xf32, #tpu.memory_space<vmem>>) attributes {dimension_semantics = [#tpu.dimension_semantics<parallel>], iteration_bounds = array<i64: 1>, scalar_prefetch = 0 : i64, scratch_operands = 0 : i64, tpu.core_type = #tpu.core_type<tc>, window_params = [{transform_indices = @transform_0, window_bounds = array<i64: 4, 256>}, {pipeline_mode = #tpu.pipeline_mode<synchronous>, transform_indices = @transform_1, window_bounds = array<i64: 32, 4>}, {pipeline_mode = #tpu.pipeline_mode<synchronous>, transform_indices = @transform_2, window_bounds = array<i64: 32, 1>}, {pipeline_mode = #tpu.pipeline_mode<synchronous>, transform_indices = @transform_3, window_bounds = array<i64: 32, 32>}, {pipeline_mode = #tpu.pipeline_mode<synchronous>, transform_indices = @transform_4, window_bounds = array<i64: 32, 1>}, {pipeline_mode = #tpu.pipeline_mode<synchronous>, transform_indices = @transform_5, window_bounds = array<i64: 2, 32>}, {pipeline_mode = #tpu.pipeline_mode<synchronous>, transform_indices = @transform_6, window_bounds = array<i64: 2, 1>}, {transform_indices = @transform_7, window_bounds = array<i64: 2, 256>}]} {
    %c0 = arith.constant 0 : index
    %c0_0 = arith.constant 0 : index
    %0 = vector.load %arg1[%c0, %c0_0] : memref<4x256xf32, #tpu.memory_space<vmem>>, vector<4x256xf32>
    %c0_1 = arith.constant 0 : index
    %c0_2 = arith.constant 0 : index
    %1 = vector.load %arg2[%c0_1, %c0_2] : memref<32x4xf32, #tpu.memory_space<vmem>>, vector<32x4xf32>
    %c0_3 = arith.constant 0 : index
    %c0_4 = arith.constant 0 : index
    %2 = vector.load %arg3[%c0_3, %c0_4] : memref<32x1xf32, #tpu.memory_space<vmem>>, vector<32x1xf32>
    %3 = vector.extract_strided_slice %1 {offsets = [0, 0], sizes = [32, 1], strides = [1, 1]} : vector<32x4xf32> to vector<32x1xf32>
    %4 = vector.extract_strided_slice %0 {offsets = [0, 0], sizes = [1, 256], strides = [1, 1]} : vector<4x256xf32> to vector<1x256xf32>
    %5 = vector.broadcast %3 : vector<32x1xf32> to vector<32x256xf32>
    %6 = vector.broadcast %4 : vector<1x256xf32> to vector<32x256xf32>
    %7 = arith.mulf %5, %6 : vector<32x256xf32>
    %8 = vector.extract_strided_slice %1 {offsets = [0, 1], sizes = [32, 1], strides = [1, 1]} : vector<32x4xf32> to vector<32x1xf32>
    %9 = vector.extract_strided_slice %0 {offsets = [1, 0], sizes = [1, 256], strides = [1, 1]} : vector<4x256xf32> to vector<1x256xf32>
    %10 = vector.broadcast %8 : vector<32x1xf32> to vector<32x256xf32>
    %11 = vector.broadcast %9 : vector<1x256xf32> to vector<32x256xf32>
    %12 = arith.mulf %10, %11 : vector<32x256xf32>
    %13 = arith.addf %7, %12 : vector<32x256xf32>
    %14 = vector.extract_strided_slice %1 {offsets = [0, 2], sizes = [32, 1], strides = [1, 1]} : vector<32x4xf32> to vector<32x1xf32>
    %15 = vector.extract_strided_slice %0 {offsets = [2, 0], sizes = [1, 256], strides = [1, 1]} : vector<4x256xf32> to vector<1x256xf32>
    %16 = vector.broadcast %14 : vector<32x1xf32> to vector<32x256xf32>
    %17 = vector.broadcast %15 : vector<1x256xf32> to vector<32x256xf32>
    %18 = arith.mulf %16, %17 : vector<32x256xf32>
    %19 = arith.addf %13, %18 : vector<32x256xf32>
    %20 = vector.extract_strided_slice %1 {offsets = [0, 3], sizes = [32, 1], strides = [1, 1]} : vector<32x4xf32> to vector<32x1xf32>
    %21 = vector.extract_strided_slice %0 {offsets = [3, 0], sizes = [1, 256], strides = [1, 1]} : vector<4x256xf32> to vector<1x256xf32>
    %22 = vector.broadcast %20 : vector<32x1xf32> to vector<32x256xf32>
    %23 = vector.broadcast %21 : vector<1x256xf32> to vector<32x256xf32>
    %24 = arith.mulf %22, %23 : vector<32x256xf32>
    %25 = arith.addf %19, %24 : vector<32x256xf32>
    %26 = vector.broadcast %2 : vector<32x1xf32> to vector<32x256xf32>
    %27 = arith.addf %25, %26 : vector<32x256xf32>
    %cst = arith.constant 0.000000e+00 : f32
    %28 = vector.broadcast %cst : f32 to vector<32x256xf32>
    %29 = arith.maximumf %27, %28 : vector<32x256xf32>
    %30 = tpu.iota {dimensions = array<i32: 0>} : vector<32x256xi32>
    %c3_i32 = arith.constant 3 : i32
    %c0_i32 = arith.constant 0 : i32
    %31 = arith.cmpi eq, %c3_i32, %c0_i32 : i32
    %c1_i32 = arith.constant 1 : i32
    %32 = arith.select %31, %c1_i32, %c3_i32 : i32
    %33 = vector.broadcast %32 : i32 to vector<32x256xi32>
    %34 = arith.remsi %30, %33 : vector<32x256xi32>
    %c0_i32_5 = arith.constant 0 : i32
    %35 = vector.broadcast %c0_i32_5 : i32 to vector<32x256xi32>
    %36 = arith.cmpi ne, %34, %35 : vector<32x256xi32>
    %c0_i32_6 = arith.constant 0 : i32
    %37 = vector.broadcast %c0_i32_6 : i32 to vector<32x256xi32>
    %38 = arith.cmpi slt, %34, %37 : vector<32x256xi32>
    %c0_i32_7 = arith.constant 0 : i32
    %39 = arith.cmpi slt, %32, %c0_i32_7 : i32
    %40 = vector.broadcast %39 : i1 to vector<32x256xi1>
    %41 = vector.broadcast %40 : vector<32x256xi1> to vector<32x256xi1>
    %42 = arith.xori %38, %41 : vector<32x256xi1>
    %43 = arith.andi %42, %36 : vector<32x256xi1>
    %44 = vector.broadcast %32 : i32 to vector<32x256xi32>
    %45 = arith.addi %34, %44 : vector<32x256xi32>
    %46 = arith.select %43, %45, %34 : vector<32x256xi1>, vector<32x256xi32>
    %c1_i32_8 = arith.constant 1 : i32
    %47 = vector.broadcast %c1_i32_8 : i32 to vector<32x256xi32>
    %48 = arith.cmpi eq, %46, %47 : vector<32x256xi32>
    %49 = math.sin %27 : vector<32x256xf32>
    %50 = arith.select %48, %49, %29 : vector<32x256xi1>, vector<32x256xf32>
    %c0_i32_9 = arith.constant 0 : i32
    %51 = vector.broadcast %c0_i32_9 : i32 to vector<32x256xi32>
    %52 = arith.cmpi eq, %46, %51 : vector<32x256xi32>
    %53 = math.tanh %27 : vector<32x256xf32>
    %54 = arith.select %52, %53, %50 : vector<32x256xi1>, vector<32x256xf32>
    %c0_10 = arith.constant 0 : index
    %c0_11 = arith.constant 0 : index
    %55 = vector.load %arg4[%c0_10, %c0_11] : memref<32x32xf32, #tpu.memory_space<vmem>>, vector<32x32xf32>
    %c0_12 = arith.constant 0 : index
    %c0_13 = arith.constant 0 : index
    %56 = vector.load %arg5[%c0_12, %c0_13] : memref<32x1xf32, #tpu.memory_space<vmem>>, vector<32x1xf32>
    %cst_14 = arith.constant dense<0.000000e+00> : vector<32x256xf32>
    %57 = tpu.matmul %55, %54, %cst_14 {dimension_numbers = #tpu.dot_dimension_numbers<[1], [0], [0], [1], [0, 0, 1, 1], [], []>} : vector<32x32xf32>, vector<32x256xf32>, vector<32x256xf32> -> vector<32x256xf32>
    %58 = vector.broadcast %56 : vector<32x1xf32> to vector<32x256xf32>
    %59 = arith.addf %57, %58 : vector<32x256xf32>
    %cst_15 = arith.constant 0.000000e+00 : f32
    %60 = vector.broadcast %cst_15 : f32 to vector<32x256xf32>
    %61 = arith.maximumf %59, %60 : vector<32x256xf32>
    %62 = tpu.iota {dimensions = array<i32: 0>} : vector<32x256xi32>
    %c3_i32_16 = arith.constant 3 : i32
    %c0_i32_17 = arith.constant 0 : i32
    %63 = arith.cmpi eq, %c3_i32_16, %c0_i32_17 : i32
    %c1_i32_18 = arith.constant 1 : i32
    %64 = arith.select %63, %c1_i32_18, %c3_i32_16 : i32
    %65 = vector.broadcast %64 : i32 to vector<32x256xi32>
    %66 = arith.remsi %62, %65 : vector<32x256xi32>
    %c0_i32_19 = arith.constant 0 : i32
    %67 = vector.broadcast %c0_i32_19 : i32 to vector<32x256xi32>
    %68 = arith.cmpi ne, %66, %67 : vector<32x256xi32>
    %c0_i32_20 = arith.constant 0 : i32
    %69 = vector.broadcast %c0_i32_20 : i32 to vector<32x256xi32>
    %70 = arith.cmpi slt, %66, %69 : vector<32x256xi32>
    %c0_i32_21 = arith.constant 0 : i32
    %71 = arith.cmpi slt, %64, %c0_i32_21 : i32
    %72 = vector.broadcast %71 : i1 to vector<32x256xi1>
    %73 = vector.broadcast %72 : vector<32x256xi1> to vector<32x256xi1>
    %74 = arith.xori %70, %73 : vector<32x256xi1>
    %75 = arith.andi %74, %68 : vector<32x256xi1>
    %76 = vector.broadcast %64 : i32 to vector<32x256xi32>
    %77 = arith.addi %66, %76 : vector<32x256xi32>
    %78 = arith.select %75, %77, %66 : vector<32x256xi1>, vector<32x256xi32>
    %c1_i32_22 = arith.constant 1 : i32
    %79 = vector.broadcast %c1_i32_22 : i32 to vector<32x256xi32>
    %80 = arith.cmpi eq, %78, %79 : vector<32x256xi32>
    %81 = math.sin %59 : vector<32x256xf32>
    %82 = arith.select %80, %81, %61 : vector<32x256xi1>, vector<32x256xf32>
    %c0_i32_23 = arith.constant 0 : i32
    %83 = vector.broadcast %c0_i32_23 : i32 to vector<32x256xi32>
    %84 = arith.cmpi eq, %78, %83 : vector<32x256xi32>
    %85 = math.tanh %59 : vector<32x256xf32>
    %86 = arith.select %84, %85, %82 : vector<32x256xi1>, vector<32x256xf32>
    %c0_24 = arith.constant 0 : index
    %c0_25 = arith.constant 0 : index
    %87 = vector.load %arg6[%c0_24, %c0_25] : memref<2x32xf32, #tpu.memory_space<vmem>>, vector<2x32xf32>
    %c0_26 = arith.constant 0 : index
    %c0_27 = arith.constant 0 : index
    %88 = vector.load %arg7[%c0_26, %c0_27] : memref<2x1xf32, #tpu.memory_space<vmem>>, vector<2x1xf32>
    %cst_28 = arith.constant dense<0.000000e+00> : vector<2x256xf32>
    %89 = tpu.matmul %87, %86, %cst_28 {dimension_numbers = #tpu.dot_dimension_numbers<[1], [0], [0], [1], [0, 0, 1, 1], [], []>} : vector<2x32xf32>, vector<32x256xf32>, vector<2x256xf32> -> vector<2x256xf32>
    %90 = vector.broadcast %88 : vector<2x1xf32> to vector<2x256xf32>
    %91 = arith.addf %89, %90 : vector<2x256xf32>
    %92 = math.sin %91 : vector<2x256xf32>
    %93 = tpu.iota {dimensions = array<i32: 0>} : vector<2x256xi32>
    %c3_i32_29 = arith.constant 3 : i32
    %c0_i32_30 = arith.constant 0 : i32
    %94 = arith.cmpi eq, %c3_i32_29, %c0_i32_30 : i32
    %c1_i32_31 = arith.constant 1 : i32
    %95 = arith.select %94, %c1_i32_31, %c3_i32_29 : i32
    %96 = vector.broadcast %95 : i32 to vector<2x256xi32>
    %97 = arith.remsi %93, %96 : vector<2x256xi32>
    %c0_i32_32 = arith.constant 0 : i32
    %98 = vector.broadcast %c0_i32_32 : i32 to vector<2x256xi32>
    %99 = arith.cmpi ne, %97, %98 : vector<2x256xi32>
    %c0_i32_33 = arith.constant 0 : i32
    %100 = vector.broadcast %c0_i32_33 : i32 to vector<2x256xi32>
    %101 = arith.cmpi slt, %97, %100 : vector<2x256xi32>
    %c0_i32_34 = arith.constant 0 : i32
    %102 = arith.cmpi slt, %95, %c0_i32_34 : i32
    %103 = vector.broadcast %102 : i1 to vector<2x256xi1>
    %104 = vector.broadcast %103 : vector<2x256xi1> to vector<2x256xi1>
    %105 = arith.xori %101, %104 : vector<2x256xi1>
    %106 = arith.andi %105, %99 : vector<2x256xi1>
    %107 = vector.broadcast %95 : i32 to vector<2x256xi32>
    %108 = arith.addi %97, %107 : vector<2x256xi32>
    %109 = arith.select %106, %108, %97 : vector<2x256xi1>, vector<2x256xi32>
    %c0_i32_35 = arith.constant 0 : i32
    %110 = vector.broadcast %c0_i32_35 : i32 to vector<2x256xi32>
    %111 = arith.cmpi eq, %109, %110 : vector<2x256xi32>
    %112 = math.tanh %91 : vector<2x256xf32>
    %113 = arith.select %111, %112, %92 : vector<2x256xi1>, vector<2x256xf32>
    %c0_36 = arith.constant 0 : index
    %c0_37 = arith.constant 0 : index
    %114 = vector.load %arg8[%c0_36, %c0_37] : memref<2x256xf32, #tpu.memory_space<vmem>>, vector<2x256xf32>
    tpu.vector_store %arg8[%c0_36, %c0_37], %113 {strides = array<i32>} : memref<2x256xf32, #tpu.memory_space<vmem>>, vector<2x256xf32>,
    return
  }
  func.func @transform_0(%arg0: i32) -> (i32, i32) {
    %c0_i32 = arith.constant 0 : i32
    %c0_i32_0 = arith.constant 0 : i32
    return %c0_i32, %arg0 : i32, i32
  }
  func.func @transform_1(%arg0: i32) -> (i32, i32) {
    %c0_i32 = arith.constant 0 : i32
    %c0_i32_0 = arith.constant 0 : i32
    %c0_i32_1 = arith.constant 0 : i32
    return %c0_i32, %c0_i32_0 : i32, i32
  }
  func.func @transform_2(%arg0: i32) -> (i32, i32) {
    %c0_i32 = arith.constant 0 : i32
    %c0_i32_0 = arith.constant 0 : i32
    %c0_i32_1 = arith.constant 0 : i32
    return %c0_i32, %c0_i32_0 : i32, i32
  }
  func.func @transform_3(%arg0: i32) -> (i32, i32) {
    %c0_i32 = arith.constant 0 : i32
    %c0_i32_0 = arith.constant 0 : i32
    %c0_i32_1 = arith.constant 0 : i32
    return %c0_i32, %c0_i32_0 : i32, i32
  }
  func.func @transform_4(%arg0: i32) -> (i32, i32) {
    %c0_i32 = arith.constant 0 : i32
    %c0_i32_0 = arith.constant 0 : i32
    %c0_i32_1 = arith.constant 0 : i32
    return %c0_i32, %c0_i32_0 : i32, i32
  }
  func.func @transform_5(%arg0: i32) -> (i32, i32) {
    %c0_i32 = arith.constant 0 : i32
    %c0_i32_0 = arith.constant 0 : i32
    %c0_i32_1 = arith.constant 0 : i32
    return %c0_i32, %c0_i32_0 : i32, i32
  }
  func.func @transform_6(%arg0: i32) -> (i32, i32) {
    %c0_i32 = arith.constant 0 : i32
    %c0_i32_0 = arith.constant 0 : i32
    %c0_i32_1 = arith.constant 0 : i32
    return %c0_i32, %c0_i32_0 : i32, i32
  }
  func.func @transform_7(%arg0: i32) -> (i32, i32) {
    %c0_i32 = arith.constant 0 : i32
    %c0_i32_0 = arith.constant 0 : i32
    return %c0_i32, %arg0 : i32, i32
  }
}

</mosaic_0001>

<bundles_post_ra>
// kernel: vdlnn_forward.1
= control target key start
LH: loop header
LB: loop body
LE: loop exit
PB: predicated region body
PF: predicated region fallthrough
CT: control target
= control target key end

     0   :  { %v2844_v1 = vmov 3   ;;  %v2845_v2 = vmov 1   ;;  %s4872_s0 = inlined_call_operand.vmem [shape: f32[4,256], index: 0, kind: input, shape index: {}]   ;;  %s4873_s1 = inlined_call_operand.vmem [shape: f32[32,4], index: 1, kind: input, shape index: {}]   ;;  %s4874_s2 = inlined_call_operand.vmem [shape: f32[32,1], index: 2, kind: input, shape index: {}]   ;;  %s4875_s3 = inlined_call_operand.vmem [shape: f32[32,32], index: 3, kind: input, shape index: {}]   ;;  %s4876_s4 = inlined_call_operand.vmem [shape: f32[32,1], index: 4, kind: input, shape index: {}]   ;;  %s4877_s5 = inlined_call_operand.vmem [shape: f32[2,32], index: 5, kind: input, shape index: {}]   ;;  %s4878_s6 = inlined_call_operand.vmem [shape: f32[2,1], index: 6, kind: input, shape index: {}]   ;;  %s4879_s7 = inlined_call_operand.hbm [shape: f32[2,256], index: 7, kind: output, shape index: {}]  }
   0x1   :  { %v28_v0 = vld [vmem:[%s4873_s1] sm:$0xff]  ;;  %2705 = vset.pattern.permute.xlu0 %v2844_v1  ;;  %2701 = vset.pattern.permute.xlu1 %v2845_v2  ;;  %v29_v3 = vld [vmem:[%s4873_s1 + $0x8] sm:$0xff] }
   0x2   :  { %184 = vperm.xlu0 %2705, %v28_v0   ;;  %84 = vperm.xlu1 %2701, %v28_v0  }
   0x3   :  { %12 = vsyncpa [#allocation3], 0  ;;  %v2846_v4 = vmov 2   ;;  %v31_v5 = vld [vmem:[%s4873_s1 + $0x18] sm:$0xff]  ;;  %v30_v6 = vld [vmem:[%s4873_s1 + $0x10] sm:$0xff]  ;;  %v2847_v7 = vmov 0   ;;  %v57_v17 = vlaneseq }
   0x4   :  { %v32_v8 = vld [vmem:[%s4874_s2] sm:$0xff]  ;;  %v35_v9 = vld [vmem:[%s4874_s2 + $0x18] sm:$0xff]  ;;  %v1207_v10 = vld [vmem:[%s4876_s4 + $0x8] sm:$0xff] }
   0x5   :  { %v1209_v11 = vld [vmem:[%s4876_s4 + $0x18] sm:$0xff]  ;;  %v33_v12 = vld [vmem:[%s4874_s2 + $0x8] sm:$0xff]  ;;  %v34_v13 = vld [vmem:[%s4874_s2 + $0x10] sm:$0xff]  ;;  %v2935_v18 = vshrl.u32 %v57_v17, 7 }
   0x6   :  { %2706 = vset.pattern.permute.xlu0 %v2846_v4  ;;  %88 = vperm.xlu1 %2701, %v29_v3   ;;  %v1206_v14 = vld [vmem:[%s4876_s4] sm:$0xff]  ;;  %v1208_v15 = vld [vmem:[%s4876_s4 + $0x10] sm:$0xff] }
   0x7   :  { %134 = vperm.xlu0 %2706, %v28_v0   ;;  %v2197_v16 = vld [vmem:[%s4878_s6] sm:$0x3]  ;;  %v151_v21 = vsub.s32 2, %v2935_v18  ;;  %v155_v22 = vsub.s32 6, %v2935_v18  ;;  %v101_v23 = vsub.s32 1, %v2935_v18  ;;  %v105_v24 = vsub.s32 5, %v2935_v18 }
   0x8   :  { %v27_v25 = vld [vmem:[%s4872_s0] sm:$0xff]  ;;  %v59_v26 = vsub.s32 0, %v2935_v18  ;;  %v63_v27 = vsub.s32 4, %v2935_v18  ;;  %v201_v31 = vsub.s32 3, %v2935_v18  ;;  %v205_v37 = vsub.s32 7, %v2935_v18 }
   0x9   :  { %v152_v29 = vrot.slane %v27_v25, %v151_v21  ;;  %v156_v30 = vrot.slane %v27_v25, %v155_v22  ;;  %v102_v33 = vrot.slane %v27_v25, %v101_v23  ;;  %v106_v34 = vrot.slane %v27_v25, %v105_v24 }
   0xa   :  { %2702 = vset.pattern.permute.xlu1 %v2846_v4  ;;  %v60_v35 = vrot.slane %v27_v25, %v59_v26  ;;  %v64_v36 = vrot.slane %v27_v25, %v63_v27  ;;  %v202_v40 = vrot.slane %v27_v25, %v201_v31  ;;  %v206_v49 = vrot.slane %v27_v25, %v205_v37 }
   0xb   :  { %146 = vperm.xlu0 %2706, %v31_v5   ;;  %138 = vperm.xlu1 %2702, %v29_v3   ;;  %v2950_v38 = vrot.slane %v152_v29, %v151_v21  ;;  %v2952_v39 = vrot.slane %v156_v30, %v151_v21  ;;  %v112_v43 = vrot.slane %v102_v33, %v101_v23 }
   0xc   :  { %v2956_v44 = vrot.slane %v106_v34, %v101_v23  ;;  %v70_v47 = vrot.slane %v60_v35, %v59_v26  ;;  %v74_v48 = vrot.slane %v64_v36, %v59_v26  ;;  %v2960_v50 = vrot.slane %v202_v40, %v201_v31 }
   0xd   :  { %v2964_v60 = vrot.slane %v206_v49, %v201_v31  ;;  %v2978_v24 = vmul.u32.u64.low 2863311531, %v2935_v18  ;;  %v2979_v25 = vmul.u32.u64.high 2863311531, %v2935_v18, %v2978_v24 }
   0xf   :  { %2709 = vset.pattern.permute.xlu0 %v2847_v7  ;;  %2703 = vset.pattern.permute.xlu1 %v2847_v7 }
  0x10   :  { %38 = vperm.xlu0 %2709, %v28_v0   ;;  %48 = vperm.xlu1 %2703, %v30_v6  }
  0x14   :  { %43 = vperm.xlu0 %2709, %v29_v3   ;;  %2704 = vset.pattern.permute.xlu1 %v2845_v2 }
  0x15   :  { %92 = vperm.xlu1 %2704, %v30_v6  }
  0x18   :  { %53 = vperm.xlu0 %2709, %v31_v5  }
  0x19   :  { %96 = vperm.xlu1 %2704, %v31_v5  }
  0x1c   :  { %235 = vperm.xlu0 %2709, %v32_v8  }
  0x1d   :  { %2707 = vset.pattern.permute.xlu1 %v2844_v1 }
  0x1e   :  { %188 = vperm.xlu1 %2707, %v29_v3  }
  0x20   :  { %250 = vperm.xlu0 %2709, %v35_v9   ;;  %v271_v9 = vadd.s32 8, %v2935_v18 }
  0x22   :  { %2708 = vset.pattern.permute.xlu1 %v2846_v4  ;;  %v2981_v27 = vmul.u32.u64.low 2863311531, %v271_v9  ;;  %v2982_v29 = vmul.u32.u64.high 2863311531, %v271_v9, %v2981_v27 }
  0x23   :  { %142 = vperm.xlu1 %2708, %v30_v6  }
  0x24   :  { %1217 = vperm.xlu0 %2709, %v1207_v10   ;;  %v291_v49 = vshrl.u32 %v2982_v29, 1  ;;  %v2849_v29 = vmov 2102212464  }
  0x27   :  { %2710 = vset.pattern.permute.xlu1 %v2844_v1 }
  0x28   :  { %1227 = vperm.xlu0 %2709, %v1209_v11   ;;  %192 = vperm.xlu1 %2710, %v30_v6  }
  0x2c   :  { %196 = vperm.xlu1 %2710, %v31_v5  }
  0x30   :  { %2711 = vset.pattern.permute.xlu1 %v2847_v7 }
  0x31   :  { %240 = vperm.xlu1 %2711, %v33_v12  }
  0x35   :  { %245 = vperm.xlu1 %2711, %v34_v13  }
  0x39   :  { %1212 = vperm.xlu1 %2711, %v1206_v14  }
  0x3d   :  { %1222 = vperm.xlu1 %2711, %v1208_v15  }
  0x41   :  { %2200 = vperm.xlu1 %2711, %v2197_v16  }
  0x81   :  { %v85_v19 = vpop.permute.xlu1 %84  ;;  %v185_v20 = vpop.permute.xlu0 %184 }
  0x82   :  { %v117_v51 = vmul.f32 %v112_v43, %v85_v19  ;;  %v118_v52 = vmul.f32 %v2956_v44, %v85_v19  ;;  %v217_v61 = vmul.f32 %v2960_v50, %v185_v20  ;;  %v218_v6 = vmul.f32 %v2964_v60, %v185_v20 }
  0x85   :  { %v2946_v28 = vpop.permute.xlu1 %88 }
  0x86   :  { %v135_v32 = vpop.permute.xlu0 %134  ;;  %v119_v2 = vmul.f32 %v112_v43, %v2946_v28 }
  0x87   :  { %v167_v53 = vmul.f32 %v2950_v38, %v135_v32  ;;  %v168_v62 = vmul.f32 %v2952_v39, %v135_v32 }
  0x8a   :  { %v2954_v41 = vpop.permute.xlu1 %138  ;;  %v147_v42 = vpop.permute.xlu0 %146 }
  0x8b   :  { %v173_v45 = vmul.f32 %v2950_v38, %v147_v42  ;;  %v174_v46 = vmul.f32 %v2952_v39, %v147_v42  ;;  %v169_v10 = vmul.f32 %v2950_v38, %v2954_v41  ;;  %v280_v42 = vshrl.u32 %v2979_v25, 1 }
  0x8f   :  { %v39_v54 = vpop.permute.xlu0 %38  ;;  %v49_v55 = vpop.permute.xlu1 %48 }
  0x90   :  { %v75_v56 = vmul.f32 %v70_v47, %v39_v54  ;;  %v76_v57 = vmul.f32 %v74_v48, %v39_v54  ;;  %v79_v58 = vmul.f32 %v70_v47, %v49_v55  ;;  %v80_v59 = vmul.f32 %v74_v48, %v49_v55 }
  0x92   :  { %v125_v63 = vadd.f32 %v117_v51, %v75_v56  ;;  %v126_v0 = vadd.f32 %v118_v52, %v76_v57  ;;  %v292_v57 = vmul.u32 3, %v291_v49 }
  0x93   :  { %v44_v1 = vpop.permute.xlu0 %43 }
  0x94   :  { %v77_v3 = vmul.f32 %v70_v47, %v44_v1  ;;  %v93_v4 = vpop.permute.xlu1 %92  ;;  %v175_v5 = vadd.f32 %v167_v53, %v125_v63  ;;  %v176_v12 = vadd.f32 %v168_v62, %v126_v0  ;;  %v78_v55 = vmul.f32 %v74_v48, %v44_v1 }
  0x95   :  { %v121_v7 = vmul.f32 %v112_v43, %v93_v4  ;;  %v122_v8 = vmul.f32 %v2956_v44, %v93_v4 }
  0x96   :  { %v127_v11 = vadd.f32 %v119_v2, %v77_v3  ;;  %v225_v13 = vadd.f32 %v217_v61, %v175_v5  ;;  %v226_v26 = vadd.f32 %v218_v6, %v176_v12  ;;  %v293_v3 = vsub.s32 %v271_v9, %v292_v57 }
  0x97   :  { %v129_v14 = vadd.f32 %v121_v7, %v79_v58  ;;  %v130_v15 = vadd.f32 %v122_v8, %v80_v59  ;;  %v54_v16 = vpop.permute.xlu0 %53  ;;  %v120_v58 = vmul.f32 %v2956_v44, %v2946_v28 }
  0x98   :  { %v81_v17 = vmul.f32 %v70_v47, %v54_v16  ;;  %v82_v19 = vmul.f32 %v74_v48, %v54_v16  ;;  %v97_v21 = vpop.permute.xlu1 %96  ;;  %v2974_v22 = vadd.f32 %v169_v10, %v127_v11  ;;  %v170_v48 = vmul.f32 %v2952_v39, %v2954_v41 }
  0x99   :  { %v123_v20 = vmul.f32 %v112_v43, %v97_v21  ;;  %v124_v23 = vmul.f32 %v2956_v44, %v97_v21  ;;  %v128_v63 = vadd.f32 %v120_v58, %v78_v55  ;;  %vm319_vm3 = vcmp.ne.s32.totalorder %v293_v3, 0 }
  0x9a   :  { %vm323_vm4 = vcmp.lt.s32.totalorder %v293_v3, 0  ;;  %v2848_v21 = vmov 920167782  }
  0x9b   :  { %v131_v30 = vadd.f32 %v123_v20, %v81_v17  ;;  %v132_v31 = vadd.f32 %v124_v23, %v82_v19  ;;  %v236_v32 = vpop.permute.xlu0 %235  ;;  %v178_v10 = vadd.f32 %v170_v48, %v128_v63  ;;  %vm327_vm6 = vmand %vm323_vm4, %vm319_vm3 }
  0x9c   :  { %v2984_v33 = vadd.f32 %v236_v32, %v226_v26  ;;  %v2991_v51 = vadd.f32 %v236_v32, %v225_v13  ;;  %v2850_v32 = vmov 2475754826  }
  0x9d   :  { %v2986_v34 = vpop.permute.xlu1 %188  ;;  %v181_v35 = vadd.f32 %v173_v45, %v131_v30  ;;  %v182_v36 = vadd.f32 %v174_v46, %v132_v31  ;;  %v281_v46 = vmul.u32 3, %v280_v42 }
  0x9e   :  { %v449_v37 = vand.u32 2139095040, %v2984_v33  ;;  %v345_v59 = vand.u32 2139095040, %v2991_v51  ;;  %v220_v1 = vmul.f32 %v2964_v60, %v2986_v34  ;;  %2712 = vtanh.f32 %v2991_v51 }
  0x9f   :  { %v282_v2 = vsub.s32 %v2935_v18, %v281_v46  ;;  %v219_v25 = vmul.f32 %v2960_v50, %v2986_v34  ;;  %v342_v42 = vand.u32 2147483647, %v2991_v51  ;;  %v251_v57 = vpop.permute.xlu0 %250  ;;  %2714 = vtanh.f32 %v2984_v33 }
  0xa0   :  { %v450_v40 = vshrl.u32 %v449_v37, 23  ;;  %v346_v4 = vshrl.u32 %v345_v59, 23  ;;  %v228_v12 = vadd.f32 %v220_v1, %v178_v10 }
  0xa1   :  { %vm318_vm1 = vcmp.ne.s32.totalorder %v282_v2, 0  ;;  %vm322_vm2 = vcmp.lt.s32.totalorder %v282_v2, 0  ;;  %v227_v55 = vadd.f32 %v219_v25, %v2974_v22  ;;  %v3058_v48 = vand.u32 8388607, %v342_v42 }
  0xa2   :  { %v2519_v43 = vadd.s32 4294967169, %v450_v40  ;;  %v143_v47 = vpop.permute.xlu1 %142  ;;  %v2515_v41 = vadd.s32 4294967169, %v346_v4  ;;  %vm326_vm5 = vmand %vm322_vm2, %vm318_vm1 }
  0xa3   :  { %v171_v52 = vmul.f32 %v2950_v38, %v143_v47  ;;  %v172_v53 = vmul.f32 %v2952_v39, %v143_v47 }
  0xa4   :  { %v456_v54 = vadd.s32 1, %v2519_v43  ;;  %v352_v17 = vadd.s32 1, %v2515_v41  ;;  %v2852_v43 = vmov 683565275  }
  0xa5   :  { %v179_v56 = vadd.f32 %v171_v52, %v129_v14  ;;  %v180_v45 = vadd.f32 %v172_v53, %v130_v15  ;;  %v330_v14 = vadd.s32 3, %v282_v2  ;;  %v331_v15 = vadd.s32 3, %v293_v3 }
  0xa6   :  { %vm457_vm0 = vcmp.gt.s32.totalorder %v456_v54, 0  ;;  %vm353_vm7 = vcmp.gt.s32.totalorder %v352_v17, 0  ;;  %v2853_v53 = vmov 1326507024  }
  0xa7   :  { %v193_v61 = vpop.permute.xlu1 %192  ;;  %v458_v62 = vsel %vm457_vm0, %v456_v54, 0  ;;  %v3020_v23 = vsel %vm326_vm5, %v330_v14, %v282_v2  ;;  %v3022_v24 = vsel %vm327_vm6, %v331_v15, %v293_v3 }
  0xa8   :  { %v221_v0 = vmul.f32 %v2960_v50, %v193_v61  ;;  %v222_v38 = vmul.f32 %v2964_v60, %v193_v61  ;;  %v460_v28 = vand.u32 31, %v458_v62  ;;  %v3029_v31 = vshrl.u32 %v458_v62, 5  ;;  %v3064_v4 = vpop.eup %2712 }
  0xa9   :  { %v3047_v62 = vsel %vm353_vm7, %v352_v17, 0 }
  0xaa   :  { %v3005_v5 = vadd.f32 %v221_v0, %v179_v56  ;;  %v3007_v6 = vadd.f32 %v222_v38, %v180_v45  ;;  %v3011_v9 = vsub.s32 32, %v460_v28  ;;  %v472_v30 = vshll.u32 %v2849_v29, %v460_v28 }
  0xab   :  { %v197_v44 = vpop.permute.xlu1 %196  ;;  %v463_v47 = vshll.u32 %v2852_v43, %v460_v28  ;;  %v466_v49 = vshll.u32 %v2850_v32, %v460_v28  ;;  %v475_v46 = vshll.u32 %v2848_v21, %v460_v28  ;;  %vm481_vm8 = vcmp.lt.s32.totalorder %v3029_v31, 4 }
  0xac   :  { %v223_v7 = vmul.f32 %v2960_v50, %v197_v44  ;;  %v224_v8 = vmul.f32 %v2964_v60, %v197_v44  ;;  %v446_v60 = vand.u32 2147483647, %v2984_v33  ;;  %v473_v20 = vshrl.u32 %v2848_v21, %v3011_v9 }
  0xad   :  { %v470_v50 = vshrl.u32 %v2849_v29, %v3011_v9  ;;  %v476_v54 = vshrl.u32 %v2853_v53, %v3011_v9  ;;  %v262_v38 = vmax.f32 %v2984_v33, 0.0  ;;  %vm478_vm10 = vcmp.lt.s32.totalorder %v3029_v31, 1 }
  0xae   :  { %v231_v11 = vadd.f32 %v223_v7, %v181_v35  ;;  %v232_v39 = vadd.f32 %v224_v8, %v182_v36  ;;  %v453_v27 = vand.u32 8388607, %v446_v60  ;;  %v464_v35 = vshrl.u32 %v2850_v32, %v3011_v9 }
  0xaf   :  { %v2851_v36 = vmov 2131351028   ;;  %v474_v40 = vor.u32 %v473_v20, %v472_v30  ;;  %v477_v2 = vor.u32 %v476_v54, %v475_v46  ;;  %vm480_vm11 = vcmp.lt.s32.totalorder %v3029_v31, 3 }
  0xb0   :  { %v241_v13 = vpop.permute.xlu1 %240  ;;  %v467_v37 = vshrl.u32 %v2851_v36, %v3011_v9  ;;  %v469_v52 = vshll.u32 %v2851_v36, %v460_v28  ;;  %v454_v45 = vor.u32 8388608, %v453_v27  ;;  %v465_v58 = vor.u32 %v464_v35, %v463_v47 }
  0xb1   :  { %v3013_v16 = vadd.f32 %v241_v13, %v228_v12  ;;  %v3049_v63 = vadd.f32 %v251_v57, %v231_v11  ;;  %v487_v0 = vsel %vm481_vm8, %v474_v40, 920167782  ;;  %v3053_v22 = vadd.f32 %v251_v57, %v232_v39 }
  0xb2   :  { %v468_v59 = vor.u32 %v467_v37, %v466_v49  ;;  %v471_v61 = vor.u32 %v470_v50, %v469_v52  ;;  %v3060_v1 = vadd.f32 %v241_v13, %v227_v55  ;;  %v3067_v28 = vand.u32 31, %v3047_v62 }
  0xb3   :  { %v657_v19 = vand.u32 2139095040, %v3013_v16  ;;  %v494_v8 = vshll.u32 %v454_v45, 8  ;;  %v969_v10 = vand.u32 2139095040, %v3049_v63  ;;  %v462_v39 = vshrl.u32 %v2852_v43, %v3011_v9 }
  0xb4   :  { %v486_v44 = vsel %vm478_vm10, %v465_v58, %v468_v59  ;;  %v488_v7 = vsel %vm480_vm11, %v471_v61, %v487_v0  ;;  %v483_v41 = vsel %vm481_vm8, %v471_v61, 2102212464  ;;  %v1073_v12 = vand.u32 2139095040, %v3053_v22  ;;  %v246_v25 = vpop.permute.xlu1 %245 }
  0xb5   :  { %v658_v26 = vshrl.u32 %v657_v19, 23  ;;  %vm479_vm12 = vcmp.lt.s32.totalorder %v3029_v31, 2  ;;  %v490_v13 = vsel %vm478_vm10, %v468_v59, %v471_v61  ;;  %v491_v14 = vsel %vm481_vm8, %v477_v2, 1326507024 }
  0xb6   :  { %v553_v15 = vand.u32 2139095040, %v3060_v1  ;;  %v482_v17 = vsel %vm478_vm10, %v462_v39, %v465_v58  ;;  %v489_v9 = vsel %vm479_vm12, %v486_v44, %v488_v7  ;;  %v492_v19 = vsel %vm480_vm11, %v474_v40, %v491_v14 }
  0xb7   :  { %v2527_v34 = vadd.s32 4294967169, %v658_v26  ;;  %v484_v26 = vsel %vm480_vm11, %v468_v59, %v483_v41  ;;  %v493_v27 = vsel %vm479_vm12, %v490_v13, %v492_v19  ;;  %v654_v30 = vand.u32 2147483647, %v3013_v16 }
  0xb8   :  { %v3097_v35 = vsub.s32 32, %v3067_v28  ;;  %v970_v37 = vshrl.u32 %v969_v10, 23  ;;  %v350_v50 = vor.u32 8388608, %v3058_v48  ;;  %v1074_v52 = vshrl.u32 %v1073_v12, 23 }
  0xb9   :  { %v664_v56 = vadd.s32 1, %v2527_v34  ;;  %v3101_v34 = vmul.u32.u64.low %v494_v8, %v493_v27  ;;  %v3102_v40 = vmul.u32.u64.high %v494_v8, %v493_v27, %v3101_v34  ;;  %v554_v54 = vshrl.u32 %v553_v15, 23 }
  0xba   :  { %v3104_v47 = vmul.u32.u64.low %v494_v8, %v489_v9  ;;  %v3105_v49 = vmul.u32.u64.high %v494_v8, %v489_v9, %v3104_v47  ;;  %v3109_v55 = vadd.f32 %v246_v25, %v3005_v5  ;;  %v3114_v45 = vadd.f32 %v246_v25, %v3007_v6  ;;  %v3133_v25 = vpop.eup %2714 }
  0xbb   :  { %vm665_vm9 = vcmp.gt.s32.totalorder %v664_v56, 0  ;;  %v661_v46 = vand.u32 8388607, %v654_v30  ;;  %2716 = vtanh.f32 %v3060_v1  ;;  %v360_v48 = vshrl.u32 %v2850_v32, %v3097_v35 }
  0xbc   :  { %v666_v3 = vsel %vm665_vm9, %v664_v56, 0  ;;  %v485_v56 = vsel %vm479_vm12, %v482_v17, %v484_v26  ;;  %vm503_vm13 = vc.u32 %v3102_v40, %v3104_v47  ;;  %v504_v6 = vadd.s32 1, %v3105_v49 }
  0xbd   :  { %v668_v11 = vand.u32 31, %v666_v3  ;;  %v667_v31 = vshrl.u32 %v666_v3, 5  ;;  %v501_v2 = vmul.u32 %v494_v8, %v485_v56  ;;  %v2539_v3 = vadd.s32 4294967169, %v970_v37 }
  0xbe   :  { %v505_v41 = vsel %vm503_vm13, %v504_v6, %v3105_v49  ;;  %v662_v15 = vor.u32 8388608, %v661_v46  ;;  %vm448_vm9 = vcmp.lt.s32.totalorder %v2984_v33, 0  ;;  %vm3232_vm11 = vcmp.le.f32.partialorder %v446_v60, 0.7853982 }
  0xbf   :  { %v669_v20 = vsub.s32 32, %v668_v11  ;;  %v671_v57 = vshll.u32 %v2852_v43, %v668_v11  ;;  %v674_v59 = vshll.u32 %v2850_v32, %v668_v11  ;;  %v677_v5 = vshll.u32 %v2851_v36, %v668_v11 }
  0xc0   :  { %v680_v39 = vshll.u32 %v2849_v29, %v668_v11  ;;  %v683_v13 = vshll.u32 %v2848_v21, %v668_v11  ;;  %v506_v8 = vadd.s32 %v505_v41, %v501_v2  ;;  %vm686_vm14 = vcmp.lt.s32.totalorder %v667_v31, 1 }
  0xc1   :  { %v672_v58 = vshrl.u32 %v2850_v32, %v669_v20  ;;  %v675_v61 = vshrl.u32 %v2851_v36, %v669_v20  ;;  %v678_v0 = vshrl.u32 %v2849_v29, %v669_v20  ;;  %v681_v12 = vshrl.u32 %v2848_v21, %v669_v20 }
  0xc2   :  { %v684_v14 = vshrl.u32 %v2853_v53, %v669_v20  ;;  %v670_v17 = vshrl.u32 %v2852_v43, %v669_v20  ;;  %vm689_vm15 = vcmp.lt.s32.totalorder %v667_v31, 4  ;;  %v507_v26 = vadd.s32 536870912, %v506_v8 }
  0xc3   :  { %v673_v44 = vor.u32 %v672_v58, %v671_v57  ;;  %v676_v7 = vor.u32 %v675_v61, %v674_v59  ;;  %v679_v10 = vor.u32 %v678_v0, %v677_v5  ;;  %v682_v9 = vor.u32 %v681_v12, %v680_v39 }
  0xc4   :  { %v685_v19 = vor.u32 %v684_v14, %v683_v13  ;;  %vm687_vm0 = vcmp.lt.s32.totalorder %v667_v31, 2  ;;  %vm688_vm1 = vcmp.lt.s32.totalorder %v667_v31, 3  ;;  %v3135_v57 = vshrl.u32 %v507_v26, 30 }
  0xc5   :  { %v691_v27 = vsel %vm689_vm15, %v679_v10, 2102212464  ;;  %v694_v34 = vsel %vm686_vm14, %v673_v44, %v676_v7  ;;  %v698_v49 = vsel %vm686_vm14, %v676_v7, %v679_v10  ;;  %v695_v11 = vsel %vm689_vm15, %v682_v9, 920167782 }
  0xc6   :  { %v699_v56 = vsel %vm689_vm15, %v685_v19, 1326507024  ;;  %v696_v37 = vsel %vm688_vm1, %v679_v10, %v695_v11  ;;  %v702_v58 = vshll.u32 %v662_v15, 8  ;;  %v690_v20 = vsel %vm686_vm14, %v670_v17, %v673_v44 }
  0xc7   :  { %v700_v46 = vsel %vm688_vm1, %v682_v9, %v699_v56  ;;  %v692_v59 = vsel %vm688_vm1, %v676_v7, %v691_v27  ;;  %v697_v61 = vsel %vm687_vm0, %v694_v34, %v696_v37  ;;  %v2543_v0 = vadd.s32 4294967169, %v1074_v52 }
  0xc8   :  { %v701_v5 = vsel %vm687_vm0, %v698_v49, %v700_v46  ;;  %v509_v2 = vshll.u32 %v3135_v57, 30  ;;  %v2523_v41 = vadd.s32 4294967169, %v554_v54  ;;  %v3149_v44 = vshrl.u32 %v3047_v62, 5 }
  0xc9   :  { %v3140_v6 = vmul.u32.u64.low %v702_v58, %v701_v5  ;;  %v3141_v39 = vmul.u32.u64.high %v702_v58, %v701_v5, %v3140_v6  ;;  %v3143_v12 = vmul.u32.u64.low %v702_v58, %v697_v61  ;;  %v3144_v13 = vmul.u32.u64.high %v702_v58, %v697_v61, %v3143_v12 }
  0xca   :  { %v3151_v7 = vsub.s32 %v506_v8, %v509_v2  ;;  %v693_v14 = vsel %vm687_vm0, %v690_v20, %v692_v59  ;;  %v3156_v52 = vshll.u32 %v350_v50, 8  ;;  %v3158_v15 = vadd.s32 1, %v2539_v3 }
  0xcb   :  { %v761_v54 = vand.u32 2139095040, %v3109_v55  ;;  %v865_v17 = vand.u32 2139095040, %v3114_v45  ;;  %v3163_v9 = vadd.s32 1, %v2543_v0  ;;  %vm711_vm2 = vc.u32 %v3141_v39, %v3143_v12 }
  0xcc   :  { %v512_v62 = vsub.s32 0, %v3151_v7  ;;  %v560_v50 = vadd.s32 1, %v2523_v41  ;;  %v709_v31 = vmul.u32 %v702_v58, %v693_v14  ;;  %v712_v3 = vadd.s32 1, %v3144_v13 }
  0xcd   :  { %v363_v8 = vshrl.u32 %v2851_v36, %v3097_v35  ;;  %v359_v26 = vshll.u32 %v2852_v43, %v3067_v28  ;;  %v362_v27 = vshll.u32 %v2850_v32, %v3067_v28  ;;  %v366_v34 = vshrl.u32 %v2849_v29, %v3097_v35 }
  0xce   :  { %v2520_v19 = vmin.u32 %v512_v62, %v3151_v7  ;;  %v713_v49 = vsel %vm711_vm2, %v712_v3, %v3144_v13  ;;  %v368_v11 = vshll.u32 %v2849_v29, %v3067_v28  ;;  %v369_v56 = vshrl.u32 %v2848_v21, %v3097_v35 }
  0xcf   :  { %v372_v37 = vshrl.u32 %v2853_v53, %v3097_v35  ;;  %v3187_v46 = vshrl.u32 %v761_v54, 23  ;;  %v361_v20 = vor.u32 %v360_v48, %v359_v26  ;;  %v365_v59 = vshll.u32 %v2851_v36, %v3067_v28 }
  0xd0   :  { %v514_v58 = vclz %v2520_v19  ;;  %v714_v61 = vadd.s32 %v713_v49, %v709_v31  ;;  %v364_v5 = vor.u32 %v363_v8, %v362_v27  ;;  %v370_v0 = vor.u32 %v369_v56, %v368_v11 }
  0xd1   :  { %v371_v2 = vshll.u32 %v2848_v21, %v3067_v28  ;;  %vm561_vm3 = vcmp.gt.s32.totalorder %v560_v50, 0  ;;  %v866_v6 = vshrl.u32 %v865_v17, 23  ;;  %v367_v13 = vor.u32 %v366_v34, %v365_v59  ;;  %v3202_v17 = vpop.eup %2716 }
  0xd2   :  { %v2521_v41 = vadd.s32 4294967294, %v514_v58  ;;  %vm977_vm4 = vcmp.gt.s32.totalorder %v3158_v15, 0  ;;  %v502_v14 = vadd.s32 %v3104_v47, %v3102_v40  ;;  %v715_v54 = vadd.s32 536870912, %v714_v61 }
  0xd3   :  { %v373_v62 = vor.u32 %v372_v37, %v371_v2  ;;  %vm377_vm5 = vcmp.lt.s32.totalorder %v3149_v44, 4  ;;  %v358_v48 = vshrl.u32 %v2852_v43, %v3097_v35  ;;  %vm374_vm7 = vcmp.lt.s32.totalorder %v3149_v44, 1 }
  0xd4   :  { %vm2522_vm6 = vcmp.lt.s32.totalorder %v2521_v41, 0  ;;  %v383_v28 = vsel %vm377_vm5, %v370_v0, 920167782  ;;  %v3204_v3 = vshrl.u32 %v715_v54, 30  ;;  %vm376_vm8 = vcmp.lt.s32.totalorder %v3149_v44, 3 }
  0xd5   :  { %v517_v31 = vsel %vm2522_vm6, 0, %v2521_v41  ;;  %v382_v40 = vsel %vm374_vm7, %v361_v20, %v364_v5  ;;  %v384_v35 = vsel %vm376_vm8, %v367_v13, %v383_v28  ;;  %v386_v19 = vsel %vm374_vm7, %v364_v5, %v367_v13 }
  0xd6   :  { %v518_v47 = vsub.s32 32, %v517_v31  ;;  %v522_v8 = vsub.s32 4294967266, %v517_v31  ;;  %v717_v26 = vshll.u32 %v3204_v3, 30  ;;  %vm375_vm10 = vcmp.lt.s32.totalorder %v3149_v44, 2 }
  0xd7   :  { %v379_v27 = vsel %vm377_vm5, %v367_v13, 2102212464  ;;  %v387_v34 = vsel %vm377_vm5, %v373_v62, 1326507024  ;;  %v519_v49 = vshll.u32 %v3151_v7, %v517_v31  ;;  %v562_v58 = vsel %vm561_vm3, %v560_v50, 0 }
  0xd8   :  { %v520_v11 = vshrl.u32 %v502_v14, %v518_v47  ;;  %v523_v56 = vadd.s32 127, %v522_v8  ;;  %v388_v37 = vsel %vm376_vm8, %v370_v0, %v387_v34  ;;  %v3224_v59 = vsub.s32 %v714_v61, %v717_v26 }
  0xd9   :  { %v385_v2 = vsel %vm375_vm10, %v382_v40, %v384_v35  ;;  %v389_v41 = vsel %vm375_vm10, %v386_v19, %v388_v37  ;;  %v532_v0 = vsub.s32 4, %v3135_v57  ;;  %v378_v50 = vsel %vm374_vm7, %v358_v48, %v361_v20 }
  0xda   :  { %v521_v7 = vor.u32 %v520_v11, %v519_v49  ;;  %v524_v14 = vshll.u32 %v523_v56, 23  ;;  %v720_v61 = vsub.s32 0, %v3224_v59  ;;  %v380_v54 = vsel %vm376_vm8, %v364_v5, %v379_v27 }
  0xdb   :  { %v3243_v62 = vmul.u32.u64.low %v3156_v52, %v389_v41  ;;  %v3244_v28 = vmul.u32.u64.high %v3156_v52, %v389_v41, %v3243_v62  ;;  %vm1081_vm12 = vcmp.gt.s32.totalorder %v3163_v9, 0  ;;  %v564_v47 = vand.u32 31, %v562_v58 }
  0xdc   :  { %v525_v60 = vor.u32 4788187, %v524_v14  ;;  %v3248_v31 = vmul.u32.u64.low %v3156_v52, %v385_v2  ;;  %v3249_v40 = vmul.u32.u64.high %v3156_v52, %v385_v2, %v3248_v31  ;;  %v2535_v8 = vadd.s32 4294967169, %v866_v6 }
  0xdd   :  { %v264_v20 = vmax.f32 %v3013_v16, 0.0  ;;  %v2528_v48 = vmin.u32 %v720_v61, %v3224_v59  ;;  %v3257_v5 = vsel %vm977_vm4, %v3158_v15, 0  ;;  %v528_v19 = vcvt.s32.f32 %v521_v7 }
  0xde   :  { %v526_v35 = vand.u32 2147483647, %v525_v60  ;;  %v381_v26 = vsel %vm375_vm10, %v378_v50, %v380_v54  ;;  %v3262_v27 = vsel %vm1081_vm12, %v3163_v9, 0  ;;  %v2531_v34 = vadd.s32 4294967169, %v3187_v46 }
  0xdf   :  { %v533_v6 = vsel %vm448_vm9, %v532_v0, %v3135_v57  ;;  %v722_v49 = vclz %v2528_v48  ;;  %vm399_vm13 = vc.u32 %v3244_v28, %v3248_v31  ;;  %v400_v15 = vadd.s32 1, %v3249_v40 }
  0xe0   :  { %v529_v11 = vmul.f32 %v528_v19, %v526_v35  ;;  %v4880_v56 = vand.u32 2147483647, %v3060_v1  ;;  %v3272_v44 = vsub.s32 32, %v564_v47  ;;  %v872_v37 = vadd.s32 1, %v2535_v8 }
  0xe1   :  { %v2529_v9 = vadd.s32 4294967294, %v722_v49  ;;  %v397_v2 = vmul.u32 %v3156_v52, %v381_v26  ;;  %v3276_v46 = vand.u32 31, %v3262_v27  ;;  %v3278_v41 = vshrl.u32 %v562_v58, 5 }
  0xe2   :  { %v530_v57 = vxor.u32 2147483648, %v529_v11  ;;  %v401_v7 = vsel %vm399_vm13, %v400_v15, %v3249_v40  ;;  %v3281_v14 = vadd.s32 1, %v2531_v34  ;;  %v535_v0 = vsel %vm3232_vm11, 0, %v533_v6 }
  0xe3   :  { %vm2530_vm14 = vcmp.lt.s32.totalorder %v2529_v9, 0  ;;  %v402_v50 = vadd.s32 %v401_v7, %v397_v2  ;;  %v710_v52 = vadd.s32 %v3143_v12, %v3141_v39  ;;  %v3291_v58 = vand.u32 8388607, %v4880_v56 }
  0xe4   :  { %v531_v61 = vsel %vm448_vm9, %v530_v57, %v529_v11  ;;  %v725_v54 = vsel %vm2530_vm14, 0, %v2529_v9  ;;  %vm873_vm15 = vcmp.gt.s32.totalorder %v872_v37, 0  ;;  %v568_v40 = vshrl.u32 %v2850_v32, %v3272_v44 }
  0xe5   :  { %v726_v62 = vsub.s32 32, %v725_v54  ;;  %v730_v60 = vsub.s32 4294967266, %v725_v54  ;;  %v570_v8 = vshll.u32 %v2850_v32, %v564_v47  ;;  %v534_v48 = vsel %vm3232_vm11, %v2984_v33, %v531_v61 }
  0xe6   :  { %v403_v35 = vadd.s32 536870912, %v402_v50  ;;  %v571_v39 = vshrl.u32 %v2851_v36, %v3272_v44  ;;  %v577_v12 = vshrl.u32 %v2848_v21, %v3272_v44  ;;  %v727_v19 = vshll.u32 %v3224_v59, %v725_v54 }
  0xe7   :  { %v728_v26 = vshrl.u32 %v710_v52, %v726_v62  ;;  %v731_v34 = vadd.s32 127, %v730_v60  ;;  %v574_v6 = vshrl.u32 %v2849_v29, %v3272_v44  ;;  %v573_v11 = vshll.u32 %v2851_v36, %v564_v47 }
  0xe8   :  { %v3306_v49 = vshrl.u32 %v403_v35, 30  ;;  %v576_v13 = vshll.u32 %v2849_v29, %v564_v47  ;;  %v580_v15 = vshrl.u32 %v2853_v53, %v3272_v44  ;;  %2718 = vcosq.f32 %v534_v48 }
  0xe9   :  { %v729_v9 = vor.u32 %v728_v26, %v727_v19  ;;  %v732_v2 = vshll.u32 %v731_v34, 23  ;;  %v579_v57 = vshll.u32 %v2848_v21, %v564_v47  ;;  %2720 = vsinq.f32 %v534_v48 }
  0xea   :  { %v405_v59 = vshll.u32 %v3306_v49, 30  ;;  %v567_v7 = vshll.u32 %v2852_v43, %v564_v47  ;;  %v578_v61 = vor.u32 %v577_v12, %v576_v13  ;;  %v572_v54 = vor.u32 %v571_v39, %v570_v8 }
  0xeb   :  { %v733_v52 = vor.u32 4788187, %v732_v2  ;;  %v575_v62 = vor.u32 %v574_v6, %v573_v11  ;;  %v581_v60 = vor.u32 %v580_v15, %v579_v57  ;;  %v539_v35 = vadd.s32 3, %v535_v0 }
  0xec   :  { %vm656_vm0 = vcmp.lt.s32.totalorder %v3013_v16, 0  ;;  %v740_v10 = vsub.s32 4, %v3204_v3  ;;  %v3317_v56 = vsub.s32 %v402_v50, %v405_v59  ;;  %v736_v26 = vcvt.s32.f32 %v729_v9 }
  0xed   :  { %v734_v19 = vand.u32 2147483647, %v733_v52  ;;  %v569_v34 = vor.u32 %v568_v40, %v567_v7  ;;  %vm585_vm1 = vcmp.lt.s32.totalorder %v3278_v41, 4  ;;  %v558_v47 = vor.u32 8388608, %v3291_v58 }
  0xee   :  { %v408_v48 = vsub.s32 0, %v3317_v56  ;;  %vm582_vm2 = vcmp.lt.s32.totalorder %v3278_v41, 1  ;;  %v591_v0 = vsel %vm585_vm1, %v578_v61, 920167782  ;;  %vm584_vm3 = vcmp.lt.s32.totalorder %v3278_v41, 3 }
  0xef   :  { %v737_v8 = vmul.f32 %v736_v26, %v734_v19  ;;  %v594_v50 = vsel %vm582_vm2, %v572_v54, %v575_v62  ;;  %v595_v40 = vsel %vm585_vm1, %v581_v60, 1326507024  ;;  %v3331_v39 = vsel %vm873_vm15, %v872_v37, 0 }
  0xf0   :  { %v741_v58 = vsel %vm656_vm0, %v740_v10, %v3204_v3  ;;  %v2516_v12 = vmin.u32 %v408_v48, %v3317_v56  ;;  %v596_v6 = vsel %vm584_vm3, %v578_v61, %v595_v40  ;;  %vm583_vm4 = vcmp.lt.s32.totalorder %v3278_v41, 2 }
  0xf1   :  { %v738_v11 = vxor.u32 2147483648, %v737_v8  ;;  %v590_v13 = vsel %vm582_vm2, %v569_v34, %v572_v54  ;;  %v592_v15 = vsel %vm584_vm3, %v575_v62, %v591_v0  ;;  %v540_v37 = vand.u32 3, %v539_v35 }
  0xf2   :  { %vm3346_vm5 = vcmp.le.f32.partialorder %v654_v30, 0.7853982  ;;  %v410_v10 = vclz %v2516_v12  ;;  %v597_v3 = vsel %vm583_vm4, %v594_v50, %v596_v6  ;;  %v2719_v2 = vpop.eup %2718  ;;  %vm344_vm6 = vcmp.lt.s32.totalorder %v2991_v51, 0 }
  0xf3   :  { %v739_v57 = vsel %vm656_vm0, %v738_v11, %v737_v8  ;;  %v566_v59 = vshrl.u32 %v2852_v43, %v3272_v44  ;;  %v587_v7 = vsel %vm585_vm1, %v575_v62, 2102212464  ;;  %v598_v30 = vshll.u32 %v558_v47, 8  ;;  %v2721_v61 = vpop.eup %2720 }
  0xf4   :  { %v742_v52 = vsel %vm3346_vm5, %v3013_v16, %v739_v57  ;;  %v743_v60 = vsel %vm3346_vm5, 0, %v741_v58  ;;  %v2517_v35 = vadd.s32 4294967294, %v410_v10  ;;  %v593_v19 = vsel %vm583_vm4, %v590_v13, %v592_v15 }
  0xf5   :  { %2722 = vcosq.f32 %v742_v52  ;;  %v586_v44 = vsel %vm582_vm2, %v566_v59, %v569_v34  ;;  %v3368_v26 = vmul.u32.u64.low %v598_v30, %v597_v3  ;;  %v3369_v48 = vmul.u32.u64.high %v598_v30, %v597_v3, %v3368_v26 }
  0xf6   :  { %v546_v62 = vxor.u32 2147483648, %v2719_v2  ;;  %2724 = vsinq.f32 %v742_v52  ;;  %vm3373_vm7 = vcmp.le.f32.partialorder %v342_v42, 0.7853982  ;;  %vm2518_vm8 = vcmp.lt.s32.totalorder %v2517_v35, 0 }
  0xf7   :  { %v588_v0 = vsel %vm584_vm3, %v572_v54, %v587_v7  ;;  %v543_v8 = vxor.u32 2147483648, %v2721_v61  ;;  %v413_v50 = vsel %vm2518_vm8, 0, %v2517_v35  ;;  %vm538_vm9 = vweird.f32 %v2984_v33 }
  0xf8   :  { %v3379_v40 = vmul.u32.u64.low %v598_v30, %v593_v19  ;;  %v3380_v58 = vmul.u32.u64.high %v598_v30, %v593_v19, %v3379_v40  ;;  %v398_v34 = vadd.s32 %v3248_v31, %v3244_v28  ;;  %v414_v12 = vsub.s32 32, %v413_v50 }
  0xf9   :  { %v418_v42 = vsub.s32 4294967266, %v413_v50  ;;  %v428_v6 = vsub.s32 4, %v3306_v49  ;;  %vm338_vm10 = vcmp.eq.s32.totalorder %v3020_v23, 1  ;;  %vm542_vm11 = vcmp.eq.s32.totalorder %v540_v37, 0 }
  0xfa   :  { %vm545_vm12 = vcmp.eq.s32.totalorder %v540_v37, 2  ;;  %v747_v54 = vadd.s32 3, %v743_v60  ;;  %v589_v11 = vsel %vm583_vm4, %v586_v44, %v588_v0  ;;  %v415_v13 = vshll.u32 %v3317_v56, %v413_v50 }
  0xfb   :  { %v416_v15 = vshrl.u32 %v398_v34, %v414_v12  ;;  %v419_v9 = vadd.s32 127, %v418_v42  ;;  %vm607_vm13 = vc.u32 %v3369_v48, %v3379_v40  ;;  %vm339_vm14 = vcmp.eq.s32.totalorder %v3022_v24, 1 }
  0xfc   :  { %v544_v28 = vsel %vm542_vm11, %v2719_v2, %v543_v8  ;;  %v547_v31 = vsel %vm545_vm12, %v546_v62, %v2721_v61  ;;  %2726 = vtanh.f32 %v3013_v16  ;;  %v608_v10 = vadd.s32 1, %v3380_v58 }
  0xfd   :  { %vm1182_vm15 = vcmp.eq.s32.totalorder %v3020_v23, 0  ;;  %vm1183_vm0 = vcmp.eq.s32.totalorder %v3022_v24, 0  ;;  %v417_v41 = vor.u32 %v416_v15, %v415_v13  ;;  %v420_v3 = vshll.u32 %v419_v9, 23 }
  0xfe   :  { %v429_v56 = vsel %vm344_vm6, %v428_v6, %v3306_v49  ;;  %v605_v57 = vmul.u32 %v598_v30, %v589_v11  ;;  %v876_v59 = vand.u32 31, %v3331_v39  ;;  %vm541_vm1 = vcmp.lt.s32.totalorder %v540_v37, 2 }
  0xff   :  { %v748_v2 = vand.u32 3, %v747_v54  ;;  %v609_v7 = vsel %vm607_vm13, %v608_v10, %v3380_v58  ;;  %v3404_v61 = vand.u32 31, %v3257_v5  ;;  %v548_v52 = vsel %vm541_vm1, %v544_v28, %v547_v31  ;;  %v2723_v19 = vpop.eup %2722 }
 0x100   :  { %v421_v60 = vor.u32 4788187, %v420_v3  ;;  %v610_v35 = vadd.s32 %v609_v7, %v605_v57  ;;  %v3407_v44 = vshrl.u32 %v3262_v27, 5  ;;  %v3410_v26 = vsub.s32 32, %v3276_v46  ;;  %v2725_v37 = vpop.eup %2724 }
 0x101   :  { %vm769_vm2 = vcmp.gt.s32.totalorder %v3281_v14, 0  ;;  %v431_v49 = vsel %vm3373_vm7, 0, %v429_v56  ;;  %v754_v30 = vxor.u32 2147483648, %v2723_v19  ;;  %v424_v0 = vcvt.s32.f32 %v417_v41 }
 0x102   :  { %v422_v62 = vand.u32 2147483647, %v421_v60  ;;  %v611_v8 = vadd.s32 536870912, %v610_v35  ;;  %v877_v50 = vsub.s32 32, %v876_v59  ;;  %v549_v58 = vsel %vm538_vm9, nan, %v548_v52 }
 0x103   :  { %v751_v34 = vxor.u32 2147483648, %v2725_v37  ;;  %vm753_vm3 = vcmp.eq.s32.totalorder %v748_v2, 2  ;;  %vm750_vm4 = vcmp.eq.s32.totalorder %v748_v2, 0  ;;  %vm746_vm5 = vweird.f32 %v3013_v16 }
 0x104   :  { %v755_v27 = vsel %vm753_vm3, %v754_v30, %v2725_v37  ;;  %v425_v12 = vmul.f32 %v424_v0, %v422_v62  ;;  %v612_v42 = vshrl.u32 %v611_v8, 30  ;;  %vm749_vm8 = vcmp.lt.s32.totalorder %v748_v2, 2 }
 0x105   :  { %v752_v6 = vsel %vm750_vm4, %v2723_v19, %v751_v34  ;;  %v435_v54 = vadd.s32 3, %v431_v49  ;;  %v1175_v13 = vsel %vm338_vm10, %v549_v58, %v262_v38  ;;  %v3425_v31 = vsel %vm769_vm2, %v3281_v14, 0 }
 0x106   :  { %v756_v11 = vsel %vm749_vm8, %v752_v6, %v755_v27  ;;  %v426_v15 = vxor.u32 2147483648, %v425_v12  ;;  %v613_v9 = vshll.u32 %v612_v42, 30  ;;  %v2727_v28 = vpop.eup %2726  ;;  %v3428_v10 = vshrl.u32 %v3331_v39, 5 }
 0x107   :  { %v757_v41 = vsel %vm746_vm5, nan, %v756_v11  ;;  %v862_v3 = vand.u32 2147483647, %v3114_v45  ;;  %vm552_vm9 = vcmp.lt.s32.totalorder %v3060_v1, 0  ;;  %v1195_v14 = vsel %vm1182_vm15, %v3133_v25, %v1175_v13 }
 0x108   :  { %v1177_v33 = vsel %vm339_vm14, %v757_v41, %v264_v20  ;;  %v427_v38 = vsel %vm344_vm6, %v426_v15, %v425_v12  ;;  %v3438_v56 = vsub.s32 %v610_v35, %v613_v9  ;;  %v3448_v57 = vand.u32 3, %v435_v54 }
 0x109   :  { %v1197_v39 = vsel %vm1183_vm0, %v2727_v28, %v1177_v33  ;;  %v430_v16 = vsel %vm3373_vm7, %v2991_v51, %v427_v38  ;;  %v883_v7 = vshrl.u32 %v2851_v36, %v877_v50  ;;  %v869_v52 = vand.u32 8388607, %v862_v3 }
 0x10a   :  { %v2593_v20 = vpack.c.bf16 %v1197_v39, %v1195_v14  ;;  %2728 = vcosq.f32 %v430_v16  ;;  %v616_v2 = vsub.s32 0, %v3438_v56  ;;  %v879_v25 = vshll.u32 %v2852_v43, %v876_v59 }
 0x10b   :  { %v880_v60 = vshrl.u32 %v2850_v32, %v877_v50  ;;  %v882_v35 = vshll.u32 %v2850_v32, %v876_v59  ;;  %v636_v19 = vsub.s32 4, %v612_v42  ;;  %v885_v49 = vshll.u32 %v2851_v36, %v876_v59 }
 0x10c   :  { %2594 = vmatprep.subr.bf16.mxu0 %v2593_v20  ;;  %v2524_v47 = vmin.u32 %v616_v2, %v3438_v56  ;;  %v886_v37 = vshrl.u32 %v2849_v29, %v877_v50  ;;  %v888_v30 = vshll.u32 %v2849_v29, %v876_v59  ;;  %v889_v62 = vshrl.u32 %v2848_v21, %v877_v50 }
 0x10d   :  { %v891_v0 = vshll.u32 %v2848_v21, %v876_v59  ;;  %v892_v8 = vshrl.u32 %v2853_v53, %v877_v50  ;;  %2730 = vsinq.f32 %v430_v16  ;;  %v3465_v34 = vadd.s32 16, %v2935_v18 }
 0x10e   :  { %v618_v58 = vclz %v2524_v47  ;;  %v884_v27 = vor.u32 %v883_v7, %v882_v35  ;;  %v881_v12 = vor.u32 %v880_v60, %v879_v25  ;;  %v887_v6 = vor.u32 %v886_v37, %v885_v49 }
 0x10f   :  { %v890_v54 = vor.u32 %v889_v62, %v888_v30  ;;  %v893_v11 = vor.u32 %v892_v8, %v891_v0  ;;  %v606_v13 = vadd.s32 %v3379_v40, %v3369_v48  ;;  %v878_v9 = vshrl.u32 %v2852_v43, %v877_v50 }
 0x110   :  { %v2525_v15 = vadd.s32 4294967294, %v618_v58  ;;  %vm897_vm6 = vcmp.lt.s32.totalorder %v3428_v10, 4  ;;  %v637_v59 = vsel %vm552_vm9, %v636_v19, %v612_v42  ;;  %v870_v28 = vor.u32 8388608, %v869_v52 }
 0x111   :  { %vm894_vm7 = vcmp.lt.s32.totalorder %v3428_v10, 1  ;;  %v903_v41 = vsel %vm897_vm6, %v890_v54, 920167782  ;;  %vm896_vm12 = vcmp.lt.s32.totalorder %v3428_v10, 3  ;;  %v899_v33 = vsel %vm897_vm6, %v887_v6, 2102212464 }
 0x112   :  { %vm2526_vm11 = vcmp.lt.s32.totalorder %v2525_v15, 0  ;;  %v906_v38 = vsel %vm894_vm7, %v884_v27, %v887_v6  ;;  %v902_v39 = vsel %vm894_vm7, %v881_v12, %v884_v27  ;;  %v904_v48 = vsel %vm896_vm12, %v887_v6, %v903_v41 }
 0x113   :  { %v621_v14 = vsel %vm2526_vm11, 0, %v2525_v15  ;;  %v907_v40 = vsel %vm897_vm6, %v893_v11, 1326507024  ;;  %vm895_vm13 = vcmp.lt.s32.totalorder %v3428_v10, 2  ;;  %v898_v42 = vsel %vm894_vm7, %v878_v9, %v881_v12 }
 0x114   :  { %v2729_v16 = vpop.eup %2728  ;;  %v622_v50 = vsub.s32 32, %v621_v14  ;;  %v626_v20 = vsub.s32 4294967266, %v621_v14  ;;  %v908_v2 = vsel %vm896_vm12, %v890_v54, %v907_v40  ;;  %v900_v7 = vsel %vm896_vm12, %v884_v27, %v899_v33 }
 0x115   :  { %v909_v52 = vsel %vm895_vm13, %v906_v38, %v908_v2  ;;  %v910_v25 = vshll.u32 %v870_v28, 8  ;;  %v623_v60 = vshll.u32 %v3438_v56, %v621_v14  ;;  %v905_v19 = vsel %vm895_vm13, %v902_v39, %v904_v48 }
 0x116   :  { %v624_v35 = vshrl.u32 %v606_v13, %v622_v50  ;;  %v627_v47 = vadd.s32 127, %v626_v20  ;;  %v442_v49 = vxor.u32 2147483648, %v2729_v16  ;;  %v4890_v37 = vand.u32 2147483647, %v3060_v1 }
 0x117   :  { %v3487_v62 = vmul.u32.u64.low %v910_v25, %v909_v52  ;;  %v3488_v0 = vmul.u32.u64.high %v910_v25, %v909_v52, %v3487_v62  ;;  %v2731_v8 = vpop.eup %2730  ;;  %v3491_v58 = vand.u32 31, %v3425_v31  ;;  %v901_v6 = vsel %vm895_vm13, %v898_v42, %v900_v7 }
 0x118   :  { %vm3483_vm1 = vcmp.le.f32.partialorder %v4890_v37, 0.7853982  ;;  %v625_v56 = vor.u32 %v624_v35, %v623_v60  ;;  %v628_v27 = vshll.u32 %v627_v47, 23  ;;  %v1070_v13 = vand.u32 2147483647, %v3053_v22 }
 0x119   :  { %v639_v12 = vsel %vm3483_vm1, 0, %v637_v59  ;;  %v3497_v54 = vmul.u32.u64.low %v910_v25, %v905_v19  ;;  %v3498_v11 = vmul.u32.u64.high %v910_v25, %v905_v19, %v3497_v54  ;;  %vm441_vm2 = vcmp.eq.s32.totalorder %v3448_v57, 2 }
 0x11a   :  { %v629_v15 = vor.u32 4788187, %v628_v27  ;;  %v3504_v9 = vmul.u32.u64.low 2863311531, %v3465_v34  ;;  %v3505_v28 = vmul.u32.u64.high 2863311531, %v3465_v34, %v3504_v9  ;;  %vm438_vm3 = vcmp.eq.s32.totalorder %v3448_v57, 0 }
 0x11b   :  { %v439_v59 = vxor.u32 2147483648, %v2731_v8  ;;  %v443_v41 = vsel %vm441_vm2, %v442_v49, %v2731_v8  ;;  %v643_v10 = vadd.s32 3, %v639_v12  ;;  %v632_v38 = vcvt.s32.f32 %v625_v56 }
 0x11c   :  { %v630_v33 = vand.u32 2147483647, %v629_v15  ;;  %v917_v14 = vmul.u32 %v910_v25, %v901_v6  ;;  %vm919_vm4 = vc.u32 %v3488_v0, %v3497_v54  ;;  %v920_v39 = vadd.s32 1, %v3498_v11 }
 0x11d   :  { %v1077_v48 = vand.u32 8388607, %v1070_v13  ;;  %v1088_v40 = vshrl.u32 %v2850_v32, %v3410_v26  ;;  %v1091_v50 = vshrl.u32 %v2851_v36, %v3410_v26  ;;  %v1087_v2 = vshll.u32 %v2852_v43, %v3276_v46 }
 0x11e   :  { %v633_v20 = vmul.f32 %v632_v38, %v630_v33  ;;  %v1090_v42 = vshll.u32 %v2850_v32, %v3276_v46  ;;  %v1094_v7 = vshrl.u32 %v2849_v29, %v3410_v26  ;;  %vm437_vm5 = vcmp.lt.s32.totalorder %v3448_v57, 2 }
 0x11f   :  { %v921_v52 = vsel %vm919_vm4, %v920_v39, %v3498_v11  ;;  %v1093_v25 = vshll.u32 %v2851_v36, %v3276_v46  ;;  %v1096_v60 = vshll.u32 %v2849_v29, %v3276_v46  ;;  %v1097_v35 = vshrl.u32 %v2848_v21, %v3410_v26 }
 0x120   :  { %v634_v47 = vxor.u32 2147483648, %v633_v20  ;;  %v922_v19 = vadd.s32 %v921_v52, %v917_v14  ;;  %v1089_v49 = vor.u32 %v1088_v40, %v1087_v2  ;;  %v1092_v37 = vor.u32 %v1091_v50, %v1090_v42 }
 0x121   :  { %v1095_v62 = vor.u32 %v1094_v7, %v1093_v25  ;;  %v1098_v8 = vor.u32 %v1097_v35, %v1096_v60  ;;  %v1099_v56 = vshll.u32 %v2848_v21, %v3276_v46  ;;  %v1100_v27 = vshrl.u32 %v2853_v53, %v3410_v26 }
 0x122   :  { %vm434_vm8 = vweird.f32 %v2991_v51  ;;  %v440_v12 = vsel %vm438_vm3, %v2729_v16, %v439_v59  ;;  %v635_v6 = vsel %vm552_vm9, %v634_v47, %v633_v20  ;;  %v923_v11 = vadd.s32 536870912, %v922_v19 }
 0x123   :  { %v1086_v15 = vshrl.u32 %v2852_v43, %v3410_v26  ;;  %v638_v9 = vsel %vm3483_vm1, %v3060_v1, %v635_v6  ;;  %v1078_v46 = vor.u32 8388608, %v1077_v48  ;;  %v1101_v33 = vor.u32 %v1100_v27, %v1099_v56 }
 0x124   :  { %vm1102_vm6 = vcmp.lt.s32.totalorder %v3407_v44, 1  ;;  %2732 = vcosq.f32 %v638_v9  ;;  %v3547_v38 = vshrl.u32 %v923_v11, 30  ;;  %vm1105_vm7 = vcmp.lt.s32.totalorder %v3407_v44, 4 }
 0x125   :  { %v1110_v16 = vsel %vm1102_vm6, %v1089_v49, %v1092_v37  ;;  %2734 = vsinq.f32 %v638_v9  ;;  %vm1104_vm9 = vcmp.lt.s32.totalorder %v3407_v44, 3  ;;  %v1111_v26 = vsel %vm1105_vm7, %v1098_v8, 920167782 }
 0x126   :  { %v1114_v30 = vsel %vm1102_vm6, %v1092_v37, %v1095_v62  ;;  %v925_v59 = vshll.u32 %v3547_v38, 30  ;;  %vm1103_vm11 = vcmp.lt.s32.totalorder %v3407_v44, 2  ;;  %v1112_v14 = vsel %vm1104_vm9, %v1095_v62, %v1111_v26 }
 0x127   :  { %v1115_v39 = vsel %vm1105_vm7, %v1101_v33, 1326507024  ;;  %v1107_v48 = vsel %vm1105_vm7, %v1095_v62, 2102212464  ;;  %v1113_v40 = vsel %vm1103_vm11, %v1110_v16, %v1112_v14  ;;  %v1118_v20 = vshll.u32 %v1078_v46, 8 }
 0x128   :  { %v1116_v50 = vsel %vm1104_vm9, %v1098_v8, %v1115_v39  ;;  %v444_v2 = vsel %vm437_vm5, %v440_v12, %v443_v41  ;;  %v3566_v42 = vadd.s32 24, %v2935_v18  ;;  %v3568_v7 = vsub.s32 %v922_v19, %v925_v59 }
 0x129   :  { %v1117_v52 = vsel %vm1103_vm11, %v1114_v30, %v1116_v50  ;;  %v644_v25 = vand.u32 3, %v643_v10  ;;  %v1106_v60 = vsel %vm1102_vm6, %v1086_v15, %v1089_v49  ;;  %v1108_v57 = vsel %vm1104_vm9, %v1092_v37, %v1107_v48 }
 0x12a   :  { %v3574_v35 = vmul.u32.u64.low %v1118_v20, %v1117_v52  ;;  %v3575_v47 = vmul.u32.u64.high %v1118_v20, %v1117_v52, %v3574_v35  ;;  %v928_v62 = vsub.s32 0, %v3568_v7  ;;  %v3585_v19 = vshrl.u32 %v3425_v31, 5 }
 0x12b   :  { %v3580_v41 = vmul.u32.u64.low %v1118_v20, %v1113_v40  ;;  %v3581_v18 = vmul.u32.u64.high %v1118_v20, %v1113_v40, %v3580_v41  ;;  %v3588_v10 = vsub.s32 32, %v3491_v58  ;;  %v263_v49 = vmax.f32 %v3060_v1, 0.0 }
 0x12c   :  { %v445_v8 = vsel %vm434_vm8, nan, %v444_v2  ;;  %vm642_vm12 = vweird.f32 %v3060_v1  ;;  %v3595_v56 = vmul.u32.u64.low 2863311531, %v3566_v42  ;;  %v3596_v37 = vmul.u32.u64.high 2863311531, %v3566_v42, %v3595_v56 }
 0x12d   :  { %v2536_v27 = vmin.u32 %v928_v62, %v3568_v7  ;;  %vm645_vm13 = vcmp.lt.s32.totalorder %v644_v25, 2  ;;  %vm646_vm1 = vcmp.eq.s32.totalorder %v644_v25, 0  ;;  %v302_v31 = vshrl.u32 %v3505_v28, 1 }
 0x12e   :  { %v1109_v12 = vsel %vm1103_vm11, %v1106_v60, %v1108_v57  ;;  %v2733_v6 = vpop.eup %2732  ;;  %v4893_v11 = vmax.f32 %v2991_v51, 0.0  ;;  %vm1127_vm2 = vc.u32 %v3575_v47, %v3580_v41  ;;  %v758_v46 = vand.u32 2147483647, %v3109_v55 }
 0x12f   :  { %v930_v9 = vclz %v2536_v27  ;;  %v2735_v33 = vpop.eup %2734  ;;  %vm649_vm3 = vcmp.eq.s32.totalorder %v644_v25, 2  ;;  %v650_v16 = vxor.u32 2147483648, %v2733_v6  ;;  %v918_v28 = vadd.s32 %v3497_v54, %v3488_v0 }
 0x130   :  { %v1174_v15 = vsel %vm338_vm10, %v445_v8, %v4893_v11  ;;  %v1128_v44 = vadd.s32 1, %v3581_v18  ;;  %v647_v26 = vxor.u32 2147483648, %v2735_v33  ;;  %v1125_v51 = vmul.u32 %v1118_v20, %v1109_v12 }
 0x131   :  { %v2537_v30 = vadd.s32 4294967294, %v930_v9  ;;  %v776_v59 = vshrl.u32 %v2850_v32, %v3588_v10  ;;  %v651_v14 = vsel %vm649_vm3, %v650_v16, %v2735_v33  ;;  %v1194_v39 = vsel %vm1182_vm15, %v3064_v4, %v1174_v15 }
 0x132   :  { %v1129_v48 = vsel %vm1127_vm2, %v1128_v44, %v3581_v18  ;;  %v775_v40 = vshll.u32 %v2852_v43, %v3491_v58  ;;  %v648_v0 = vsel %vm646_vm1, %v2733_v6, %v647_v26  ;;  %v765_v50 = vand.u32 8388607, %v758_v46 }
 0x133   :  { %vm2538_vm4 = vcmp.lt.s32.totalorder %v2537_v30, 0  ;;  %v1130_v54 = vadd.s32 %v1129_v48, %v1125_v51  ;;  %v652_v20 = vsel %vm645_vm13, %v648_v0, %v651_v14  ;;  %v778_v52 = vshll.u32 %v2850_v32, %v3491_v58 }
 0x134   :  { %v933_v2 = vsel %vm2538_vm4, 0, %v2537_v30  ;;  %v779_v4 = vshrl.u32 %v2851_v36, %v3588_v10  ;;  %v653_v60 = vsel %vm642_vm12, nan, %v652_v20  ;;  %v777_v57 = vor.u32 %v776_v59, %v775_v40 }
 0x135   :  { %v934_v35 = vsub.s32 32, %v933_v2  ;;  %v938_v62 = vsub.s32 4294967266, %v933_v2  ;;  %v1176_v18 = vsel %vm339_vm14, %v653_v60, %v263_v49  ;;  %v935_v8 = vshll.u32 %v3568_v7, %v933_v2 }
 0x136   :  { %v1131_v25 = vadd.s32 536870912, %v1130_v54  ;;  %v782_v56 = vshrl.u32 %v2849_v29, %v3588_v10  ;;  %v1196_v27 = vsel %vm1183_vm0, %v3202_v17, %v1176_v18  ;;  %v785_v1 = vshrl.u32 %v2848_v21, %v3588_v10 }
 0x137   :  { %v936_v12 = vshrl.u32 %v918_v28, %v934_v35  ;;  %v939_v6 = vadd.s32 127, %v938_v62  ;;  %v2595_v11 = vpack.c.bf16 %v1196_v27, %v1194_v39  ;;  %vm864_vm5 = vcmp.lt.s32.totalorder %v3114_v45, 0 }
 0x138   :  { %v3641_v15 = vshrl.u32 %v1131_v25, 30  ;;  %v780_v49 = vor.u32 %v779_v4, %v778_v52  ;;  %v784_v7 = vshll.u32 %v2849_v29, %v3491_v58  ;;  %v781_v16 = vshll.u32 %v2851_v36, %v3491_v58 }
 0x139   :  { %v937_v9 = vor.u32 %v936_v12, %v935_v8  ;;  %v940_v33 = vshll.u32 %v939_v6, 23  ;;  %v788_v17 = vshrl.u32 %v2853_v53, %v3588_v10  ;;  %2596 = vmatpush1.bf16.msra.mxu0 %v2595_v11  ;;  %v313_v28 = vshrl.u32 %v3596_v37, 1 }
 0x13a   :  { %v1133_v44 = vshll.u32 %v3641_v15, 30  ;;  %v786_v26 = vor.u32 %v785_v1, %v784_v7  ;;  %v787_v30 = vshll.u32 %v2848_v21, %v3491_v58  ;;  %v303_v51 = vmul.u32 3, %v302_v31 }
 0x13b   :  { %vm3655_vm8 = vcmp.le.f32.partialorder %v862_v3, 0.7853982  ;;  %v941_v14 = vor.u32 4788187, %v940_v33  ;;  %v948_v39 = vsub.s32 4, %v3547_v38  ;;  %v783_v48 = vor.u32 %v782_v56, %v781_v16 }
 0x13c   :  { %v3660_v40 = vsub.s32 %v1130_v54, %v1133_v44  ;;  %v766_v37 = vor.u32 8388608, %v765_v50  ;;  %v789_v0 = vor.u32 %v788_v17, %v787_v30  ;;  %vm790_vm6 = vcmp.lt.s32.totalorder %v3585_v19, 1 }
 0x13d   :  { %v942_v20 = vand.u32 2147483647, %v941_v14  ;;  %v944_v2 = vcvt.s32.f32 %v937_v9  ;;  %vm793_vm7 = vcmp.lt.s32.totalorder %v3585_v19, 4  ;;  %v798_v3 = vsel %vm790_vm6, %v777_v57, %v780_v49 }
 0x13e   :  { %v1136_v58 = vsub.s32 0, %v3660_v40  ;;  %v774_v31 = vshrl.u32 %v2852_v43, %v3588_v10  ;;  %vm792_vm9 = vcmp.lt.s32.totalorder %v3585_v19, 3  ;;  %v799_v54 = vsel %vm793_vm7, %v786_v26, 920167782 }
 0x13f   :  { %v945_v52 = vmul.f32 %v944_v2, %v942_v20  ;;  %vm791_vm11 = vcmp.lt.s32.totalorder %v3585_v19, 2  ;;  %v795_v50 = vsel %vm793_vm7, %v783_v48, 2102212464  ;;  %v800_v4 = vsel %vm792_vm9, %v783_v48, %v799_v54 }
 0x140   :  { %v2544_v60 = vmin.u32 %v1136_v58, %v3660_v40  ;;  %v801_v35 = vsel %vm791_vm11, %v798_v3, %v800_v4  ;;  %v802_v62 = vsel %vm790_vm6, %v780_v49, %v783_v48  ;;  %v803_v18 = vsel %vm793_vm7, %v789_v0, 1326507024 }
 0x141   :  { %v946_v10 = vxor.u32 2147483648, %v945_v52  ;;  %v949_v8 = vsel %vm864_vm5, %v948_v39, %v3547_v38  ;;  %v804_v25 = vsel %vm792_vm9, %v786_v26, %v803_v18  ;;  %v806_v56 = vshll.u32 %v766_v37, 8 }
 0x142   :  { %v314_v27 = vmul.u32 3, %v313_v28  ;;  %v1138_v12 = vclz %v2544_v60  ;;  %v794_v6 = vsel %vm790_vm6, %v774_v31, %v777_v57  ;;  %v796_v1 = vsel %vm792_vm9, %v780_v49, %v795_v50 }
 0x143   :  { %v947_v11 = vsel %vm864_vm5, %v946_v10, %v945_v52  ;;  %v805_v7 = vsel %vm791_vm11, %v802_v62, %v804_v25  ;;  %v3691_v9 = vmul.u32.u64.low %v806_v56, %v801_v35  ;;  %v3692_v38 = vmul.u32.u64.high %v806_v56, %v801_v35, %v3691_v9 }
 0x144   :  { %v951_v33 = vsel %vm3655_vm8, 0, %v949_v8  ;;  %v2545_v16 = vadd.s32 4294967294, %v1138_v12  ;;  %v3697_v17 = vmul.u32.u64.low %v806_v56, %v805_v7  ;;  %v3698_v28 = vmul.u32.u64.high %v806_v56, %v805_v7, %v3697_v17 }
 0x145   :  { %v3701_v57 = vshrl.u32 %v3257_v5, 5  ;;  %v3704_v49 = vsub.s32 32, %v3404_v61  ;;  %2736 = vtanh.f32 %v3114_v45  ;;  %v950_v44 = vsel %vm3655_vm8, %v3114_v45, %v947_v11 }
 0x146   :  { %v266_v26 = vmax.f32 %v3114_v45, 0.0  ;;  %v3712_v30 = vsub.s32 %v3465_v34, %v303_v51  ;;  %vm2546_vm12 = vcmp.lt.s32.totalorder %v2545_v16, 0  ;;  %v797_v14 = vsel %vm791_vm11, %v794_v6, %v796_v1 }
 0x147   :  { %v3717_v5 = vsub.s32 %v3566_v42, %v314_v27  ;;  %v955_v39 = vadd.s32 3, %v951_v33  ;;  %v1141_v48 = vsel %vm2546_vm12, 0, %v2545_v16  ;;  %v816_v37 = vadd.s32 1, %v3692_v38 }
 0x148   :  { %2738 = vcosq.f32 %v950_v44  ;;  %v1126_v59 = vadd.s32 %v3580_v41, %v3575_v47  ;;  %v1142_v0 = vsub.s32 32, %v1141_v48  ;;  %v1146_v20 = vsub.s32 4294967266, %v1141_v48 }
 0x149   :  { %2740 = vsinq.f32 %v950_v44  ;;  %v1156_v34 = vsub.s32 4, %v3641_v15  ;;  %v813_v51 = vmul.u32 %v806_v56, %v797_v14  ;;  %vm815_vm13 = vc.u32 %v3698_v28, %v3691_v9 }
 0x14a   :  { %v1143_v42 = vshll.u32 %v3660_v40, %v1141_v48  ;;  %v1144_v19 = vshrl.u32 %v1126_v59, %v1142_v0  ;;  %v1147_v2 = vadd.s32 127, %v1146_v20  ;;  %v817_v3 = vsel %vm815_vm13, %v816_v37, %v3692_v38 }
 0x14b   :  { %v3728_v58 = vadd.s32 3, %v3712_v30  ;;  %vm3732_vm1 = vcmp.le.f32.partialorder %v1070_v13, 0.7853982  ;;  %v818_v41 = vadd.s32 %v817_v3, %v813_v51  ;;  %v966_v31 = vand.u32 2147483647, %v3049_v63 }
 0x14c   :  { %v3737_v54 = vand.u32 3, %v955_v39  ;;  %vm1072_vm2 = vcmp.lt.s32.totalorder %v3053_v22, 0  ;;  %v1145_v40 = vor.u32 %v1144_v19, %v1143_v42  ;;  %v1148_v52 = vshll.u32 %v1147_v2, 23 }
 0x14d   :  { %v819_v50 = vadd.s32 536870912, %v818_v41  ;;  %v984_v4 = vshrl.u32 %v2850_v32, %v3704_v49  ;;  %v987_v60 = vshrl.u32 %v2851_v36, %v3704_v49  ;;  %v993_v13 = vshrl.u32 %v2848_v21, %v3704_v49 }
 0x14e   :  { %v1149_v35 = vor.u32 4788187, %v1148_v52  ;;  %v1157_v62 = vsel %vm1072_vm2, %v1156_v34, %v3641_v15  ;;  %v983_v18 = vshll.u32 %v2852_v43, %v3404_v61  ;;  %v990_v10 = vshrl.u32 %v2849_v29, %v3704_v49 }
 0x14f   :  { %v3753_v8 = vpop.eup %2736  ;;  %vm320_vm3 = vcmp.ne.s32.totalorder %v3712_v30, 0  ;;  %vm324_vm4 = vcmp.lt.s32.totalorder %v3712_v30, 0  ;;  %v3757_v25 = vshrl.u32 %v819_v50, 30  ;;  %v973_v56 = vand.u32 8388607, %v966_v31 }
 0x150   :  { %v986_v15 = vshll.u32 %v2850_v32, %v3404_v61  ;;  %v992_v27 = vshll.u32 %v2849_v29, %v3404_v61  ;;  %v1150_v12 = vand.u32 2147483647, %v1149_v35  ;;  %v1152_v6 = vcvt.s32.f32 %v1145_v40 }
 0x151   :  { %v989_v1 = vshll.u32 %v2851_v36, %v3404_v61  ;;  %v996_v11 = vshrl.u32 %v2853_v53, %v3704_v49  ;;  %v821_v7 = vshll.u32 %v3757_v25, 30  ;;  %v985_v38 = vor.u32 %v984_v4, %v983_v18 }
 0x152   :  { %v988_v33 = vor.u32 %v987_v60, %v986_v15  ;;  %v994_v16 = vor.u32 %v993_v13, %v992_v27  ;;  %v2739_v17 = vpop.eup %2738  ;;  %v1153_v44 = vmul.f32 %v1152_v6, %v1150_v12  ;;  %v1159_v14 = vsel %vm3732_vm1, 0, %v1157_v62 }
 0x153   :  { %v991_v39 = vor.u32 %v990_v10, %v989_v1  ;;  %v995_v48 = vshll.u32 %v2848_v21, %v3404_v61  ;;  %v2741_v37 = vpop.eup %2740  ;;  %vm958_vm5 = vcmp.eq.s32.totalorder %v3737_v54, 0  ;;  %v3775_v59 = vsub.s32 %v818_v41, %v821_v7 }
 0x154   :  { %v974_v0 = vor.u32 8388608, %v973_v56  ;;  %v982_v20 = vshrl.u32 %v2852_v43, %v3704_v49  ;;  %vm998_vm8 = vcmp.lt.s32.totalorder %v3701_v57, 1  ;;  %v1154_v34 = vxor.u32 2147483648, %v1153_v44 }
 0x155   :  { %v997_v51 = vor.u32 %v996_v11, %v995_v48  ;;  %vm999_vm6 = vcmp.lt.s32.totalorder %v3701_v57, 2  ;;  %vm1001_vm7 = vcmp.lt.s32.totalorder %v3701_v57, 4  ;;  %vm321_vm9 = vcmp.ne.s32.totalorder %v3717_v5, 0 }
 0x156   :  { %vm325_vm11 = vcmp.lt.s32.totalorder %v3717_v5, 0  ;;  %v824_v61 = vsub.s32 0, %v3775_v59  ;;  %vm1000_vm12 = vcmp.lt.s32.totalorder %v3701_v57, 3  ;;  %v1006_v42 = vsel %vm998_vm8, %v985_v38, %v988_v33 }
 0x157   :  { %v1007_v49 = vsel %vm1001_vm7, %v994_v16, 920167782  ;;  %v959_v19 = vxor.u32 2147483648, %v2741_v37  ;;  %v962_v2 = vxor.u32 2147483648, %v2739_v17  ;;  %v1155_v3 = vsel %vm1072_vm2, %v1154_v34, %v1153_v44 }
 0x158   :  { %v1008_v41 = vsel %vm1000_vm12, %v991_v39, %v1007_v49  ;;  %v1158_v40 = vsel %vm3732_vm1, %v3053_v22, %v1155_v3  ;;  %v2532_v52 = vmin.u32 %v824_v61, %v3775_v59  ;;  %v1003_v50 = vsel %vm1001_vm7, %v991_v39, 2102212464  ;;  %vm328_vm1 = vmand %vm324_vm4, %vm320_vm3 }
 0x159   :  { %v1010_v4 = vsel %vm998_vm8, %v988_v33, %v991_v39  ;;  %2742 = vcosq.f32 %v1158_v40  ;;  %v1009_v60 = vsel %vm999_vm6, %v1006_v42, %v1008_v41  ;;  %v1011_v13 = vsel %vm1001_vm7, %v997_v51, 1326507024  ;;  %vm329_vm4 = vmand %vm325_vm11, %vm321_vm9 }
 0x15a   :  { %v1014_v35 = vshll.u32 %v974_v0, 8  ;;  %vm961_vm13 = vcmp.eq.s32.totalorder %v3737_v54, 2  ;;  %2744 = vsinq.f32 %v1158_v40  ;;  %v826_v47 = vclz %v2532_v52 }
 0x15b   :  { %v1002_v62 = vsel %vm998_vm8, %v982_v20, %v985_v38  ;;  %v1004_v18 = vsel %vm1000_vm12, %v988_v33, %v1003_v50  ;;  %v1012_v10 = vsel %vm1000_vm12, %v994_v16, %v1011_v13  ;;  %v963_v27 = vsel %vm961_vm13, %v962_v2, %v2741_v37 }
 0x15c   :  { %v3817_v56 = vmul.u32.u64.low %v1014_v35, %v1009_v60  ;;  %v3818_v15 = vmul.u32.u64.high %v1014_v35, %v1009_v60, %v3817_v56  ;;  %v1163_v12 = vadd.s32 3, %v1159_v14  ;;  %v2533_v6 = vadd.s32 4294967294, %v826_v47 }
 0x15d   :  { %v1013_v1 = vsel %vm999_vm6, %v1010_v4, %v1012_v10  ;;  %v960_v11 = vsel %vm958_vm5, %v2739_v17, %v959_v19  ;;  %v333_v33 = vadd.s32 3, %v3717_v5  ;;  %v3831_v16 = vsel %vm328_vm1, %v3728_v58, %v3712_v30 }
 0x15e   :  { %v3825_v7 = vmul.u32.u64.low %v1014_v35, %v1013_v1  ;;  %v3826_v38 = vmul.u32.u64.high %v1014_v35, %v1013_v1, %v3825_v7  ;;  %vm2534_vm2 = vcmp.lt.s32.totalorder %v2533_v6, 0  ;;  %v1005_v44 = vsel %vm999_vm6, %v1002_v62, %v1004_v18 }
 0x15f   :  { %v2854_v14 = vmov 0.0   ;;  %vm957_vm3 = vcmp.lt.s32.totalorder %v3737_v54, 2  ;;  %2746 = vtanh.f32 %v3053_v22  ;;  %v829_v17 = vsel %vm2534_vm2, 0, %v2533_v6 }
 0x160   :  { %1307 = vmatprep.mubr.f32.mxu0 %v2854_v14  ;;  %2270 = vmatprep.mubr.f32.mxu1 %v2854_v14  ;;  %v1024_v39 = vadd.s32 1, %v3818_v15  ;;  %v964_v48 = vsel %vm957_vm3, %v960_v11, %v963_v27  ;;  %v814_v30 = vadd.s32 %v3691_v9, %v3698_v28  ;;  %v830_v58 = vsub.s32 32, %v829_v17 }
 0x161   :  { %v834_v37 = vsub.s32 4294967266, %v829_v17  ;;  %v268_v57 = vmax.f32 %v3053_v22, 0.0  ;;  %v1164_v0 = vand.u32 3, %v1163_v12  ;;  %v1021_v54 = vmul.u32 %v1014_v35, %v1005_v44 }
 0x162   :  { %vm1023_vm5 = vc.u32 %v3826_v38, %v3817_v56  ;;  %vm954_vm8 = vweird.f32 %v3114_v45  ;;  %v832_v20 = vshrl.u32 %v814_v30, %v830_v58  ;;  %vm340_vm6 = vcmp.eq.s32.totalorder %v3831_v16, 1 }
 0x163   :  { %v835_v34 = vadd.s32 127, %v834_v37  ;;  %v1025_v9 = vsel %vm1023_vm5, %v1024_v39, %v3818_v15  ;;  %v2743_v28 = vpop.eup %2742  ;;  %v965_v51 = vsel %vm954_vm8, nan, %v964_v48  ;;  %v831_v61 = vshll.u32 %v3775_v59, %v829_v17 }
 0x164   :  { %v1026_v42 = vadd.s32 %v1025_v9, %v1021_v54  ;;  %v2745_v49 = vpop.eup %2744  ;;  %v3854_v19 = vsel %vm329_vm4, %v333_v33, %v3717_v5  ;;  %v1170_v2 = vxor.u32 2147483648, %v2743_v28  ;;  %vm4883_vm7 = vcmp.eq.s32.totalorder %v3831_v16, 0 }
 0x165   :  { %v836_v3 = vshll.u32 %v835_v34, 23  ;;  %v1167_v41 = vxor.u32 2147483648, %v2745_v49  ;;  %vm1169_vm9 = vcmp.eq.s32.totalorder %v1164_v0, 2  ;;  %v833_v40 = vor.u32 %v832_v20, %v831_v61 }
 0x166   :  { %v1027_v52 = vadd.s32 536870912, %v1026_v42  ;;  %vm1166_vm11 = vcmp.eq.s32.totalorder %v1164_v0, 0  ;;  %v1171_v50 = vsel %vm1169_vm9, %v1170_v2, %v2745_v49  ;;  %v1179_v59 = vsel %vm340_vm6, %v965_v51, %v266_v26 }
 0x167   :  { %v837_v4 = vor.u32 4788187, %v836_v3  ;;  %vm341_vm12 = vcmp.eq.s32.totalorder %v3854_v19, 1  ;;  %vm1165_vm13 = vcmp.lt.s32.totalorder %v1164_v0, 2  ;;  %v1168_v5 = vsel %vm1166_vm11, %v2743_v28, %v1167_v41 }
 0x168   :  { %v1028_v60 = vshrl.u32 %v1027_v52, 30  ;;  %vm1162_vm1 = vweird.f32 %v3053_v22  ;;  %v1172_v13 = vsel %vm1165_vm13, %v1168_v5, %v1171_v50  ;;  %vm4882_vm2 = vcmp.eq.s32.totalorder %v3854_v19, 0 }
 0x169   :  { %v838_v35 = vand.u32 2147483647, %v837_v4  ;;  %v2747_v47 = vpop.eup %2746  ;;  %v1173_v62 = vsel %vm1162_vm1, nan, %v1172_v13  ;;  %v1199_v45 = vsel %vm4883_vm7, %v3753_v8, %v1179_v59  ;;  %v840_v18 = vcvt.s32.f32 %v833_v40 }
 0x16a   :  { %v1029_v26 = vshll.u32 %v1028_v60, 30  ;;  %v1181_v10 = vsel %vm341_vm12, %v1173_v62, %v268_v57  ;;  %vm760_vm3 = vcmp.lt.s32.totalorder %v3109_v55, 0  ;;  %vm3876_vm4 = vcmp.le.f32.partialorder %v758_v46, 0.7853982 }
 0x16b   :  { %v1201_v15 = vsel %vm4882_vm2, %v2747_v47, %v1181_v10  ;;  %v841_v27 = vmul.f32 %v840_v18, %v838_v35  ;;  %v1022_v48 = vadd.s32 %v3817_v56, %v3826_v38  ;;  %v844_v37 = vsub.s32 4, %v3757_v25 }
 0x16c   :  { %v1030_v22 = vsub.s32 %v1026_v42, %v1029_v26  ;;  %v2597_v12 = vpack.c.bf16 %v1201_v15, %v1199_v45  ;;  %v1052_v61 = vsub.s32 4, %v1028_v60  ;;  %vm968_vm8 = vcmp.lt.s32.totalorder %v3049_v63, 0 }
 0x16d   :  { %v842_v1 = vxor.u32 2147483648, %v841_v27  ;;  %v845_v34 = vsel %vm760_vm3, %v844_v37, %v3757_v25  ;;  %vm967_vm9 = vcmp.le.f32.partialorder %v966_v31, 0.7853982  ;;  %v265_v18 = vmax.f32 %v3109_v55, 0.0 }
 0x16e   :  { %v1032_v6 = vsub.s32 0, %v1030_v22  ;;  %2598 = vmatprep.subr.bf16.mxu0 %v2597_v12  ;;  %v847_v28 = vsel %vm3876_vm4, 0, %v845_v34  ;;  %v1053_v40 = vsel %vm968_vm8, %v1052_v61, %v1028_v60 }
 0x16f   :  { %v843_v8 = vsel %vm760_vm3, %v842_v1, %v841_v27  ;;  %v851_v42 = vadd.s32 3, %v847_v28  ;;  %v1055_v4 = vsel %vm967_vm9, 0, %v1053_v40  ;;  %vm850_vm3 = vweird.f32 %v3109_v55 }
 0x170   :  { %v2540_v11 = vmin.u32 %v1032_v6, %v1030_v22  ;;  %v846_v17 = vsel %vm3876_vm4, %v3109_v55, %v843_v8  ;;  %v1059_v35 = vadd.s32 3, %v1055_v4  ;;  %v267_v6 = vmax.f32 %v3049_v63, 0.0 }
 0x171   :  { %2748 = vcosq.f32 %v846_v17  ;;  %v852_v25 = vand.u32 3, %v851_v42 }
 0x172   :  { %v1034_v7 = vclz %v2540_v11  ;;  %2750 = vsinq.f32 %v846_v17  ;;  %v1060_v31 = vand.u32 3, %v1059_v35  ;;  %v1202_v17 = vld [vmem:[%s4875_s3] sm:$0xff] }
 0x173   :  { %vm854_vm11 = vcmp.eq.s32.totalorder %v852_v25, 0  ;;  %vm857_vm13 = vcmp.eq.s32.totalorder %v852_v25, 2  ;;  %vm853_vm1 = vcmp.lt.s32.totalorder %v852_v25, 2 }
 0x174   :  { %v2541_v33 = vadd.s32 4294967294, %v1034_v7  ;;  %vm1065_vm4 = vcmp.eq.s32.totalorder %v1060_v31, 2 }
 0x176   :  { %vm2542_vm5 = vcmp.lt.s32.totalorder %v2541_v33, 0 }
 0x177   :  { %v1037_v39 = vsel %vm2542_vm5, 0, %v2541_v33  ;;  %vm1062_vm5 = vcmp.eq.s32.totalorder %v1060_v31, 0 }
 0x178   :  { %v1038_v30 = vsub.s32 32, %v1037_v39  ;;  %v1042_v58 = vsub.s32 4294967266, %v1037_v39  ;;  %v1039_v57 = vshll.u32 %v1030_v22, %v1037_v39  ;;  %v1204_v39 = vld [vmem:[%s4875_s3 + $0x10] sm:$0xff] }
 0x17a   :  { %v1040_v0 = vshrl.u32 %v1022_v48, %v1038_v30  ;;  %v1043_v46 = vadd.s32 127, %v1042_v58  ;;  %v1205_v48 = vld [vmem:[%s4875_s3 + $0x18] sm:$0xff]  ;;  %v1213_v30 = vpop.permute.xlu1 %1212 }
 0x17b   :  { %v2749_v49 = vpop.eup %2748 }
 0x17c   :  { %v1041_v54 = vor.u32 %v1040_v0, %v1039_v57  ;;  %v1044_v20 = vshll.u32 %v1043_v46, 23  ;;  %v2751_v3 = vpop.eup %2750  ;;  %v858_v59 = vxor.u32 2147483648, %v2749_v49  ;;  %v1218_v46 = vpop.permute.xlu0 %1217 }
 0x17d   :  { %v855_v50 = vxor.u32 2147483648, %v2751_v3 }
 0x17e   :  { %v1045_v9 = vor.u32 4788187, %v1044_v20  ;;  %v1048_v38 = vcvt.s32.f32 %v1041_v54  ;;  %v859_v13 = vsel %vm857_vm13, %v858_v59, %v2751_v3 }
 0x17f   :  { %v856_v5 = vsel %vm854_vm11, %v2749_v49, %v855_v50  ;;  %vm4881_vm11 = vcmask 261120  }
 0x180   :  { %v1046_v56 = vand.u32 2147483647, %v1045_v9  ;;  %v860_v47 = vsel %vm853_vm1, %v856_v5, %v859_v13 }
 0x181   :  { %v861_v62 = vsel %vm850_vm3, nan, %v860_v47 }
 0x182   :  { %v1049_v51 = vmul.f32 %v1048_v38, %v1046_v56  ;;  %v1178_v27 = vsel %vm340_vm6, %v861_v62, %v265_v18 }
 0x184   :  { %v1050_v2 = vxor.u32 2147483648, %v1049_v51 }
 0x186   :  { %v1051_v41 = vsel %vm968_vm8, %v1050_v2, %v1049_v51  ;;  %vm1061_vm8 = vcmp.lt.s32.totalorder %v1060_v31, 2 }
 0x187   :  { %v1054_v52 = vsel %vm967_vm9, %v3049_v63, %v1051_v41  ;;  %vm1058_vm9 = vweird.f32 %v3049_v63 }
 0x188   :  { %2752 = vcosq.f32 %v1054_v52 }
 0x189   :  { %2754 = vsinq.f32 %v1054_v52  ;;  %v1223_v52 = vpop.permute.xlu1 %1222 }
 0x18a   :  { %2756 = vtanh.f32 %v3109_v55 }
 0x18b   :  { %2758 = vtanh.f32 %v3049_v63  ;;  %v1203_v63 = vld [vmem:[%s4875_s3 + $0x8] sm:$0xff] }
 0x192   :  { %v2753_v60 = vpop.eup %2752 }
 0x193   :  { %v2755_v45 = vpop.eup %2754  ;;  %v1066_v26 = vxor.u32 2147483648, %v2753_v60 }
 0x194   :  { %v1063_v10 = vxor.u32 2147483648, %v2755_v45  ;;  %v2757_v12 = vpop.eup %2756 }
 0x195   :  { %v1067_v15 = vsel %vm1065_vm4, %v1066_v26, %v2755_v45  ;;  %v1198_v55 = vsel %vm4883_vm7, %v2757_v12, %v1178_v27  ;;  %v2759_v7 = vpop.eup %2758 }
 0x196   :  { %v1064_v22 = vsel %vm1062_vm5, %v2753_v60, %v1063_v10 }
 0x197   :  { %v1068_v1 = vsel %vm1061_vm8, %v1064_v22, %v1067_v15 }
 0x198   :  { %v1069_v11 = vsel %vm1058_vm9, nan, %v1068_v1 }
 0x199   :  { %v1180_v8 = vsel %vm341_vm12, %v1069_v11, %v267_v6 }
 0x19a   :  { %v1200_v33 = vsel %vm4882_vm2, %v2759_v7, %v1180_v8 }
 0x19b   :  { %v2599_v44 = vpack.c.bf16 %v1200_v33, %v1198_v55 }
 0x19d   :  { %2600 = vmatpush1.bf16.msra.mxu0 %v2599_v44 }
 0x1a0   :  { %2547 = vmatmul.mubr.msk.f32.vlgmr.msra.gmra.mrb[0].mxu0 %vm4881_vm11, %v1202_v17 }
 0x1a1   :  { %1313 = vmatprep.mubr.f32.mxu0 %v2854_v14 }
 0x1a4   :  { %2548 = vmatmul.mubr.msk.f32.gmra.mrb[2].mxu0 %vm4881_vm11, %v1203_v63 }
 0x1a5   :  { %1319 = vmatprep.mubr.f32.mxu0 %v2854_v14 }
 0x1a8   :  { %2549 = vmatmul.mubr.msk.f32.gmra.mrb[4].mxu0 %vm4881_vm11, %v1204_v39 }
 0x1a9   :  { %1325 = vmatprep.mubr.f32.mxu0 %v2854_v14 }
 0x1ac   :  { %2550 = vmatmul.mubr.msk.f32.gmra.mrb[6].mxu0 %vm4881_vm11, %v1205_v48 }
 0x273   :  { %v1309_v58 = vpop.f32.mrb[0].mxu0 }
 0x274   :  { %v3928_v37 = vadd.f32 %v1309_v58, %v1213_v30  ;;  %v1311_v57 = vpop.f32.mrb[1].mxu0 }
 0x275   :  { %v3930_v0 = vadd.f32 %v1311_v57, %v1213_v30 }
 0x276   :  { %v1343_v34 = vand.u32 2139095040, %v3928_v37  ;;  %2760 = vtanh.f32 %v3928_v37  ;;  %v1340_v12 = vand.u32 2147483647, %v3928_v37 }
 0x277   :  { %v1447_v54 = vand.u32 2139095040, %v3930_v0  ;;  %v1315_v20 = vpop.f32.mrb[2].mxu0  ;;  %v1444_v47 = vand.u32 2147483647, %v3930_v0  ;;  %2762 = vtanh.f32 %v3930_v0  ;;  %v1333_v6 = vmax.f32 %v3930_v0, 0.0 }
 0x278   :  { %v3934_v14 = vadd.f32 %v1315_v20, %v1218_v46  ;;  %v1317_v9 = vpop.f32.mrb[3].mxu0  ;;  %v1344_v49 = vshrl.u32 %v1343_v34, 23 }
 0x279   :  { %v1448_v28 = vshrl.u32 %v1447_v54, 23  ;;  %v3936_v56 = vadd.f32 %v1317_v9, %v1218_v46  ;;  %v1451_v10 = vand.u32 8388607, %v1444_v47 }
 0x27a   :  { %v1551_v38 = vand.u32 2139095040, %v3934_v14  ;;  %v2551_v50 = vadd.s32 4294967169, %v1344_v49 }
 0x27b   :  { %v2555_v51 = vadd.s32 4294967169, %v1448_v28  ;;  %v1655_v61 = vand.u32 2139095040, %v3936_v56  ;;  %v1321_v42 = vpop.f32.mrb[4].mxu0  ;;  %v1452_v1 = vor.u32 8388608, %v1451_v10  ;;  %v1652_v11 = vand.u32 2147483647, %v3936_v56 }
 0x27c   :  { %v1323_v2 = vpop.f32.mrb[5].mxu0  ;;  %v1552_v41 = vshrl.u32 %v1551_v38, 23  ;;  %v3940_v35 = vadd.f32 %v1321_v42, %v1223_v52  ;;  %v1350_v60 = vadd.s32 1, %v2551_v50  ;;  %2764 = vtanh.f32 %v3936_v56 }
 0x27d   :  { %v1454_v3 = vadd.s32 1, %v2555_v51  ;;  %v1656_v40 = vshrl.u32 %v1655_v61, 23  ;;  %v3943_v45 = vadd.f32 %v1323_v2, %v1223_v52  ;;  %v1228_v61 = vpop.permute.xlu0 %1227 }
 0x27e   :  { %v2559_v13 = vadd.s32 4294967169, %v1552_v41  ;;  %v1759_v26 = vand.u32 2139095040, %v3940_v35  ;;  %vm1351_vm1 = vcmp.gt.s32.totalorder %v1350_v60, 0 }
 0x27f   :  { %vm1455_vm13 = vcmp.gt.s32.totalorder %v1454_v3, 0  ;;  %v1327_v25 = vpop.f32.mrb[6].mxu0  ;;  %v2563_v4 = vadd.s32 4294967169, %v1656_v40  ;;  %v1863_v27 = vand.u32 2139095040, %v3943_v45  ;;  %v3954_v55 = vsel %vm1351_vm1, %v1350_v60, 0 }
 0x280   :  { %v1456_v59 = vsel %vm1455_vm13, %v1454_v3, 0  ;;  %v1329_v5 = vpop.f32.mrb[7].mxu0  ;;  %v1558_v18 = vadd.s32 1, %v2559_v13  ;;  %v1760_v22 = vshrl.u32 %v1759_v26, 23  ;;  %v3971_v42 = vand.u32 31, %v3954_v55  ;;  %v3985_v13 = vpop.eup %2760 }
 0x281   :  { %v1458_v31 = vand.u32 31, %v1456_v59  ;;  %v1662_v62 = vadd.s32 1, %v2563_v4  ;;  %v1457_v7 = vshrl.u32 %v1456_v59, 5  ;;  %v1864_v17 = vshrl.u32 %v1863_v27, 23 }
 0x282   :  { %vm1559_vm4 = vcmp.gt.s32.totalorder %v1558_v18, 0  ;;  %v2567_v48 = vadd.s32 4294967169, %v1760_v22  ;;  %v3980_v52 = vadd.f32 %v1327_v25, %v1228_v61  ;;  %v3982_v59 = vadd.f32 %v1329_v5, %v1228_v61 }
 0x283   :  { %v1459_v15 = vsub.s32 32, %v1458_v31  ;;  %vm1663_vm3 = vcmp.gt.s32.totalorder %v1662_v62, 0  ;;  %v3957_v44 = vsel %vm1559_vm4, %v1558_v18, 0  ;;  %v1461_v63 = vshll.u32 %v2852_v43, %v1458_v31  ;;  %v3988_v18 = vpop.eup %2762 }
 0x284   :  { %v1664_v8 = vsel %vm1663_vm3, %v1662_v62, 0  ;;  %v1464_v30 = vshll.u32 %v2850_v32, %v1458_v31  ;;  %v1467_v58 = vshll.u32 %v2851_v36, %v1458_v31  ;;  %v1470_v20 = vshll.u32 %v2849_v29, %v1458_v31 }
 0x285   :  { %v1462_v33 = vshrl.u32 %v2850_v32, %v1459_v15  ;;  %v1465_v39 = vshrl.u32 %v2851_v36, %v1459_v15  ;;  %v1468_v57 = vshrl.u32 %v2849_v29, %v1459_v15  ;;  %v3964_v46 = vand.u32 31, %v1664_v8 }
 0x286   :  { %v1471_v34 = vshrl.u32 %v2848_v21, %v1459_v15  ;;  %v1473_v38 = vshll.u32 %v2848_v21, %v1458_v31  ;;  %v1474_v51 = vshrl.u32 %v2853_v53, %v1459_v15  ;;  %v3974_v49 = vand.u32 31, %v3957_v44 }
 0x287   :  { %v1463_v54 = vor.u32 %v1462_v33, %v1461_v63  ;;  %v1466_v9 = vor.u32 %v1465_v39, %v1464_v30  ;;  %v1469_v28 = vor.u32 %v1468_v57, %v1467_v58  ;;  %v2571_v2 = vadd.s32 4294967169, %v1864_v17 }
 0x288   :  { %v1472_v3 = vor.u32 %v1471_v34, %v1470_v20  ;;  %v3976_v41 = vshrl.u32 %v1664_v8, 5  ;;  %v3978_v40 = vadd.s32 1, %v2567_v48  ;;  %v1475_v50 = vor.u32 %v1474_v51, %v1473_v38 }
 0x289   :  { %v1460_v4 = vshrl.u32 %v2852_v43, %v1459_v15  ;;  %vm1476_vm5 = vcmp.lt.s32.totalorder %v1457_v7, 1  ;;  %vm1479_vm8 = vcmp.lt.s32.totalorder %v1457_v7, 4  ;;  %v1667_v31 = vsub.s32 32, %v3964_v46 }
 0x28a   :  { %vm1477_vm9 = vcmp.lt.s32.totalorder %v1457_v7, 2  ;;  %v1481_v60 = vsel %vm1479_vm8, %v1469_v28, 2102212464  ;;  %v1484_v62 = vsel %vm1476_vm5, %v1463_v54, %v1466_v9  ;;  %vm1478_vm13 = vcmp.lt.s32.totalorder %v1457_v7, 3 }
 0x28b   :  { %v1480_v26 = vsel %vm1476_vm5, %v1460_v4, %v1463_v54  ;;  %v1485_v25 = vsel %vm1479_vm8, %v1472_v3, 920167782  ;;  %v1488_v10 = vsel %vm1476_vm5, %v1466_v9, %v1469_v28  ;;  %v1482_v27 = vsel %vm1478_vm13, %v1466_v9, %v1481_v60 }
 0x28c   :  { %v1486_v5 = vsel %vm1478_vm13, %v1469_v28, %v1485_v25  ;;  %v1489_v22 = vsel %vm1479_vm8, %v1475_v50, 1326507024  ;;  %v1492_v8 = vshll.u32 %v1452_v1, 8  ;;  %v3990_v15 = vadd.s32 1, %v2571_v2 }
 0x28d   :  { %v2071_v33 = vand.u32 2139095040, %v3982_v59  ;;  %v1487_v17 = vsel %vm1477_vm9, %v1484_v62, %v1486_v5  ;;  %v1490_v63 = vsel %vm1478_vm13, %v1472_v3, %v1489_v22  ;;  %v1967_v39 = vand.u32 2139095040, %v3980_v52 }
 0x28e   :  { %v1491_v48 = vsel %vm1477_vm9, %v1488_v10, %v1490_v63  ;;  %v3996_v30 = vmul.u32.u64.low %v1492_v8, %v1487_v17  ;;  %v3997_v58 = vmul.u32.u64.high %v1492_v8, %v1487_v17, %v3996_v30  ;;  %v1483_v57 = vsel %vm1477_vm9, %v1480_v26, %v1482_v27 }
 0x28f   :  { %v4001_v54 = vmul.u32.u64.low %v1492_v8, %v1491_v48  ;;  %v4002_v20 = vmul.u32.u64.high %v1492_v8, %v1491_v48, %v4001_v54  ;;  %v1659_v1 = vand.u32 8388607, %v1652_v11  ;;  %v1669_v34 = vshll.u32 %v2852_v43, %v3964_v46 }
 0x290   :  { %v1670_v9 = vshrl.u32 %v2850_v32, %v1667_v31  ;;  %v1672_v28 = vshll.u32 %v2850_v32, %v3964_v46  ;;  %v1673_v38 = vshrl.u32 %v2851_v36, %v1667_v31  ;;  %v2072_v51 = vshrl.u32 %v2071_v33, 23 }
 0x291   :  { %v1675_v7 = vshll.u32 %v2851_v36, %v3964_v46  ;;  %v1676_v61 = vshrl.u32 %v2849_v29, %v1667_v31  ;;  %v1678_v2 = vshll.u32 %v2849_v29, %v3964_v46  ;;  %v1502_v3 = vadd.s32 1, %v3997_v58 }
 0x292   :  { %v1671_v50 = vor.u32 %v1670_v9, %v1669_v34  ;;  %v1674_v4 = vor.u32 %v1673_v38, %v1672_v28  ;;  %v1679_v60 = vshrl.u32 %v2848_v21, %v1667_v31  ;;  %v1499_v62 = vmul.u32 %v1492_v8, %v1483_v57 }
 0x293   :  { %vm1501_vm1 = vc.u32 %v4002_v20, %v3996_v30  ;;  %v1660_v26 = vor.u32 8388608, %v1659_v1  ;;  %v1677_v25 = vor.u32 %v1676_v61, %v1675_v7  ;;  %v1681_v5 = vshll.u32 %v2848_v21, %v3964_v46 }
 0x294   :  { %v1503_v10 = vsel %vm1501_vm1, %v1502_v3, %v3997_v58  ;;  %v1680_v27 = vor.u32 %v1679_v60, %v1678_v2  ;;  %v1682_v22 = vshrl.u32 %v2853_v53, %v1667_v31  ;;  %v1668_v17 = vshrl.u32 %v2852_v43, %v1667_v31 }
 0x295   :  { %v1504_v33 = vadd.s32 %v1503_v10, %v1499_v62  ;;  %vm1684_vm3 = vcmp.lt.s32.totalorder %v3976_v41, 1  ;;  %vm1687_vm4 = vcmp.lt.s32.totalorder %v3976_v41, 4  ;;  %vm1685_vm5 = vcmp.lt.s32.totalorder %v3976_v41, 2 }
 0x296   :  { %v1683_v8 = vor.u32 %v1682_v22, %v1681_v5  ;;  %v1689_v63 = vsel %vm1687_vm4, %v1677_v25, 2102212464  ;;  %v1692_v48 = vsel %vm1684_vm3, %v1671_v50, %v1674_v4  ;;  %vm1686_vm8 = vcmp.lt.s32.totalorder %v3976_v41, 3 }
 0x297   :  { %v1505_v57 = vadd.s32 536870912, %v1504_v33  ;;  %v1693_v58 = vsel %vm1687_vm4, %v1680_v27, 920167782  ;;  %v1696_v54 = vsel %vm1684_vm3, %v1674_v4, %v1677_v25  ;;  %v1688_v46 = vsel %vm1684_vm3, %v1668_v17, %v1671_v50 }
 0x298   :  { %v1694_v1 = vsel %vm1686_vm8, %v1677_v25, %v1693_v58  ;;  %v1697_v34 = vsel %vm1687_vm4, %v1683_v8, 1326507024  ;;  %v1700_v9 = vshll.u32 %v1660_v26, 8  ;;  %v1690_v31 = vsel %vm1686_vm8, %v1674_v4, %v1689_v63 }
 0x299   :  { %v1506_v28 = vshrl.u32 %v1505_v57, 30  ;;  %v1695_v38 = vsel %vm1685_vm5, %v1692_v48, %v1694_v1  ;;  %v1698_v7 = vsel %vm1686_vm8, %v1680_v27, %v1697_v34  ;;  %vm1871_vm9 = vcmp.gt.s32.totalorder %v3990_v15, 0 }
 0x29a   :  { %vm1446_vm13 = vcmp.lt.s32.totalorder %v3930_v0, 0  ;;  %v1699_v61 = vsel %vm1685_vm5, %v1696_v54, %v1698_v7  ;;  %v4036_v2 = vmul.u32.u64.low %v1700_v9, %v1695_v38  ;;  %v4037_v3 = vmul.u32.u64.high %v1700_v9, %v1695_v38, %v4036_v2 }
 0x29b   :  { %v1507_v50 = vshll.u32 %v1506_v28, 30  ;;  %v4041_v60 = vmul.u32.u64.low %v1700_v9, %v1699_v61  ;;  %v4042_v4 = vmul.u32.u64.high %v1700_v9, %v1699_v61, %v4041_v60  ;;  %v4045_v62 = vshrl.u32 %v3954_v55, 5 }
 0x29c   :  { %vm1767_vm1 = vcmp.gt.s32.totalorder %v3978_v40, 0  ;;  %v1335_v26 = vmax.f32 %v3936_v56, 0.0  ;;  %v1691_v25 = vsel %vm1685_vm5, %v1688_v46, %v1690_v31  ;;  %v1872_v10 = vsel %vm1871_vm9, %v3990_v15, 0 }
 0x29d   :  { %v1968_v27 = vshrl.u32 %v1967_v39, 23  ;;  %v2579_v5 = vadd.s32 4294967169, %v2072_v51  ;;  %v4052_v22 = vsub.s32 %v1504_v33, %v1507_v50  ;;  %v4055_v17 = vsub.s32 32, %v3971_v42 }
 0x29e   :  { %v4058_v8 = vshrl.u32 %v3957_v44, 5  ;;  %v4061_v55 = vsub.s32 32, %v3974_v49  ;;  %vm4065_vm3 = vcmp.le.f32.partialorder %v1444_v47, 0.7853982  ;;  %v1710_v15 = vadd.s32 1, %v4037_v3 }
 0x29f   :  { %v1510_v39 = vsub.s32 0, %v4052_v22  ;;  %v1530_v51 = vsub.s32 4, %v1506_v28  ;;  %v1707_v33 = vmul.u32 %v1700_v9, %v1691_v25  ;;  %vm1709_vm4 = vc.u32 %v4042_v4, %v4036_v2 }
 0x2a0   :  { %v4076_v44 = vsel %vm1767_vm1, %v3978_v40, 0  ;;  %v4078_v63 = vshrl.u32 %v1872_v10, 5  ;;  %v4080_v47 = vand.u32 31, %v1872_v10  ;;  %v1711_v48 = vsel %vm1709_vm4, %v1710_v15, %v4037_v3  ;;  %v4106_v10 = vpop.eup %2764 }
 0x2a1   :  { %v4083_v57 = vadd.s32 4294967169, %v1968_v27  ;;  %v4085_v58 = vadd.s32 1, %v2579_v5  ;;  %v2556_v54 = vmin.u32 %v1510_v39, %v4052_v22  ;;  %v1712_v46 = vadd.s32 %v1711_v48, %v1707_v33 }
 0x2a2   :  { %v1358_v1 = vshrl.u32 %v2850_v32, %v4055_v17  ;;  %v1361_v40 = vshrl.u32 %v2851_v36, %v4055_v17  ;;  %v1366_v34 = vshll.u32 %v2849_v29, %v3971_v42  ;;  %v1367_v9 = vshrl.u32 %v2848_v21, %v4055_v17 }
 0x2a3   :  { %v1512_v31 = vclz %v2556_v54  ;;  %v1531_v38 = vsel %vm1446_vm13, %v1530_v51, %v1506_v28  ;;  %v1357_v7 = vshll.u32 %v2852_v43, %v3971_v42  ;;  %v1364_v61 = vshrl.u32 %v2849_v29, %v4055_v17 }
 0x2a4   :  { %v1713_v3 = vadd.s32 536870912, %v1712_v46  ;;  %v1360_v50 = vshll.u32 %v2850_v32, %v3971_v42  ;;  %v1368_v60 = vor.u32 %v1367_v9, %v1366_v34  ;;  %v1370_v25 = vshrl.u32 %v2853_v53, %v4055_v17 }
 0x2a5   :  { %v1500_v27 = vadd.s32 %v3996_v30, %v4002_v20  ;;  %v2557_v28 = vadd.s32 4294967294, %v1512_v31  ;;  %v1347_v5 = vand.u32 8388607, %v1340_v12  ;;  %v1363_v15 = vshll.u32 %v2851_v36, %v3971_v42 }
 0x2a6   :  { %v4114_v39 = vshrl.u32 %v1713_v3, 30  ;;  %v1359_v51 = vor.u32 %v1358_v1, %v1357_v7  ;;  %v1362_v33 = vor.u32 %v1361_v40, %v1360_v50  ;;  %v1369_v48 = vshll.u32 %v2848_v21, %v3971_v42 }
 0x2a7   :  { %vm2558_vm5 = vcmp.lt.s32.totalorder %v2557_v28, 0  ;;  %v1533_v54 = vsel %vm4065_vm3, 0, %v1531_v38  ;;  %v1365_v34 = vor.u32 %v1364_v61, %v1363_v15  ;;  %vm1375_vm8 = vcmp.lt.s32.totalorder %v4045_v62, 4 }
 0x2a8   :  { %v1515_v30 = vsel %vm2558_vm5, 0, %v2557_v28  ;;  %v1715_v20 = vshll.u32 %v4114_v39, 30  ;;  %v1371_v9 = vor.u32 %v1370_v25, %v1369_v48  ;;  %v1381_v31 = vsel %vm1375_vm8, %v1368_v60, 920167782 }
 0x2a9   :  { %v1516_v3 = vsub.s32 32, %v1515_v30  ;;  %v1520_v1 = vsub.s32 4294967266, %v1515_v30  ;;  %v1348_v40 = vor.u32 8388608, %v1347_v5  ;;  %vm1372_vm9 = vcmp.lt.s32.totalorder %v4045_v62, 1 }
 0x2aa   :  { %v1517_v42 = vshll.u32 %v4052_v22, %v1515_v30  ;;  %v4126_v7 = vsub.s32 %v1712_v46, %v1715_v20  ;;  %vm1374_vm1 = vcmp.lt.s32.totalorder %v4045_v62, 3  ;;  %v1380_v38 = vsel %vm1372_vm9, %v1359_v51, %v1362_v33 }
 0x2ab   :  { %v1518_v61 = vshrl.u32 %v1500_v27, %v1516_v3  ;;  %v1521_v50 = vadd.s32 127, %v1520_v1  ;;  %v1382_v25 = vsel %vm1374_vm1, %v1365_v34, %v1381_v31  ;;  %v1384_v28 = vsel %vm1372_vm9, %v1362_v33, %v1365_v34 }
 0x2ac   :  { %v1718_v5 = vsub.s32 0, %v4126_v7  ;;  %vm1373_vm4 = vcmp.lt.s32.totalorder %v4045_v62, 2  ;;  %v1377_v22 = vsel %vm1375_vm8, %v1365_v34, 2102212464  ;;  %v1385_v46 = vsel %vm1375_vm8, %v1371_v9, 1326507024 }
 0x2ad   :  { %v1519_v15 = vor.u32 %v1518_v61, %v1517_v42  ;;  %v1522_v48 = vshll.u32 %v1521_v50, 23  ;;  %v1386_v27 = vsel %vm1374_vm1, %v1368_v60, %v1385_v46  ;;  %v1388_v30 = vshll.u32 %v1348_v40, 8 }
 0x2ae   :  { %v2564_v20 = vmin.u32 %v1718_v5, %v4126_v7  ;;  %v1356_v31 = vshrl.u32 %v2852_v43, %v4055_v17  ;;  %v1383_v3 = vsel %vm1373_vm4, %v1380_v38, %v1382_v25  ;;  %v1387_v34 = vsel %vm1373_vm4, %v1384_v28, %v1386_v27 }
 0x2af   :  { %vm2079_vm5 = vcmp.gt.s32.totalorder %v4085_v58, 0  ;;  %v1523_v9 = vor.u32 4788187, %v1522_v48  ;;  %v4151_v1 = vmul.u32.u64.low %v1388_v30, %v1387_v34  ;;  %v4152_v42 = vmul.u32.u64.high %v1388_v30, %v1387_v34, %v4151_v1 }
 0x2b0   :  { %v1537_v61 = vadd.s32 3, %v1533_v54  ;;  %v1720_v60 = vclz %v2564_v20  ;;  %v1376_v40 = vsel %vm1372_vm9, %v1356_v31, %v1359_v51  ;;  %v1378_v17 = vsel %vm1374_vm1, %v1362_v33, %v1377_v22 }
 0x2b1   :  { %v1524_v50 = vand.u32 2147483647, %v1523_v9  ;;  %v1526_v5 = vcvt.s32.f32 %v1519_v15  ;;  %v4158_v38 = vmul.u32.u64.low %v1388_v30, %v1383_v3  ;;  %v4159_v25 = vmul.u32.u64.high %v1388_v30, %v1383_v3, %v4158_v38 }
 0x2b2   :  { %v4163_v28 = vsub.s32 32, %v4080_v47  ;;  %v4166_v46 = vadd.s32 1, %v4083_v57  ;;  %v2565_v54 = vadd.s32 4294967294, %v1720_v60  ;;  %v1738_v48 = vsub.s32 4, %v4114_v39 }
 0x2b3   :  { %v4170_v51 = vsel %vm2079_vm5, %v4085_v58, 0  ;;  %v1527_v27 = vmul.f32 %v1526_v5, %v1524_v50  ;;  %vm4174_vm8 = vcmp.le.f32.partialorder %v1652_v11, 0.7853982  ;;  %v1379_v22 = vsel %vm1373_vm4, %v1376_v40, %v1378_v17 }
 0x2b4   :  { %vm1654_vm9 = vcmp.lt.s32.totalorder %v3936_v56, 0  ;;  %v1708_v57 = vadd.s32 %v4036_v2, %v4042_v4  ;;  %vm2566_vm1 = vcmp.lt.s32.totalorder %v2565_v54, 0  ;;  %vm1397_vm5 = vc.u32 %v4152_v42, %v4158_v38 }
 0x2b5   :  { %v1528_v58 = vxor.u32 2147483648, %v1527_v27  ;;  %v4185_v15 = vand.u32 3, %v1537_v61  ;;  %v1723_v20 = vsel %vm2566_vm1, 0, %v2565_v54  ;;  %v1398_v11 = vadd.s32 1, %v4159_v25 }
 0x2b6   :  { %v1724_v31 = vsub.s32 32, %v1723_v20  ;;  %v1728_v3 = vsub.s32 4294967266, %v1723_v20  ;;  %v1739_v62 = vsel %vm1654_vm9, %v1738_v48, %v4114_v39  ;;  %v1395_v34 = vmul.u32 %v1388_v30, %v1379_v22 }
 0x2b7   :  { %v1529_v2 = vsel %vm1446_vm13, %v1528_v58, %v1527_v27  ;;  %v1725_v4 = vshll.u32 %v4126_v7, %v1723_v20  ;;  %v1399_v9 = vsel %vm1397_vm5, %v1398_v11, %v4159_v25  ;;  %v1548_v1 = vand.u32 2147483647, %v3934_v14 }
 0x2b8   :  { %v1532_v61 = vsel %vm4065_vm3, %v3930_v0, %v1529_v2  ;;  %v1726_v60 = vshrl.u32 %v1708_v57, %v1724_v31  ;;  %v1729_v40 = vadd.s32 127, %v1728_v3  ;;  %v1400_v17 = vadd.s32 %v1399_v9, %v1395_v34 }
 0x2b9   :  { %2766 = vcosq.f32 %v1532_v61  ;;  %v1741_v39 = vsel %vm4174_vm8, 0, %v1739_v62  ;;  %v1566_v30 = vshrl.u32 %v2850_v32, %v4061_v55  ;;  %v1569_v7 = vshrl.u32 %v2851_v36, %v4061_v55 }
 0x2ba   :  { %2768 = vsinq.f32 %v1532_v61  ;;  %v1727_v50 = vor.u32 %v1726_v60, %v1725_v4  ;;  %v1730_v5 = vshll.u32 %v1729_v40, 23  ;;  %v1401_v25 = vadd.s32 536870912, %v1400_v17 }
 0x2bb   :  { %v1572_v41 = vshrl.u32 %v2849_v29, %v4061_v55  ;;  %v1574_v54 = vshll.u32 %v2849_v29, %v3974_v49  ;;  %v1575_v48 = vshrl.u32 %v2848_v21, %v4061_v55  ;;  %v1578_v27 = vshrl.u32 %v2853_v53, %v4061_v55 }
 0x2bc   :  { %v1731_v22 = vor.u32 4788187, %v1730_v5  ;;  %v4213_v57 = vshrl.u32 %v1401_v25, 30  ;;  %v1555_v58 = vand.u32 8388607, %v1548_v1  ;;  %v1565_v20 = vshll.u32 %v2852_v43, %v3974_v49 }
 0x2bd   :  { %v1568_v11 = vshll.u32 %v2850_v32, %v3974_v49  ;;  %v1571_v31 = vshll.u32 %v2851_v36, %v3974_v49  ;;  %v1576_v3 = vor.u32 %v1575_v48, %v1574_v54  ;;  %v1577_v62 = vshll.u32 %v2848_v21, %v3974_v49 }
 0x2be   :  { %vm1540_vm13 = vcmp.eq.s32.totalorder %v4185_v15, 0  ;;  %vm1543_vm3 = vcmp.eq.s32.totalorder %v4185_v15, 2  ;;  %v1732_v34 = vand.u32 2147483647, %v1731_v22  ;;  %v1734_v2 = vcvt.s32.f32 %v1727_v50 }
 0x2bf   :  { %v1403_v4 = vshll.u32 %v4213_v57, 30  ;;  %vm1539_vm4 = vcmp.lt.s32.totalorder %v4185_v15, 2  ;;  %v1567_v9 = vor.u32 %v1566_v30, %v1565_v20  ;;  %v1570_v61 = vor.u32 %v1569_v7, %v1568_v11 }
 0x2c0   :  { %v1573_v60 = vor.u32 %v1572_v41, %v1571_v31  ;;  %v1579_v40 = vor.u32 %v1578_v27, %v1577_v62  ;;  %vm1536_vm1 = vweird.f32 %v3930_v0  ;;  %v1735_v5 = vmul.f32 %v1734_v2, %v1732_v34 }
 0x2c1   :  { %v1745_v25 = vadd.s32 3, %v1741_v39  ;;  %v4230_v54 = vsub.s32 %v1400_v17, %v1403_v4  ;;  %vm1583_vm5 = vcmp.lt.s32.totalorder %v4058_v8, 4  ;;  %v1556_v49 = vor.u32 8388608, %v1555_v58 }
 0x2c2   :  { %v1564_v50 = vshrl.u32 %v2852_v43, %v4061_v55  ;;  %vm1580_vm11 = vcmp.lt.s32.totalorder %v4058_v8, 1  ;;  %v1589_v48 = vsel %vm1583_vm5, %v1576_v3, 920167782  ;;  %v1736_v22 = vxor.u32 2147483648, %v1735_v5 }
 0x2c3   :  { %v1406_v30 = vsub.s32 0, %v4230_v54  ;;  %vm1581_vm2 = vcmp.lt.s32.totalorder %v4058_v8, 2  ;;  %vm1582_vm7 = vcmp.lt.s32.totalorder %v4058_v8, 3  ;;  %v2767_v7 = vpop.eup %2766  ;;  %v1426_v17 = vsub.s32 4, %v4213_v57 }
 0x2c4   :  { %v1585_v39 = vsel %vm1583_vm5, %v1573_v60, 2102212464  ;;  %v1588_v41 = vsel %vm1580_vm11, %v1567_v9, %v1570_v61  ;;  %v1593_v27 = vsel %vm1583_vm5, %v1579_v40, 1326507024  ;;  %v2769_v58 = vpop.eup %2768  ;;  %v1544_v55 = vxor.u32 2147483648, %v2767_v7 }
 0x2c5   :  { %v1737_v20 = vsel %vm1654_vm9, %v1736_v22, %v1735_v5  ;;  %v2552_v11 = vmin.u32 %v1406_v30, %v4230_v54  ;;  %v1590_v31 = vsel %vm1582_vm7, %v1573_v60, %v1589_v48  ;;  %v1541_v62 = vxor.u32 2147483648, %v2769_v58 }
 0x2c6   :  { %v1740_v34 = vsel %vm4174_vm8, %v3936_v56, %v1737_v20  ;;  %v1592_v2 = vsel %vm1580_vm11, %v1570_v61, %v1573_v60  ;;  %v1594_v4 = vsel %vm1582_vm7, %v1576_v3, %v1593_v27  ;;  %v1545_v40 = vsel %vm1543_vm3, %v1544_v55, %v2769_v58 }
 0x2c7   :  { %2770 = vcosq.f32 %v1740_v34  ;;  %v1408_v5 = vclz %v2552_v11  ;;  %v1584_v22 = vsel %vm1580_vm11, %v1564_v50, %v1567_v9  ;;  %v1542_v48 = vsel %vm1540_vm13, %v2767_v7, %v1541_v62 }
 0x2c8   :  { %2772 = vsinq.f32 %v1740_v34  ;;  %v1591_v33 = vsel %vm1581_vm2, %v1588_v41, %v1590_v31  ;;  %v1596_v30 = vshll.u32 %v1556_v49, 8  ;;  %v1546_v60 = vsel %vm1539_vm4, %v1542_v48, %v1545_v40 }
 0x2c9   :  { %v2553_v3 = vadd.s32 4294967294, %v1408_v5  ;;  %v1586_v27 = vsel %vm1582_vm7, %v1570_v61, %v1585_v39  ;;  %v1595_v58 = vsel %vm1581_vm2, %v1592_v2, %v1594_v4  ;;  %v1547_v9 = vsel %vm1536_vm1, nan, %v1546_v60 }
 0x2ca   :  { %v1746_v50 = vand.u32 3, %v1745_v25  ;;  %v4270_v7 = vmul.u32.u64.low %v1596_v30, %v1595_v58  ;;  %v4271_v55 = vmul.u32.u64.high %v1596_v30, %v1595_v58, %v4270_v7  ;;  %vm1342_vm11 = vcmp.lt.s32.totalorder %v3928_v37, 0 }
 0x2cb   :  { %vm2554_vm8 = vcmp.lt.s32.totalorder %v2553_v3, 0  ;;  %v4274_v49 = vmul.u32.u64.low %v1596_v30, %v1591_v33  ;;  %v4275_v15 = vmul.u32.u64.high %v1596_v30, %v1591_v33, %v4274_v49  ;;  %v1396_v61 = vadd.s32 %v4158_v38, %v4152_v42 }
 0x2cc   :  { %v1411_v39 = vsel %vm2554_vm8, 0, %v2553_v3  ;;  %v1427_v41 = vsel %vm1342_vm11, %v1426_v17, %v4213_v57  ;;  %v1587_v25 = vsel %vm1581_vm2, %v1584_v22, %v1586_v27  ;;  %v2173_v20 = vsel %vm338_vm10, %v1547_v9, %v1333_v6 }
 0x2cd   :  { %v1412_v11 = vsub.s32 32, %v1411_v39  ;;  %v1416_v31 = vsub.s32 4294967266, %v1411_v39  ;;  %v1860_v62 = vand.u32 2147483647, %v3943_v45  ;;  %vm1744_vm7 = vweird.f32 %v3936_v56 }
 0x2ce   :  { %vm1747_vm9 = vcmp.lt.s32.totalorder %v1746_v50, 2  ;;  %vm1748_vm13 = vcmp.eq.s32.totalorder %v1746_v50, 0  ;;  %vm4293_vm3 = vcmp.le.f32.partialorder %v1340_v12, 0.7853982  ;;  %vm1605_vm2 = vc.u32 %v4271_v55, %v4274_v49 }
 0x2cf   :  { %v1413_v0 = vshll.u32 %v4230_v54, %v1411_v39  ;;  %v1414_v6 = vshrl.u32 %v1396_v61, %v1412_v11  ;;  %v1417_v8 = vadd.s32 127, %v1416_v31  ;;  %v1606_v38 = vadd.s32 1, %v4275_v15 }
 0x2d0   :  { %vm1751_vm4 = vcmp.eq.s32.totalorder %v1746_v50, 2  ;;  %v2189_v57 = vsel %vm1182_vm15, %v3988_v18, %v2173_v20  ;;  %v1429_v12 = vsel %vm4293_vm3, 0, %v1427_v41  ;;  %v1603_v17 = vmul.u32 %v1596_v30, %v1587_v25 }
 0x2d1   :  { %v2771_v34 = vpop.eup %2770  ;;  %v1415_v2 = vor.u32 %v1414_v6, %v1413_v0  ;;  %v1418_v4 = vshll.u32 %v1417_v8, 23  ;;  %v1607_v40 = vsel %vm1605_vm2, %v1606_v38, %v4275_v15  ;;  %v1867_v54 = vand.u32 8388607, %v1860_v62 }
 0x2d2   :  { %v2773_v5 = vpop.eup %2772  ;;  %v1752_v22 = vxor.u32 2147483648, %v2771_v34  ;;  %v1608_v48 = vadd.s32 %v1607_v40, %v1603_v17  ;;  %v1877_v33 = vshll.u32 %v2852_v43, %v4080_v47  ;;  %v1878_v18 = vshrl.u32 %v2850_v32, %v4163_v28 }
 0x2d3   :  { %v1749_v60 = vxor.u32 2147483648, %v2773_v5  ;;  %v1419_v3 = vor.u32 4788187, %v1418_v4  ;;  %v1880_v30 = vshll.u32 %v2850_v32, %v4080_v47  ;;  %v1881_v27 = vshrl.u32 %v2851_v36, %v4163_v28 }
 0x2d4   :  { %v1753_v58 = vsel %vm1751_vm4, %v1752_v22, %v2773_v5  ;;  %v1422_v9 = vcvt.s32.f32 %v1415_v2  ;;  %v1609_v7 = vadd.s32 536870912, %v1608_v48  ;;  %v1884_v15 = vshrl.u32 %v2849_v29, %v4163_v28 }
 0x2d5   :  { %v1750_v61 = vsel %vm1748_vm13, %v2771_v34, %v1749_v60  ;;  %v1420_v39 = vand.u32 2147483647, %v1419_v3  ;;  %v1887_v41 = vshrl.u32 %v2848_v21, %v4163_v28  ;;  %v1890_v25 = vshrl.u32 %v2853_v53, %v4163_v28 }
 0x2d6   :  { %v1754_v20 = vsel %vm1747_vm9, %v1750_v61, %v1753_v58  ;;  %v1610_v11 = vshrl.u32 %v1609_v7, 30  ;;  %v1879_v31 = vor.u32 %v1878_v18, %v1877_v33  ;;  %v1883_v0 = vshll.u32 %v2851_v36, %v4080_v47 }
 0x2d7   :  { %v1755_v6 = vsel %vm1744_vm7, nan, %v1754_v20  ;;  %v1423_v8 = vmul.f32 %v1422_v9, %v1420_v39  ;;  %v1886_v38 = vshll.u32 %v2849_v29, %v4080_v47  ;;  %v1889_v17 = vshll.u32 %v2848_v21, %v4080_v47 }
 0x2d8   :  { %v2175_v50 = vsel %vm339_vm14, %v1755_v6, %v1335_v26  ;;  %v1611_v34 = vshll.u32 %v1610_v11, 30  ;;  %v1882_v2 = vor.u32 %v1881_v27, %v1880_v30  ;;  %v1885_v4 = vor.u32 %v1884_v15, %v1883_v0 }
 0x2d9   :  { %vm1975_vm1 = vcmp.gt.s32.totalorder %v4166_v46, 0  ;;  %v2191_v40 = vsel %vm1183_vm0, %v4106_v10, %v2175_v50  ;;  %v1424_v5 = vxor.u32 2147483648, %v1423_v8  ;;  %v1888_v22 = vor.u32 %v1887_v41, %v1886_v38 }
 0x2da   :  { %v1891_v33 = vor.u32 %v1890_v25, %v1889_v17  ;;  %v4343_v18 = vand.u32 31, %v4170_v51  ;;  %v2601_v47 = vpack.c.bf16 %v2191_v40, %v2189_v57  ;;  %v1433_v56 = vadd.s32 3, %v1429_v12 }
 0x2db   :  { %v4345_v60 = vsub.s32 %v1608_v48, %v1611_v34  ;;  %v1425_v26 = vsel %vm1342_vm11, %v1424_v5, %v1423_v8  ;;  %v1868_v3 = vor.u32 8388608, %v1867_v54  ;;  %v1876_v30 = vshrl.u32 %v2852_v43, %v4163_v28 }
 0x2dc   :  { %vm1892_vm5 = vcmp.lt.s32.totalorder %v4078_v63, 1  ;;  %2602 = vmatprep.subr.bf16.mxu1 %v2601_v47  ;;  %vm1894_vm8 = vcmp.lt.s32.totalorder %v4078_v63, 3  ;;  %vm1895_vm7 = vcmp.lt.s32.totalorder %v4078_v63, 4  ;;  %v1428_v12 = vsel %vm4293_vm3, %v3928_v37, %v1425_v26 }
 0x2dd   :  { %v1614_v10 = vsub.s32 0, %v4345_v60  ;;  %v1900_v57 = vsel %vm1892_vm5, %v1879_v31, %v1882_v2  ;;  %v1897_v54 = vsel %vm1895_vm7, %v1885_v4, 2102212464  ;;  %v1901_v48 = vsel %vm1895_vm7, %v1888_v22, 920167782 }
 0x2de   :  { %v1905_v27 = vsel %vm1895_vm7, %v1891_v33, 1326507024  ;;  %vm1893_vm11 = vcmp.lt.s32.totalorder %v4078_v63, 2  ;;  %v1902_v58 = vsel %vm1894_vm8, %v1885_v4, %v1901_v48  ;;  %v1904_v9 = vsel %vm1892_vm5, %v1882_v2, %v1885_v4 }
 0x2df   :  { %v2560_v28 = vmin.u32 %v1614_v10, %v4345_v60  ;;  %v1634_v7 = vsub.s32 4, %v1610_v11  ;;  %v1903_v15 = vsel %vm1893_vm11, %v1900_v57, %v1902_v58  ;;  %v1906_v42 = vsel %vm1894_vm8, %v1888_v22, %v1905_v27 }
 0x2e0   :  { %v1908_v61 = vshll.u32 %v1868_v3, 8  ;;  %2774 = vcosq.f32 %v1428_v12  ;;  %v1896_v41 = vsel %vm1892_vm5, %v1876_v30, %v1879_v31  ;;  %v1898_v25 = vsel %vm1894_vm8, %v1882_v2, %v1897_v54 }
 0x2e1   :  { %v1616_v39 = vclz %v2560_v28  ;;  %vm1550_vm9 = vcmp.lt.s32.totalorder %v3934_v14, 0  ;;  %v1907_v20 = vsel %vm1893_vm11, %v1904_v9, %v1906_v42  ;;  %2776 = vsinq.f32 %v1428_v12 }
 0x2e2   :  { %v4377_v0 = vmul.u32.u64.low %v1908_v61, %v1903_v15  ;;  %v4378_v6 = vmul.u32.u64.high %v1908_v61, %v1903_v15, %v4377_v0  ;;  %v4381_v38 = vmul.u32.u64.low %v1908_v61, %v1907_v20  ;;  %v4382_v17 = vmul.u32.u64.high %v1908_v61, %v1907_v20, %v4381_v38 }
 0x2e3   :  { %v2561_v8 = vadd.s32 4294967294, %v1616_v39  ;;  %v4385_v50 = vand.u32 31, %v4076_v44  ;;  %v2083_v31 = vsub.s32 32, %v4343_v18  ;;  %v1635_v34 = vsel %vm1550_vm9, %v1634_v7, %v1610_v11 }
 0x2e4   :  { %v1899_v2 = vsel %vm1893_vm11, %v1896_v41, %v1898_v25  ;;  %v4395_v4 = vsel %vm1975_vm1, %v4166_v46, 0  ;;  %v4398_v40 = vshrl.u32 %v4170_v51, 5  ;;  %v4400_v5 = vand.u32 3, %v1433_v56 }
 0x2e5   :  { %vm2562_vm13 = vcmp.lt.s32.totalorder %v2561_v8, 0  ;;  %vm4404_vm3 = vcmp.le.f32.partialorder %v1548_v1, 0.7853982  ;;  %v1604_v63 = vadd.s32 %v4274_v49, %v4271_v55  ;;  %v1918_v33 = vadd.s32 1, %v4378_v6 }
 0x2e6   :  { %v1619_v11 = vsel %vm2562_vm13, 0, %v2561_v8  ;;  %v1637_v51 = vsel %vm4404_vm3, 0, %v1635_v34  ;;  %v1915_v56 = vmul.u32 %v1908_v61, %v1899_v2  ;;  %vm1917_vm2 = vc.u32 %v4382_v17, %v4377_v0 }
 0x2e7   :  { %v1620_v46 = vsub.s32 32, %v1619_v11  ;;  %v1624_v47 = vsub.s32 4294967266, %v1619_v11  ;;  %v2068_v1 = vand.u32 2147483647, %v3982_v59  ;;  %v2086_v26 = vshrl.u32 %v2850_v32, %v2083_v31 }
 0x2e8   :  { %v2089_v3 = vshrl.u32 %v2851_v36, %v2083_v31  ;;  %vm1439_vm4 = vcmp.eq.s32.totalorder %v4400_v5, 2  ;;  %v1621_v55 = vshll.u32 %v4345_v60, %v1619_v11  ;;  %v1919_v10 = vsel %vm1917_vm2, %v1918_v33, %v4378_v6 }
 0x2e9   :  { %v1622_v49 = vshrl.u32 %v1604_v63, %v1620_v46  ;;  %v1625_v30 = vadd.s32 127, %v1624_v47  ;;  %v4421_v57 = vadd.s32 3, %v1637_v51  ;;  %v1920_v12 = vadd.s32 %v1919_v10, %v1915_v56 }
 0x2ea   :  { %v2085_v54 = vshll.u32 %v2852_v43, %v4343_v18  ;;  %v2088_v48 = vshll.u32 %v2850_v32, %v4343_v18  ;;  %v2775_v27 = vpop.eup %2774  ;;  %vm1436_vm1 = vcmp.eq.s32.totalorder %v4400_v5, 0  ;;  %v2092_v60 = vshrl.u32 %v2849_v29, %v2083_v31 }
 0x2eb   :  { %v1623_v28 = vor.u32 %v1622_v49, %v1621_v55  ;;  %v1626_v58 = vshll.u32 %v1625_v30, 23  ;;  %v2095_v9 = vshrl.u32 %v2848_v21, %v2083_v31  ;;  %v1921_v7 = vadd.s32 536870912, %v1920_v12  ;;  %v2777_v39 = vpop.eup %2776 }
 0x2ec   :  { %v2075_v15 = vand.u32 8388607, %v2068_v1  ;;  %v2084_v42 = vshrl.u32 %v2852_v43, %v2083_v31  ;;  %v2094_v61 = vshll.u32 %v2849_v29, %v4343_v18  ;;  %v2087_v25 = vor.u32 %v2086_v26, %v2085_v54 }
 0x2ed   :  { %v1627_v41 = vor.u32 4788187, %v1626_v58  ;;  %v2090_v20 = vor.u32 %v2089_v3, %v2088_v48  ;;  %v2091_v6 = vshll.u32 %v2851_v36, %v4343_v18  ;;  %v1440_v8 = vxor.u32 2147483648, %v2775_v27 }
 0x2ee   :  { %v4437_v38 = vshrl.u32 %v1921_v7, 30  ;;  %v2096_v34 = vor.u32 %v2095_v9, %v2094_v61  ;;  %v2098_v2 = vshrl.u32 %v2853_v53, %v2083_v31  ;;  %vm1435_vm5 = vcmp.lt.s32.totalorder %v4400_v5, 2 }
 0x2ef   :  { %v1628_v63 = vand.u32 2147483647, %v1627_v41  ;;  %v1630_v11 = vcvt.s32.f32 %v1623_v28  ;;  %v2093_v33 = vor.u32 %v2092_v60, %v2091_v6  ;;  %v2097_v46 = vshll.u32 %v2848_v21, %v4343_v18 }
 0x2f0   :  { %v1437_v47 = vxor.u32 2147483648, %v2777_v39  ;;  %v1923_v51 = vshll.u32 %v4437_v38, 30  ;;  %v2076_v56 = vor.u32 8388608, %v2075_v15  ;;  %vm2100_vm8 = vcmp.lt.s32.totalorder %v4398_v40, 1 }
 0x2f1   :  { %v1631_v26 = vmul.f32 %v1630_v11, %v1628_v63  ;;  %v2099_v3 = vor.u32 %v2098_v2, %v2097_v46  ;;  %vm2103_vm7 = vcmp.lt.s32.totalorder %v4398_v40, 4  ;;  %v2108_v31 = vsel %vm2100_vm8, %v2087_v25, %v2090_v20 }
 0x2f2   :  { %v1441_v55 = vsel %vm1439_vm4, %v1440_v8, %v2777_v39  ;;  %v4450_v49 = vsub.s32 %v1920_v12, %v1923_v51  ;;  %vm2102_vm11 = vcmp.lt.s32.totalorder %v4398_v40, 3  ;;  %v2109_v18 = vsel %vm2103_vm7, %v2096_v34, 920167782 }
 0x2f3   :  { %v1632_v30 = vxor.u32 2147483648, %v1631_v26  ;;  %vm2101_vm13 = vcmp.lt.s32.totalorder %v4398_v40, 2  ;;  %v2105_v10 = vsel %vm2103_vm7, %v2093_v33, 2102212464  ;;  %v2110_v54 = vsel %vm2102_vm11, %v2093_v33, %v2109_v18 }
 0x2f4   :  { %v1438_v48 = vsel %vm1436_vm1, %v2775_v27, %v1437_v47  ;;  %v1926_v12 = vsub.s32 0, %v4450_v49  ;;  %v2104_v28 = vsel %vm2100_vm8, %v2084_v42, %v2087_v25  ;;  %v2111_v58 = vsel %vm2101_vm13, %v2108_v31, %v2110_v54 }
 0x2f5   :  { %v1633_v60 = vsel %vm1550_vm9, %v1632_v30, %v1631_v26  ;;  %v2112_v9 = vsel %vm2100_vm8, %v2090_v20, %v2093_v33  ;;  %v2113_v7 = vsel %vm2103_vm7, %v2099_v3, 1326507024  ;;  %v2116_v15 = vshll.u32 %v2076_v56, 8 }
 0x2f6   :  { %v1636_v27 = vsel %vm4404_vm3, %v3934_v14, %v1633_v60  ;;  %v2572_v61 = vmin.u32 %v1926_v12, %v4450_v49  ;;  %v2106_v42 = vsel %vm2102_vm11, %v2090_v20, %v2105_v10  ;;  %v2114_v39 = vsel %vm2102_vm11, %v2096_v34, %v2113_v7 }
 0x2f7   :  { %2778 = vcosq.f32 %v1636_v27  ;;  %v2115_v41 = vsel %vm2101_vm13, %v2112_v9, %v2114_v39  ;;  %v4483_v25 = vmul.u32.u64.low %v2116_v15, %v2111_v58  ;;  %v4484_v6 = vmul.u32.u64.high %v2116_v15, %v2111_v58, %v4483_v25 }
 0x2f8   :  { %v4488_v8 = vand.u32 31, %v4395_v4  ;;  %v1442_v22 = vsel %vm1435_vm5, %v1438_v48, %v1441_v55  ;;  %2780 = vsinq.f32 %v1636_v27  ;;  %v1928_v2 = vclz %v2572_v61 }
 0x2f9   :  { %2782 = vtanh.f32 %v3934_v14  ;;  %v1332_v20 = vmax.f32 %v3928_v37, 0.0  ;;  %v4494_v34 = vmul.u32.u64.low %v2116_v15, %v2115_v41  ;;  %v4495_v63 = vmul.u32.u64.high %v2116_v15, %v2115_v41, %v4494_v34 }
 0x2fa   :  { %v1334_v11 = vmax.f32 %v3934_v14, 0.0  ;;  %vm1432_vm9 = vweird.f32 %v3928_v37  ;;  %v2573_v33 = vadd.s32 4294967294, %v1928_v2  ;;  %v2107_v46 = vsel %vm2101_vm13, %v2104_v28, %v2106_v42 }
 0x2fb   :  { %v4502_v5 = vshrl.u32 %v4076_v44, 5  ;;  %v1443_v47 = vsel %vm1432_vm9, nan, %v1442_v22  ;;  %v1642_v51 = vand.u32 3, %v4421_v57  ;;  %v2126_v56 = vadd.s32 1, %v4484_v6 }
 0x2fc   :  { %v4507_v26 = vsub.s32 32, %v4385_v50  ;;  %v4510_v3 = vshrl.u32 %v4395_v4, 5  ;;  %v4513_v37 = vsub.s32 32, %v4488_v8  ;;  %vm2574_vm3 = vcmp.lt.s32.totalorder %v2573_v33, 0 }
 0x2fd   :  { %v1916_v40 = vadd.s32 %v4377_v0, %v4382_v17  ;;  %v1931_v44 = vsel %vm2574_vm3, 0, %v2573_v33  ;;  %v2123_v31 = vmul.u32 %v2116_v15, %v2107_v46  ;;  %vm2125_vm2 = vc.u32 %v4495_v63, %v4483_v25 }
 0x2fe   :  { %v2172_v57 = vsel %vm338_vm10, %v1443_v47, %v1332_v20  ;;  %v1932_v55 = vsub.s32 32, %v1931_v44  ;;  %v1936_v18 = vsub.s32 4294967266, %v1931_v44  ;;  %v2127_v4 = vsel %vm2125_vm2, %v2126_v56, %v4484_v6 }
 0x2ff   :  { %vm1640_vm4 = vweird.f32 %v3934_v14  ;;  %vm1643_vm1 = vcmp.lt.s32.totalorder %v1642_v51, 2  ;;  %vm1644_vm5 = vcmp.eq.s32.totalorder %v1642_v51, 0  ;;  %v2128_v30 = vadd.s32 %v2127_v4, %v2123_v31 }
 0x300   :  { %vm1647_vm8 = vcmp.eq.s32.totalorder %v1642_v51, 2  ;;  %v1933_v0 = vshll.u32 %v4450_v49, %v1931_v44  ;;  %v1934_v17 = vshrl.u32 %v1916_v40, %v1932_v55  ;;  %v1937_v10 = vadd.s32 127, %v1936_v18 }
 0x301   :  { %v2779_v54 = vpop.eup %2778  ;;  %v2188_v48 = vsel %vm1182_vm15, %v3985_v13, %v2172_v57  ;;  %v1946_v12 = vsub.s32 4, %v4437_v38  ;;  %v2129_v28 = vadd.s32 536870912, %v2128_v30  ;;  %v1756_v58 = vand.u32 2147483647, %v3940_v35 }
 0x302   :  { %v2781_v60 = vpop.eup %2780  ;;  %v1648_v9 = vxor.u32 2147483648, %v2779_v54  ;;  %v1935_v7 = vor.u32 %v1934_v17, %v1933_v0  ;;  %v1938_v15 = vshll.u32 %v1937_v10, 23  ;;  %v1773_v27 = vshll.u32 %v2852_v43, %v4385_v50 }
 0x303   :  { %v2783_v49 = vpop.eup %2782  ;;  %v1645_v61 = vxor.u32 2147483648, %v2781_v60  ;;  %v4531_v42 = vshrl.u32 %v2129_v28, 30  ;;  %v1774_v39 = vshrl.u32 %v2850_v32, %v4507_v26  ;;  %v1776_v13 = vshll.u32 %v2850_v32, %v4385_v50 }
 0x304   :  { %v1649_v41 = vsel %vm1647_vm8, %v1648_v9, %v2781_v60  ;;  %v1939_v6 = vor.u32 4788187, %v1938_v15  ;;  %v1777_v22 = vshrl.u32 %v2851_v36, %v4507_v26  ;;  %v1783_v2 = vshrl.u32 %v2848_v21, %v4507_v26 }
 0x305   :  { %v1646_v20 = vsel %vm1644_vm5, %v2779_v54, %v1645_v61  ;;  %v2131_v34 = vshll.u32 %v4531_v42, 30  ;;  %v1780_v33 = vshrl.u32 %v2849_v29, %v4507_v26  ;;  %v1782_v46 = vshll.u32 %v2849_v29, %v4385_v50 }
 0x306   :  { %v1650_v47 = vsel %vm1643_vm1, %v1646_v20, %v1649_v41  ;;  %vm4551_vm10 = vcmp.le.f32.partialorder %v1860_v62, 0.7853982  ;;  %v1940_v40 = vand.u32 2147483647, %v1939_v6  ;;  %v1942_v44 = vcvt.s32.f32 %v1935_v7 }
 0x307   :  { %v1786_v31 = vshrl.u32 %v2853_v53, %v4507_v26  ;;  %v1651_v57 = vsel %vm1640_vm4, nan, %v1650_v47  ;;  %v4559_v55 = vsub.s32 %v2128_v30, %v2131_v34  ;;  %v1763_v51 = vand.u32 8388607, %v1756_v58 }
 0x308   :  { %v1779_v18 = vshll.u32 %v2851_v36, %v4385_v50  ;;  %v2174_v62 = vsel %vm339_vm14, %v1651_v57, %v1334_v11  ;;  %v1943_v4 = vmul.f32 %v1942_v44, %v1940_v40  ;;  %v1784_v0 = vor.u32 %v1783_v2, %v1782_v46 }
 0x309   :  { %v1785_v17 = vshll.u32 %v2848_v21, %v4385_v50  ;;  %v2190_v14 = vsel %vm1183_vm0, %v2783_v49, %v2174_v62  ;;  %v2134_v30 = vsub.s32 0, %v4559_v55  ;;  %v1778_v10 = vor.u32 %v1777_v22, %v1776_v13 }
 0x30a   :  { %v1781_v54 = vor.u32 %v1780_v33, %v1779_v18  ;;  %v2603_v28 = vpack.c.bf16 %v2190_v14, %v2188_v48  ;;  %v1944_v60 = vxor.u32 2147483648, %v1943_v4  ;;  %v1775_v9 = vor.u32 %v1774_v39, %v1773_v27 }
 0x30b   :  { %v1787_v7 = vor.u32 %v1786_v31, %v1785_v17  ;;  %vm1862_vm7 = vcmp.lt.s32.totalorder %v3943_v45, 0  ;;  %vm2070_vm14 = vcmp.lt.s32.totalorder %v3982_v59, 0  ;;  %v2580_v11 = vmin.u32 %v2134_v30, %v4559_v55 }
 0x30c   :  { %vm1791_vm11 = vcmp.lt.s32.totalorder %v4502_v5, 4  ;;  %2604 = vmatpush1.bf16.msra.mxu1 %v2603_v28  ;;  %v1947_v24 = vsel %vm1862_vm7, %v1946_v12, %v4437_v38  ;;  %v1764_v50 = vor.u32 8388608, %v1763_v51  ;;  %vm1788_vm0 = vcmp.lt.s32.totalorder %v4502_v5, 1 }
 0x30d   :  { %v1797_v48 = vsel %vm1791_vm11, %v1784_v0, 920167782  ;;  %v2136_v15 = vclz %v2580_v11  ;;  %v2154_v27 = vsub.s32 4, %v4531_v42  ;;  %vm1790_vm13 = vcmp.lt.s32.totalorder %v4502_v5, 3 }
 0x30e   :  { %v1800_v49 = vsel %vm1788_vm0, %v1778_v10, %v1781_v54  ;;  %v1945_v61 = vsel %vm1862_vm7, %v1944_v60, %v1943_v4  ;;  %v1796_v39 = vsel %vm1788_vm0, %v1775_v9, %v1778_v10  ;;  %v1798_v38 = vsel %vm1790_vm13, %v1781_v54, %v1797_v48 }
 0x30f   :  { %v1801_v12 = vsel %vm1791_vm11, %v1787_v7, 1326507024  ;;  %v1949_v13 = vsel %vm4551_vm10, 0, %v1947_v24  ;;  %v2581_v41 = vadd.s32 4294967294, %v2136_v15  ;;  %vm1789_vm9 = vcmp.lt.s32.totalorder %v4502_v5, 2 }
 0x310   :  { %v1802_v6 = vsel %vm1790_vm13, %v1784_v0, %v1801_v12  ;;  %v1772_v22 = vshrl.u32 %v2852_v43, %v4507_v26  ;;  %v1793_v2 = vsel %vm1791_vm11, %v1781_v54, 2102212464  ;;  %v1804_v34 = vshll.u32 %v1764_v50, 8 }
 0x311   :  { %v1803_v20 = vsel %vm1789_vm9, %v1800_v49, %v1802_v6  ;;  %v1948_v33 = vsel %vm4551_vm10, %v3943_v45, %v1945_v61  ;;  %v2124_v46 = vadd.s32 %v4483_v25, %v4495_v63  ;;  %vm2582_vm3 = vcmp.lt.s32.totalorder %v2581_v41, 0 }
 0x312   :  { %v1799_v47 = vsel %vm1789_vm9, %v1796_v39, %v1798_v38  ;;  %v2139_v40 = vsel %vm2582_vm3, 0, %v2581_v41  ;;  %v2155_v26 = vsel %vm2070_vm14, %v2154_v27, %v4531_v42  ;;  %v1792_v56 = vsel %vm1788_vm0, %v1772_v22, %v1775_v9 }
 0x313   :  { %v4611_v44 = vmul.u32.u64.low %v1804_v34, %v1803_v20  ;;  %v4612_v31 = vmul.u32.u64.high %v1804_v34, %v1803_v20, %v4611_v44  ;;  %v2140_v57 = vsub.s32 32, %v2139_v40  ;;  %v2144_v51 = vsub.s32 4294967266, %v2139_v40 }
 0x314   :  { %v1794_v25 = vsel %vm1790_vm13, %v1778_v10, %v1793_v2  ;;  %2784 = vcosq.f32 %v1948_v33  ;;  %vm4620_vm2 = vcmp.le.f32.partialorder %v2068_v1, 0.7853982  ;;  %v2141_v62 = vshll.u32 %v4559_v55, %v2139_v40 }
 0x315   :  { %v4624_v18 = vmul.u32.u64.low %v1804_v34, %v1799_v47  ;;  %v4625_v42 = vmul.u32.u64.high %v1804_v34, %v1799_v47, %v4624_v18  ;;  %v2142_v4 = vshrl.u32 %v2124_v46, %v2140_v57  ;;  %v2145_v0 = vadd.s32 127, %v2144_v51 }
 0x316   :  { %v1964_v17 = vand.u32 2147483647, %v3980_v52  ;;  %2786 = vsinq.f32 %v1948_v33  ;;  %v1953_v14 = vadd.s32 3, %v1949_v13  ;;  %v2157_v30 = vsel %vm4620_vm2, 0, %v2155_v26 }
 0x317   :  { %v1795_v1 = vsel %vm1789_vm9, %v1792_v56, %v1794_v25  ;;  %v2143_v10 = vor.u32 %v2142_v4, %v2141_v62  ;;  %v2146_v54 = vshll.u32 %v2145_v0, 23  ;;  %vm1813_vm4 = vc.u32 %v4612_v31, %v4624_v18 }
 0x318   :  { %v1981_v55 = vshll.u32 %v2852_v43, %v4488_v8  ;;  %v1814_v28 = vadd.s32 1, %v4625_v42  ;;  %v1982_v60 = vshrl.u32 %v2850_v32, %v4513_v37  ;;  %v1985_v9 = vshrl.u32 %v2851_v36, %v4513_v37 }
 0x319   :  { %v1991_v5 = vshrl.u32 %v2848_v21, %v4513_v37  ;;  %v2147_v7 = vor.u32 4788187, %v2146_v54  ;;  %v1811_v11 = vmul.u32 %v1804_v34, %v1795_v1  ;;  %v1971_v24 = vand.u32 8388607, %v1964_v17 }
 0x31a   :  { %v1988_v50 = vshrl.u32 %v2849_v29, %v4513_v37  ;;  %v1815_v48 = vsel %vm1813_vm4, %v1814_v28, %v4625_v42  ;;  %v1984_v15 = vshll.u32 %v2850_v32, %v4488_v8  ;;  %v1987_v27 = vshll.u32 %v2851_v36, %v4488_v8 }
 0x31b   :  { %v1990_v49 = vshll.u32 %v2849_v29, %v4488_v8  ;;  %v2148_v61 = vand.u32 2147483647, %v2147_v7  ;;  %v2150_v39 = vcvt.s32.f32 %v2143_v10  ;;  %v1816_v38 = vadd.s32 %v1815_v48, %v1811_v11 }
 0x31c   :  { %v1994_v12 = vshrl.u32 %v2853_v53, %v4513_v37  ;;  %v1983_v13 = vor.u32 %v1982_v60, %v1981_v55  ;;  %v1986_v41 = vor.u32 %v1985_v9, %v1984_v15  ;;  %v1993_v22 = vshll.u32 %v2848_v21, %v4488_v8 }
 0x31d   :  { %v1992_v6 = vor.u32 %v1991_v5, %v1990_v49  ;;  %v2151_v2 = vmul.f32 %v2150_v39, %v2148_v61  ;;  %v1817_v20 = vadd.s32 536870912, %v1816_v38  ;;  %v1989_v34 = vor.u32 %v1988_v50, %v1987_v27 }
 0x31e   :  { %v2785_v33 = vpop.eup %2784  ;;  %v1954_v46 = vand.u32 3, %v1953_v14  ;;  %v2161_v47 = vadd.s32 3, %v2157_v30  ;;  %v1980_v40 = vshrl.u32 %v2852_v43, %v4513_v37  ;;  %v1995_v26 = vor.u32 %v1994_v12, %v1993_v22 }
 0x31f   :  { %v2152_v44 = vxor.u32 2147483648, %v2151_v2  ;;  %v4662_v57 = vshrl.u32 %v1817_v20, 30  ;;  %vm1996_vm1 = vcmp.lt.s32.totalorder %v4510_v3, 1  ;;  %vm1999_vm5 = vcmp.lt.s32.totalorder %v4510_v3, 4 }
 0x320   :  { %v2787_v51 = vpop.eup %2786  ;;  %v1972_v56 = vor.u32 8388608, %v1971_v24  ;;  %vm1997_vm8 = vcmp.lt.s32.totalorder %v4510_v3, 2  ;;  %v2004_v8 = vsel %vm1996_vm1, %v1983_v13, %v1986_v41  ;;  %v2005_v25 = vsel %vm1999_vm5, %v1992_v6, 920167782 }
 0x321   :  { %v2153_v42 = vsel %vm2070_vm14, %v2152_v44, %v2151_v2  ;;  %v1819_v37 = vshll.u32 %v4662_v57, 30  ;;  %vm1998_vm10 = vcmp.lt.s32.totalorder %v4510_v3, 3  ;;  %v2001_v62 = vsel %vm1999_vm5, %v1989_v34, 2102212464 }
 0x322   :  { %v2156_v4 = vsel %vm4620_vm2, %v3982_v59, %v2153_v42  ;;  %v2006_v0 = vsel %vm1998_vm10, %v1989_v34, %v2005_v25  ;;  %v2008_v14 = vsel %vm1996_vm1, %v1986_v41, %v1989_v34  ;;  %v2009_v30 = vsel %vm1999_vm5, %v1995_v26, 1326507024 }
 0x323   :  { %v1960_v1 = vxor.u32 2147483648, %v2785_v33  ;;  %2788 = vcosq.f32 %v2156_v4  ;;  %v1820_v10 = vsub.s32 %v1816_v38, %v1819_v37  ;;  %v2007_v54 = vsel %vm1997_vm8, %v2004_v8, %v2006_v0 }
 0x324   :  { %v1957_v55 = vxor.u32 2147483648, %v2787_v51  ;;  %2790 = vsinq.f32 %v2156_v4  ;;  %v2010_v28 = vsel %vm1998_vm10, %v1992_v6, %v2009_v30  ;;  %v2012_v63 = vshll.u32 %v1972_v56, 8 }
 0x325   :  { %v1822_v60 = vsub.s32 0, %v1820_v10  ;;  %v2000_v9 = vsel %vm1996_vm1, %v1980_v40, %v1983_v13  ;;  %v2002_v5 = vsel %vm1998_vm10, %v1986_v41, %v2001_v62  ;;  %v2011_v7 = vsel %vm1997_vm8, %v2008_v14, %v2010_v28 }
 0x326   :  { %v4690_v11 = vmul.u32.u64.low %v2012_v63, %v2011_v7  ;;  %v4691_v24 = vmul.u32.u64.high %v2012_v63, %v2011_v7, %v4690_v11  ;;  %v4693_v50 = vmul.u32.u64.low %v2012_v63, %v2007_v54  ;;  %v4694_v48 = vmul.u32.u64.high %v2012_v63, %v2007_v54, %v4693_v50 }
 0x327   :  { %v2568_v15 = vmin.u32 %v1822_v60, %v1820_v10  ;;  %vm1956_vm7 = vcmp.eq.s32.totalorder %v1954_v46, 0  ;;  %vm1959_vm14 = vcmp.eq.s32.totalorder %v1954_v46, 2  ;;  %v2003_v27 = vsel %vm1997_vm8, %v2000_v9, %v2002_v5 }
 0x328   :  { %2792 = vtanh.f32 %v3943_v45  ;;  %v1958_v49 = vsel %vm1956_vm7, %v2785_v33, %v1957_v55  ;;  %v1961_v61 = vsel %vm1959_vm14, %v1960_v1, %v2787_v51  ;;  %v2162_v38 = vand.u32 3, %v2161_v47 }
 0x329   :  { %v1824_v39 = vclz %v2568_v15  ;;  %2794 = vtanh.f32 %v3982_v59  ;;  %vm2021_vm11 = vc.u32 %v4691_v24, %v4693_v50  ;;  %v2022_v12 = vadd.s32 1, %v4694_v48 }
 0x32a   :  { %vm1955_vm0 = vcmp.lt.s32.totalorder %v1954_v46, 2  ;;  %v2019_v41 = vmul.u32 %v2012_v63, %v2003_v27  ;;  %v1337_v6 = vmax.f32 %v3943_v45, 0.0  ;;  %v1339_v20 = vmax.f32 %v3982_v59, 0.0 }
 0x32b   :  { %v2569_v13 = vadd.s32 4294967294, %v1824_v39  ;;  %v1962_v3 = vsel %vm1955_vm0, %v1958_v49, %v1961_v61  ;;  %v2023_v22 = vsel %vm2021_vm11, %v2022_v12, %v4694_v48  ;;  %vm1952_vm13 = vweird.f32 %v3943_v45 }
 0x32c   :  { %v2024_v34 = vadd.s32 %v2023_v22, %v2019_v41  ;;  %vm2167_vm3 = vcmp.eq.s32.totalorder %v2162_v38, 2  ;;  %v1812_v46 = vadd.s32 %v4624_v18, %v4612_v31  ;;  %v1963_v26 = vsel %vm1952_vm13, nan, %v1962_v3 }
 0x32d   :  { %v2789_v2 = vpop.eup %2788  ;;  %vm2570_vm9 = vcmp.lt.s32.totalorder %v2569_v13, 0  ;;  %vm2163_vm2 = vcmp.lt.s32.totalorder %v2162_v38, 2  ;;  %vm2164_vm4 = vcmp.eq.s32.totalorder %v2162_v38, 0  ;;  %vm2160_vm1 = vweird.f32 %v3982_v59 }
 0x32e   :  { %v2791_v33 = vpop.eup %2790  ;;  %v2168_v47 = vxor.u32 2147483648, %v2789_v2  ;;  %v1827_v40 = vsel %vm2570_vm9, 0, %v2569_v13  ;;  %v2025_v25 = vadd.s32 536870912, %v2024_v34  ;;  %v2177_v0 = vsel %vm340_vm6, %v1963_v26, %v1337_v6 }
 0x32f   :  { %v2165_v44 = vxor.u32 2147483648, %v2791_v33  ;;  %v1828_v51 = vsub.s32 32, %v1827_v40  ;;  %v1832_v56 = vsub.s32 4294967266, %v1827_v40  ;;  %v1829_v37 = vshll.u32 %v1820_v10, %v1827_v40 }
 0x330   :  { %v2169_v8 = vsel %vm2167_vm3, %v2168_v47, %v2791_v33  ;;  %v2026_v31 = vshrl.u32 %v2025_v25, 30  ;;  %vm4912_vm5 = vcmp.eq.s32.totalorder %v3831_v16, 0  ;;  %vm4913_vm8 = vcmp.eq.s32.totalorder %v3854_v19, 0 }
 0x331   :  { %v2166_v42 = vsel %vm2164_vm4, %v2789_v2, %v2165_v44  ;;  %v1830_v45 = vshrl.u32 %v1812_v46, %v1828_v51  ;;  %v1833_v62 = vadd.s32 127, %v1832_v56  ;;  %vm1758_vm10 = vcmp.lt.s32.totalorder %v3940_v35, 0 }
 0x332   :  { %v2170_v4 = vsel %vm2163_vm2, %v2166_v42, %v2169_v8  ;;  %v2793_v18 = vpop.eup %2792  ;;  %v2027_v28 = vshll.u32 %v2026_v31, 30  ;;  %vm4724_vm14 = vcmp.le.f32.partialorder %v1756_v58, 0.7853982  ;;  %v2020_v13 = vadd.s32 %v4693_v50, %v4691_v24 }
 0x333   :  { %v2171_v14 = vsel %vm2160_vm1, nan, %v2170_v4  ;;  %v1831_v30 = vor.u32 %v1830_v45, %v1829_v37  ;;  %v1834_v1 = vshll.u32 %v1833_v62, 23  ;;  %v2795_v54 = vpop.eup %2794  ;;  %v2193_v10 = vsel %vm4912_vm5, %v2793_v18, %v2177_v0 }
 0x334   :  { %v2179_v55 = vsel %vm341_vm12, %v2171_v14, %v1339_v20  ;;  %v2028_v9 = vsub.s32 %v2024_v34, %v2027_v28  ;;  %v1842_v34 = vsub.s32 4, %v4662_v57  ;;  %v2050_v44 = vsub.s32 4, %v2026_v31 }
 0x335   :  { %v2195_v59 = vsel %vm4913_vm8, %v2795_v54, %v2179_v55  ;;  %v1835_v63 = vor.u32 4788187, %v1834_v1  ;;  %v1838_v7 = vcvt.s32.f32 %v1831_v30  ;;  %vm1966_vm11 = vcmp.lt.s32.totalorder %v3980_v52, 0 }
 0x336   :  { %v2605_v60 = vpack.c.bf16 %v2195_v59, %v2193_v10  ;;  %v2030_v11 = vsub.s32 0, %v2028_v9  ;;  %v1843_v24 = vsel %vm1758_vm10, %v1842_v34, %v4662_v57  ;;  %vm1965_vm0 = vcmp.le.f32.partialorder %v1964_v17, 0.7853982 }
 0x337   :  { %v1836_v5 = vand.u32 2147483647, %v1835_v63  ;;  %v1845_v40 = vsel %vm4724_vm14, 0, %v1843_v24  ;;  %v2051_v42 = vsel %vm1966_vm11, %v2050_v44, %v2026_v31  ;;  %vm1848_vm2 = vweird.f32 %v3940_v35 }
 0x338   :  { %2606 = vmatprep.subr.bf16.mxu1 %v2605_v60  ;;  %v2576_v15 = vmin.u32 %v2030_v11, %v2028_v9  ;;  %v1849_v56 = vadd.s32 3, %v1845_v40  ;;  %v2053_v62 = vsel %vm1965_vm0, 0, %v2051_v42  ;;  %v1336_v59 = vmax.f32 %v3940_v35, 0.0 }
 0x339   :  { %v1839_v48 = vmul.f32 %v1838_v7, %v1836_v5  ;;  %v2057_v18 = vadd.s32 3, %v2053_v62  ;;  %vm2056_vm8 = vweird.f32 %v3980_v52 }
 0x33a   :  { %v2032_v49 = vclz %v2576_v15  ;;  %v1850_v45 = vand.u32 3, %v1849_v56 }
 0x33b   :  { %v1840_v27 = vxor.u32 2147483648, %v1839_v48  ;;  %v2058_v17 = vand.u32 3, %v2057_v18 }
 0x33c   :  { %v2577_v61 = vadd.s32 4294967294, %v2032_v49  ;;  %vm1852_vm13 = vcmp.eq.s32.totalorder %v1850_v45, 0  ;;  %vm1855_vm9 = vcmp.eq.s32.totalorder %v1850_v45, 2  ;;  %vm1851_vm3 = vcmp.lt.s32.totalorder %v1850_v45, 2 }
 0x33d   :  { %v1841_v39 = vsel %vm1758_vm10, %v1840_v27, %v1839_v48  ;;  %vm2063_vm4 = vcmp.eq.s32.totalorder %v2058_v17, 2  ;;  %vm2060_vm1 = vcmp.eq.s32.totalorder %v2058_v17, 0  ;;  %vm2059_vm5 = vcmp.lt.s32.totalorder %v2058_v17, 2 }
 0x33e   :  { %vm2578_vm7 = vcmp.lt.s32.totalorder %v2577_v61, 0  ;;  %v1844_v3 = vsel %vm4724_vm14, %v3940_v35, %v1841_v39  ;;  %vm4916_vm10 = vcmp.eq.s32.totalorder %v3831_v16, 0  ;;  %vm4918_vm14 = vcmask 261120   ;;  %v2201_v39 = vpop.permute.xlu1 %2200 }
 0x33f   :  { %v2035_v38 = vsel %vm2578_vm7, 0, %v2577_v61  ;;  %2796 = vcosq.f32 %v1844_v3  ;;  %vm4917_vm7 = vcmp.eq.s32.totalorder %v3854_v19, 0 }
 0x340   :  { %v2036_v41 = vsub.s32 32, %v2035_v38  ;;  %v2040_v6 = vsub.s32 4294967266, %v2035_v38  ;;  %v2037_v22 = vshll.u32 %v2028_v9, %v2035_v38  ;;  %2798 = vsinq.f32 %v1844_v3 }
 0x341   :  { %v1338_v9 = vmax.f32 %v3980_v52, 0.0 }
 0x342   :  { %v2038_v2 = vshrl.u32 %v2020_v13, %v2036_v41  ;;  %v2041_v20 = vadd.s32 127, %v2040_v6 }
 0x344   :  { %v2039_v33 = vor.u32 %v2038_v2, %v2037_v22  ;;  %v2042_v58 = vshll.u32 %v2041_v20, 23 }
 0x346   :  { %v2043_v47 = vor.u32 4788187, %v2042_v58  ;;  %v2046_v46 = vcvt.s32.f32 %v2039_v33 }
 0x348   :  { %v2044_v50 = vand.u32 2147483647, %v2043_v47 }
 0x349   :  { %v2797_v8 = vpop.eup %2796 }
 0x34a   :  { %v2047_v26 = vmul.f32 %v2046_v46, %v2044_v50  ;;  %v2799_v37 = vpop.eup %2798  ;;  %v1856_v0 = vxor.u32 2147483648, %v2797_v8 }
 0x34b   :  { %v1853_v4 = vxor.u32 2147483648, %v2799_v37 }
 0x34c   :  { %v2048_v51 = vxor.u32 2147483648, %v2047_v26  ;;  %v1857_v30 = vsel %vm1855_vm9, %v1856_v0, %v2799_v37 }
 0x34d   :  { %v1854_v14 = vsel %vm1852_vm13, %v2797_v8, %v1853_v4 }
 0x34e   :  { %v2049_v25 = vsel %vm1966_vm11, %v2048_v51, %v2047_v26  ;;  %v1858_v31 = vsel %vm1851_vm3, %v1854_v14, %v1857_v30 }
 0x34f   :  { %v2052_v57 = vsel %vm1965_vm0, %v3980_v52, %v2049_v25  ;;  %v1859_v28 = vsel %vm1848_vm2, nan, %v1858_v31 }
 0x350   :  { %2800 = vcosq.f32 %v2052_v57  ;;  %v2176_v7 = vsel %vm340_vm6, %v1859_v28, %v1336_v59 }
 0x351   :  { %2802 = vsinq.f32 %v2052_v57 }
 0x352   :  { %2804 = vtanh.f32 %v3940_v35 }
 0x353   :  { %2806 = vtanh.f32 %v3980_v52  ;;  %v2196_v52 = vld [vmem:[%s4877_s5] sm:$0x3]  ;;  %s2855_s5 = smov [#allocation2]  }
 0x354   :  { %s2507_s10 = sshll.u32 %s2855_s5, 4  ;;  %s2508_s10 = int_to_ptr.vmem [resolvable:$true] %s2507_s10 }
 0x355   :  { %s2820_s11 = scalar_lea.vmem %s2508_s10, 64  ;;  %p2825_p1 = scmp.lt.s32.totalorder %s2508_s10, %s2508_s10 }
 0x356   :  { %p2821_p0 = scmp.ne.s32.totalorder %s2508_s10, %s2820_s11  ;;  %p2826_p2 = scmp.lt.s32.totalorder %s2820_s11, %s2820_s11 }
 0x358   :  { %p2827_p3 = por %p2826_p2, %p2825_p1 }
 0x35a   :  { %v2801_v1 = vpop.eup %2800  ;;  %p2828_p4 = pnand %p2827_p3, %p2821_p0 }
 0x35b   :  { %v2803_v54 = vpop.eup %2802  ;;  %v2064_v55 = vxor.u32 2147483648, %v2801_v1 }
 0x35c   :  { %v2061_v10 = vxor.u32 2147483648, %v2803_v54  ;;  %v2805_v11 = vpop.eup %2804 }
 0x35d   :  { %v2065_v63 = vsel %vm2063_vm4, %v2064_v55, %v2803_v54  ;;  %v2807_v15 = vpop.eup %2806  ;;  %v2192_v35 = vsel %vm4916_vm10, %v2805_v11, %v2176_v7 }
 0x35e   :  { %v2062_v60 = vsel %vm2060_vm1, %v2801_v1, %v2061_v10 }
 0x35f   :  { %v2066_v5 = vsel %vm2059_vm5, %v2062_v60, %v2065_v63 }
 0x360   :  { %v2067_v48 = vsel %vm2056_vm8, nan, %v2066_v5 }
 0x361   :  { %v2178_v27 = vsel %vm341_vm12, %v2067_v48, %v1338_v9 }
 0x362   :  { %v2194_v49 = vsel %vm4917_vm7, %v2807_v15, %v2178_v27 }
 0x363   :  { %v2607_v61 = vpack.c.bf16 %v2194_v49, %v2192_v35 }
 0x365   :  { %2608 = vmatpush1.bf16.msra.mxu1 %v2607_v61 }
 0x368   :  { %2583 = vmatmul.mubr.msk.f32.vlgmr.msra.gmra.mrb[0].mxu1 %vm4918_vm14, %v2196_v52 }
 0x43b   :  { %v2272_v38 = vpop.f32.mrb[0].mxu1 }
 0x43c   :  { %v4761_v12 = vadd.f32 %v2272_v38, %v2201_v39  ;;  %v2274_v13 = vpop.f32.mrb[1].mxu1 }
 0x43d   :  { %v4763_v41 = vadd.f32 %v2274_v13, %v2201_v39 }
 0x43e   :  { %v2280_v16 = vand.u32 2139095040, %v4761_v12  ;;  %v2277_v19 = vand.u32 2147483647, %v4761_v12  ;;  %vm2279_vm14 = vcmp.lt.s32.totalorder %v4761_v12, 0 }
 0x43f   :  { %v2384_v6 = vand.u32 2139095040, %v4763_v41  ;;  %v2381_v34 = vand.u32 2147483647, %v4763_v41 }
 0x440   :  { %v2281_v3 = vshrl.u32 %v2280_v16, 23  ;;  %v2284_v20 = vand.u32 8388607, %v2277_v19 }
 0x441   :  { %v2385_v22 = vshrl.u32 %v2384_v6, 23  ;;  %v4773_v50 = vand.u32 8388607, %v2381_v34 }
 0x442   :  { %v2584_v2 = vadd.s32 4294967169, %v2281_v3  ;;  %v2285_v24 = vor.u32 8388608, %v2284_v20 }
 0x443   :  { %v2588_v33 = vadd.s32 4294967169, %v2385_v22  ;;  %v2389_v42 = vor.u32 8388608, %v4773_v50 }
 0x444   :  { %v2287_v58 = vadd.s32 1, %v2584_v2  ;;  %v4777_v25 = vshll.u32 %v2285_v24, 8 }
 0x445   :  { %v2391_v47 = vadd.s32 1, %v2588_v33 }
 0x446   :  { %vm2288_vm6 = vcmp.gt.s32.totalorder %v2287_v58, 0 }
 0x447   :  { %v2289_v46 = vsel %vm2288_vm6, %v2287_v58, 0  ;;  %vm2392_vm12 = vcmp.gt.s32.totalorder %v2391_v47, 0  ;;  %vm2278_vm6 = vcmp.le.f32.partialorder %v2277_v19, 0.7853982 }
 0x448   :  { %v2290_v40 = vshrl.u32 %v2289_v46, 5  ;;  %v2291_v26 = vand.u32 31, %v2289_v46  ;;  %v2393_v44 = vsel %vm2392_vm12, %v2391_v47, 0  ;;  %vm2383_vm12 = vcmp.lt.s32.totalorder %v4763_v41, 0 }
 0x449   :  { %v2395_v51 = vand.u32 31, %v2393_v44  ;;  %v4775_v8 = vshrl.u32 %v2393_v44, 5 }
 0x44a   :  { %v2292_v56 = vsub.s32 32, %v2291_v26  ;;  %v2303_v37 = vshll.u32 %v2849_v29, %v2291_v26  ;;  %v2306_v57 = vshll.u32 %v2848_v21, %v2291_v26  ;;  %vm2312_vm11 = vcmp.lt.s32.totalorder %v2290_v40, 4 }
 0x44b   :  { %v2396_v45 = vsub.s32 32, %v2395_v51  ;;  %v2407_v0 = vshll.u32 %v2849_v29, %v2395_v51  ;;  %v2410_v18 = vshll.u32 %v2848_v21, %v2395_v51  ;;  %v2294_v17 = vshll.u32 %v2852_v43, %v2291_v26 }
 0x44c   :  { %v2304_v62 = vshrl.u32 %v2848_v21, %v2292_v56  ;;  %v2307_v4 = vshrl.u32 %v2853_v53, %v2292_v56  ;;  %v2295_v31 = vshrl.u32 %v2850_v32, %v2292_v56  ;;  %v2297_v55 = vshll.u32 %v2850_v32, %v2291_v26 }
 0x44d   :  { %v2408_v14 = vshrl.u32 %v2848_v21, %v2396_v45  ;;  %v2411_v30 = vshrl.u32 %v2853_v53, %v2396_v45  ;;  %v2298_v28 = vshrl.u32 %v2851_v36, %v2292_v56  ;;  %vm2416_vm0 = vcmp.lt.s32.totalorder %v4775_v8, 4 }
 0x44e   :  { %v2305_v1 = vor.u32 %v2304_v62, %v2303_v37  ;;  %v2308_v54 = vor.u32 %v2307_v4, %v2306_v57  ;;  %v2296_v10 = vor.u32 %v2295_v31, %v2294_v17  ;;  %v2300_v59 = vshll.u32 %v2851_v36, %v2291_v26 }
 0x44f   :  { %v2301_v63 = vshrl.u32 %v2849_v29, %v2292_v56  ;;  %v2293_v60 = vshrl.u32 %v2852_v43, %v2292_v56  ;;  %v2299_v9 = vor.u32 %v2298_v28, %v2297_v55  ;;  %v2409_v5 = vor.u32 %v2408_v14, %v2407_v0 }
 0x450   :  { %v2318_v21 = vsel %vm2312_vm11, %v2305_v1, 920167782  ;;  %v2322_v53 = vsel %vm2312_vm11, %v2308_v54, 1326507024  ;;  %v2412_v7 = vor.u32 %v2411_v30, %v2410_v18  ;;  %vm2309_vm13 = vcmp.lt.s32.totalorder %v2290_v40, 1 }
 0x451   :  { %v2302_v11 = vor.u32 %v2301_v63, %v2300_v59  ;;  %vm2310_vm9 = vcmp.lt.s32.totalorder %v2290_v40, 2  ;;  %vm2311_vm3 = vcmp.lt.s32.totalorder %v2290_v40, 3  ;;  %v2313_v48 = vsel %vm2309_vm13, %v2293_v60, %v2296_v10 }
 0x452   :  { %v2317_v15 = vsel %vm2309_vm13, %v2296_v10, %v2299_v9  ;;  %v2323_v61 = vsel %vm2311_vm3, %v2305_v1, %v2322_v53  ;;  %v2398_v13 = vshll.u32 %v2852_v43, %v2395_v51  ;;  %v2399_v22 = vshrl.u32 %v2850_v32, %v2396_v45 }
 0x453   :  { %v2314_v27 = vsel %vm2312_vm11, %v2302_v11, 2102212464  ;;  %v2319_v35 = vsel %vm2311_vm3, %v2302_v11, %v2318_v21  ;;  %v2321_v49 = vsel %vm2309_vm13, %v2299_v9, %v2302_v11  ;;  %v2426_v2 = vsel %vm2416_vm0, %v2412_v7, 1326507024 }
 0x454   :  { %v2315_v52 = vsel %vm2311_vm3, %v2299_v9, %v2314_v27  ;;  %v2320_v39 = vsel %vm2310_vm9, %v2317_v15, %v2319_v35  ;;  %v2324_v38 = vsel %vm2310_vm9, %v2321_v49, %v2323_v61  ;;  %v2401_v58 = vshll.u32 %v2850_v32, %v2395_v51 }
 0x455   :  { %v2316_v16 = vsel %vm2310_vm9, %v2313_v48, %v2315_v52  ;;  %v4801_v6 = vmul.u32.u64.low %v4777_v25, %v2324_v38  ;;  %v4802_v3 = vmul.u32.u64.high %v4777_v25, %v2324_v38, %v4801_v6  ;;  %v2400_v47 = vor.u32 %v2399_v22, %v2398_v13 }
 0x456   :  { %v4808_v20 = vmul.u32.u64.low %v4777_v25, %v2320_v39  ;;  %v4809_v33 = vmul.u32.u64.high %v4777_v25, %v2320_v39, %v4808_v20  ;;  %v2402_v24 = vshrl.u32 %v2851_v36, %v2396_v45  ;;  %v2404_v50 = vshll.u32 %v2851_v36, %v2395_v51 }
 0x457   :  { %v2405_v46 = vshrl.u32 %v2849_v29, %v2396_v45  ;;  %v2422_v40 = vsel %vm2416_vm0, %v2409_v5, 920167782  ;;  %v2332_v26 = vmul.u32 %v4777_v25, %v2316_v16  ;;  %v2397_v44 = vshrl.u32 %v2852_v43, %v2396_v45 }
 0x458   :  { %v2429_v56 = vshll.u32 %v2389_v42, 8  ;;  %vm2334_vm2 = vc.u32 %v4802_v3, %v4808_v20  ;;  %v2403_v37 = vor.u32 %v2402_v24, %v2401_v58  ;;  %vm2415_vm4 = vcmp.lt.s32.totalorder %v4775_v8, 3 }
 0x459   :  { %v2406_v57 = vor.u32 %v2405_v46, %v2404_v50  ;;  %v2335_v32 = vadd.s32 1, %v4809_v33  ;;  %vm2413_vm1 = vcmp.lt.s32.totalorder %v4775_v8, 1  ;;  %vm2414_vm5 = vcmp.lt.s32.totalorder %v4775_v8, 2 }
 0x45a   :  { %v2427_v29 = vsel %vm2415_vm4, %v2409_v5, %v2426_v2  ;;  %v2421_v51 = vsel %vm2413_vm1, %v2400_v47, %v2403_v37  ;;  %v2417_v45 = vsel %vm2413_vm1, %v2397_v44, %v2400_v47  ;;  %v2333_v49 = vadd.s32 %v4808_v20, %v4802_v3 }
 0x45b   :  { %v2418_v36 = vsel %vm2416_vm0, %v2406_v57, 2102212464  ;;  %v2423_v25 = vsel %vm2415_vm4, %v2406_v57, %v2422_v40  ;;  %v2425_v43 = vsel %vm2413_vm1, %v2403_v37, %v2406_v57  ;;  %v2336_v42 = vsel %vm2334_vm2, %v2335_v32, %v4809_v33 }
 0x45c   :  { %v2424_v62 = vsel %vm2414_vm5, %v2421_v51, %v2423_v25  ;;  %v2428_v4 = vsel %vm2414_vm5, %v2425_v43, %v2427_v29  ;;  %v2337_v0 = vadd.s32 %v2336_v42, %v2332_v26  ;;  %v2419_v18 = vsel %vm2415_vm4, %v2403_v37, %v2418_v36 }
 0x45d   :  { %v4831_v14 = vmul.u32.u64.low %v2429_v56, %v2428_v4  ;;  %v4832_v30 = vmul.u32.u64.high %v2429_v56, %v2428_v4, %v4831_v14  ;;  %v4834_v17 = vmul.u32.u64.low %v2429_v56, %v2424_v62  ;;  %v4835_v31 = vmul.u32.u64.high %v2429_v56, %v2424_v62, %v4834_v17 }
 0x45e   :  { %v2338_v1 = vadd.s32 536870912, %v2337_v0  ;;  %v2420_v54 = vsel %vm2414_vm5, %v2417_v45, %v2419_v18  ;;  %vm2382_vm11 = vcmp.le.f32.partialorder %v2381_v34, 0.7853982  ;;  %vm2369_vm3 = vweird.f32 %v4761_v12 }
 0x45f   :  { %vm2438_vm8 = vc.u32 %v4832_v30, %v4834_v17  ;;  %v2439_v28 = vadd.s32 1, %v4835_v31  ;;  %v2436_v59 = vmul.u32 %v2429_v56, %v2420_v54  ;;  %v2437_v46 = vadd.s32 %v4834_v17, %v4832_v30 }
 0x460   :  { %v2339_v55 = vshrl.u32 %v2338_v1, 30  ;;  %vm2473_vm5 = vweird.f32 %v4763_v41 }
 0x461   :  { %v2440_v63 = vsel %vm2438_vm8, %v2439_v28, %v4835_v31 }
 0x462   :  { %v2340_v10 = vshll.u32 %v2339_v55, 30  ;;  %v2441_v53 = vadd.s32 %v2440_v63, %v2436_v59  ;;  %v2363_v57 = vsub.s32 4, %v2339_v55 }
 0x464   :  { %v2341_v21 = vsub.s32 %v2337_v0, %v2340_v10  ;;  %v2442_v9 = vadd.s32 536870912, %v2441_v53  ;;  %v2364_v43 = vsel %vm2279_vm14, %v2363_v57, %v2339_v55 }
 0x465   :  { %v2366_v62 = vsel %vm2278_vm6, 0, %v2364_v43 }
 0x466   :  { %v2343_v60 = vsub.s32 0, %v2341_v21  ;;  %v2443_v7 = vshrl.u32 %v2442_v9, 30  ;;  %v2370_v14 = vadd.s32 3, %v2366_v62 }
 0x468   :  { %v2585_v5 = vmin.u32 %v2343_v60, %v2341_v21  ;;  %v2444_v48 = vshll.u32 %v2443_v7, 30  ;;  %v2467_v0 = vsub.s32 4, %v2443_v7  ;;  %v2371_v1 = vand.u32 3, %v2370_v14 }
 0x46a   :  { %v2345_v11 = vclz %v2585_v5  ;;  %v2445_v8 = vsub.s32 %v2441_v53, %v2444_v48  ;;  %v2468_v30 = vsel %vm2383_vm12, %v2467_v0, %v2443_v7  ;;  %vm2373_vm0 = vcmp.eq.s32.totalorder %v2371_v1, 0 }
 0x46b   :  { %v2470_v54 = vsel %vm2382_vm11, 0, %v2468_v30  ;;  %vm2376_vm13 = vcmp.eq.s32.totalorder %v2371_v1, 2  ;;  %vm2372_vm9 = vcmp.lt.s32.totalorder %v2371_v1, 2 }
 0x46c   :  { %v2586_v15 = vadd.s32 4294967294, %v2345_v11  ;;  %v2447_v35 = vsub.s32 0, %v2445_v8  ;;  %v2474_v59 = vadd.s32 3, %v2470_v54 }
 0x46e   :  { %vm2587_vm10 = vcmp.lt.s32.totalorder %v2586_v15, 0  ;;  %v2589_v39 = vmin.u32 %v2447_v35, %v2445_v8 }
 0x46f   :  { %v2348_v27 = vsel %vm2587_vm10, 0, %v2586_v15 }
 0x470   :  { %v2349_v61 = vsub.s32 32, %v2348_v27  ;;  %v2353_v52 = vsub.s32 4294967266, %v2348_v27  ;;  %v2350_v38 = vshll.u32 %v2341_v21, %v2348_v27  ;;  %v2449_v6 = vclz %v2589_v39 }
 0x471   :  { %v2475_v21 = vand.u32 3, %v2474_v59 }
 0x472   :  { %v2351_v13 = vshrl.u32 %v2333_v49, %v2349_v61  ;;  %v2354_v16 = vadd.s32 127, %v2353_v52  ;;  %v2590_v33 = vadd.s32 4294967294, %v2449_v6 }
 0x473   :  { %vm2480_vm2 = vcmp.eq.s32.totalorder %v2475_v21, 2  ;;  %vm2477_vm4 = vcmp.eq.s32.totalorder %v2475_v21, 0  ;;  %vm2476_vm1 = vcmp.lt.s32.totalorder %v2475_v21, 2 }
 0x474   :  { %v2352_v22 = vor.u32 %v2351_v13, %v2350_v38  ;;  %v2355_v2 = vshll.u32 %v2354_v16, 23  ;;  %vm2591_vm7 = vcmp.lt.s32.totalorder %v2590_v33, 0 }
 0x475   :  { %v2452_v50 = vsel %vm2591_vm7, 0, %v2590_v33 }
 0x476   :  { %v2356_v58 = vor.u32 4788187, %v2355_v2  ;;  %v2359_v24 = vcvt.s32.f32 %v2352_v22  ;;  %v2453_v40 = vsub.s32 32, %v2452_v50  ;;  %v2457_v26 = vsub.s32 4294967266, %v2452_v50 }
 0x477   :  { %v2454_v20 = vshll.u32 %v2445_v8, %v2452_v50 }
 0x478   :  { %v2357_v47 = vand.u32 2147483647, %v2356_v58  ;;  %v2455_v44 = vshrl.u32 %v2437_v46, %v2453_v40  ;;  %v2458_v56 = vadd.s32 127, %v2457_v26 }
 0x47a   :  { %v2360_v3 = vmul.f32 %v2359_v24, %v2357_v47  ;;  %v2456_v32 = vor.u32 %v2455_v44, %v2454_v20  ;;  %v2459_v29 = vshll.u32 %v2458_v56, 23 }
 0x47c   :  { %v2361_v37 = vxor.u32 2147483648, %v2360_v3  ;;  %v2460_v25 = vor.u32 4788187, %v2459_v29  ;;  %v2463_v45 = vcvt.s32.f32 %v2456_v32 }
 0x47e   :  { %v2362_v36 = vsel %vm2279_vm14, %v2361_v37, %v2360_v3  ;;  %v2461_v42 = vand.u32 2147483647, %v2460_v25 }
 0x47f   :  { %v2365_v51 = vsel %vm2278_vm6, %v4761_v12, %v2362_v36 }
 0x480   :  { %2808 = vcosq.f32 %v2365_v51  ;;  %v2464_v4 = vmul.f32 %v2463_v45, %v2461_v42 }
 0x481   :  { %2810 = vsinq.f32 %v2365_v51 }
 0x482   :  { %v2465_v18 = vxor.u32 2147483648, %v2464_v4 }
 0x484   :  { %v2466_v19 = vsel %vm2383_vm12, %v2465_v18, %v2464_v4 }
 0x485   :  { %v2469_v17 = vsel %vm2382_vm11, %v4763_v41, %v2466_v19 }
 0x486   :  { %2812 = vcosq.f32 %v2469_v17 }
 0x487   :  { %2814 = vsinq.f32 %v2469_v17 }
 0x488   :  { %2816 = vtanh.f32 %v4761_v12 }
 0x489   :  { %2818 = vtanh.f32 %v4763_v41 }
 0x48a   :  { %v2809_v31 = vpop.eup %2808 }
 0x48b   :  { %v2811_v55 = vpop.eup %2810  ;;  %v2377_v28 = vxor.u32 2147483648, %v2809_v31 }
 0x48c   :  { %v2374_v10 = vxor.u32 2147483648, %v2811_v55 }
 0x48d   :  { %v2378_v63 = vsel %vm2376_vm13, %v2377_v28, %v2811_v55 }
 0x48e   :  { %v2375_v34 = vsel %vm2373_vm0, %v2809_v31, %v2374_v10 }
 0x48f   :  { %v2379_v53 = vsel %vm2372_vm9, %v2375_v34, %v2378_v63 }
 0x490   :  { %v2813_v60 = vpop.eup %2812  ;;  %v2380_v7 = vsel %vm2369_vm3, nan, %v2379_v53 }
 0x491   :  { %v2815_v9 = vpop.eup %2814  ;;  %v2481_v5 = vxor.u32 2147483648, %v2813_v60 }
 0x492   :  { %v2478_v11 = vxor.u32 2147483648, %v2815_v9  ;;  %v2817_v15 = vpop.eup %2816 }
 0x493   :  { %v2482_v48 = vsel %vm2480_vm2, %v2481_v5, %v2815_v9  ;;  %v2487_v35 = vsel %vm1182_vm15, %v2817_v15, %v2380_v7  ;;  %v2819_v49 = vpop.eup %2818 }
 0x494   :  { %v2479_v8 = vsel %vm2477_vm4, %v2813_v60, %v2478_v11 }
 0x495   :  { %v2483_v27 = vsel %vm2476_vm1, %v2479_v8, %v2482_v48 }
 0x496   :  { %v2484_v61 = vsel %vm2473_vm5, nan, %v2483_v27 }
 0x497   :  { %v2488_v12 = vsel %vm1182_vm15, %v2819_v49, %v2484_v61 }
 0x498   :  { %v2491_v52 = vcombine.low %v2487_v35, %v2488_v12 }
 0x49a   :  { %2592 = vst.sshfl [vmem:[#allocation2] sm:$0x33 pattern:$0x76325410] %v2491_v52 }
 0x49b   :  { %2831 = shalt.err (!%p2828_p4)
}
 0x49c   :  { %s2832_s13 = scalar_lea.hbm %s4879_s7, 64 }
 0x49d   :  { %p2833_p5 = scmp.ne.s32.totalorder %s4879_s7, %s2832_s13  ;;  %p2836_p6 = scmp.lt.u32.totalorder %s2832_s13, %s4879_s7 }
 0x49f   :  { %p2838_p7 = pnand %p2836_p6, %p2833_p5 }
 0x4a1   :  { %2841 = shalt.err (!%p2838_p7)
}
 0x4a2   :  { %2510 = dma.vmem_to_hbm [thread:$0]  %s2508_s10, 64, %s4879_s7, [#allocation3]  }
 0x4a3   :  { %2842 = dma.done.wait [#allocation3], 64  }
 0x4a4   :  { %2843 = vsyncadd [#allocation3], 4294967232 }
 0x4a5   :  { %2514 = vsyncpa [#allocation3], 1 }

</bundles_post_ra>
